<compile_context>
chip_gen: v5e
topology: v5e:2x2
jax: 0.10.0
libtpu: 0.0.40
codegen_flags: <defaults>
</compile_context>

<pallas_src>
import jax
import jax.numpy as jnp
from jax import lax
from jax.experimental import pallas as pl
from jax.experimental.pallas import tpu as pltpu


def _round_up(a, m):
    return (a + m - 1) // m * m


# ---------------------------------------------------------------------------
# Pallas kernel: one batch tile per grid step.
# ---------------------------------------------------------------------------
def ctc_kernel(x_ref, wih0_ref, whh0_ref, b0_ref, w1_ref, b1_ref,
               out_ref, xproj_ref, seq_ref):
    T, BT, D = x_ref.shape
    Hp = seq_ref.shape[2]          # lane-padded state width (multiple of 128)
    Gp = xproj_ref.shape[2]        # lane-padded gate-vector width
    L = out_ref.shape[1]           # out_seq_len
    H = L + 1                      # real hidden size (incl. blank)
    packed = (Gp == Hp)            # all four gates packed into one 128-lane group
    gs = H if packed else Hp       # lane stride between gate blocks
    f32 = jnp.float32
    bf16 = jnp.bfloat16

    xb = x_ref[...]                                    # (T, BT, D) f32

    # ---- layer-1 input projection for all timesteps (off the recurrence path) ----
    xp = jnp.dot(xb.astype(bf16).reshape(T * BT, D), wih0_ref[...],
                 preferred_element_type=f32) + b0_ref[...]
    xproj_ref[...] = xp.reshape(T, BT, Gp).astype(xproj_ref.dtype)

    whh0 = whh0_ref[...]                               # (Hp, Gp) bf16
    w1 = w1_ref[...]                                   # (2Hp, Gp) bf16 fused [Wih1; Whh1]
    # hoisted: broadcast_in_dim is not CSE'd, so do it once, not T times
    b1b = jnp.broadcast_to(b1_ref[...], (BT, Gp))      # (BT, Gp) f32

    glane = lax.broadcasted_iota(jnp.int32, (1, Gp), 1)
    g_block = (glane >= 2 * gs) & (glane < 3 * gs)     # lanes of the tanh ("g") gate
    state_valid = lax.broadcasted_iota(jnp.int32, (1, Hp), 1) < H

    def lstm_update(g, c):
        # Single EUP pass: tanh(x) = 2*sigmoid(2x) - 1 on the g-gate lanes only.
        s = jax.nn.sigmoid(jnp.where(g_block, g + g, g))
        a = jnp.where(g_block, s + s - f32(1.0), s)
        if packed:
            # gates live at lane offsets [0, gs, 2gs, 3gs): realign with XLU rolls
            i = a
            f = pltpu.roll(a, Gp - gs, axis=1)
            gg = pltpu.roll(a, Gp - 2 * gs, axis=1)
            o = pltpu.roll(a, Gp - 3 * gs, axis=1)
        else:
            # lane-aligned 128-wide gate groups, PyTorch order [i, f, g, o]
            i, f, gg, o = (a[:, 0:Hp], a[:, Hp:2 * Hp],
                           a[:, 2 * Hp:3 * Hp], a[:, 3 * Hp:4 * Hp])
        i = jnp.where(state_valid, i, f32(0.0))        # keep padded state lanes exactly 0
        c = f * c + i * gg
        h = o * jnp.tanh(c)
        return h, c

    def step(t, carry):
        h1, c1, h2, c2 = carry
        # layer 1: only the recurrent matmul is on the critical path
        g1 = xproj_ref[t].astype(f32) + jnp.dot(h1, whh0, preferred_element_type=f32)
        h1f, c1 = lstm_update(g1, c1)
        h1 = h1f.astype(bf16)
        # layer 2: single fused matmul over [h1, h2]
        g2 = jnp.dot(jnp.concatenate([h1, h2], axis=1), w1,
                     preferred_element_type=f32) + b1b
        h2f, c2 = lstm_update(g2, c2)
        h2 = h2f.astype(bf16)
        seq_ref[t] = h2                                # full (BT, Hp) tile store
        return (h1, c1, h2, c2)

    zb = jnp.zeros((BT, Hp), bf16)
    zf = jnp.zeros((BT, Hp), f32)
    unroll = True if T <= 16 else 4                    # full unroll only for short T
    lax.fori_loop(0, T, step, (zb, zf, zb, zf), unroll=unroll)

    # ---- softmax over the real H lanes (blank is the LAST real lane, see wrapper) ----
    logits = seq_ref[...].astype(f32)                  # (T, BT, Hp)
    valid = lax.broadcasted_iota(jnp.int32, (1, 1, Hp), 2) < H
    neg = jnp.finfo(f32).min
    m = jnp.max(jnp.where(valid, logits, neg), axis=-1, keepdims=True)
    e = jnp.where(valid, jnp.exp(logits - m), f32(0.0))
    probs = e / jnp.sum(e, axis=-1, keepdims=True)
    probs_nb = probs[:, :, :L]                         # drop blank: offset-0 lane slice

    # ---- pseudo-aligned output: one (L, T)@(T, D) contraction, batched over BT ----
    out = lax.dot_general(probs_nb, xb,
                          dimension_numbers=(((0,), (0,)), ((1,), (1,))),
                          preferred_element_type=f32)  # (BT, L, D)
    out_ref[...] = out.astype(out_ref.dtype)


# ---------------------------------------------------------------------------
# Wrapper
# ---------------------------------------------------------------------------
def ctc_module_forward(x, params, b_tile=None):
    B, T, D = x.shape
    H = params["whh0"].shape[1]        # (4H, H) -> H = out_seq_len + 1
    L = H - 1
    Hp = _round_up(H, 128)             # lane-aligned state width
    packed = (4 * H <= 128)            # pack all gates into one 128-lane group
    gs = H if packed else Hp
    Gp = Hp if packed else 4 * Hp
    f32, bf16 = jnp.float32, jnp.bfloat16

    # Blank-last permutation of the layer-2 hidden units: new lane j = old unit
    # (j+1) % H, so softmax lanes [0, L) are the non-blank classes in order and the
    # epilogue slice probs[:, :, :L] is an offset-0 (rotate-free) lane slice.
    perm = (jnp.arange(H) + 1) % H

    def gate_cols(w_t, hperm=None):
        # (R, 4H) -> (R, Gp): gate blocks at lane offsets k*gs, zeros elsewhere.
        # Zero padding keeps the padded h/c lanes exactly 0 (with the in-kernel i-mask),
        # so real-lane semantics match the unpadded LSTM.
        R = w_t.shape[0]
        blocks = w_t.reshape(R, 4, H)
        if hperm is not None:
            blocks = blocks[:, :, hperm]
        out = jnp.zeros((R, Gp), f32)
        for k in range(4):
            out = out.at[:, k * gs:k * gs + H].set(blocks[:, k])
        return out

    def pad_rows(w, rows):
        return jnp.zeros((rows, w.shape[1]), w.dtype).at[:w.shape[0]].set(w)

    # Weights transposed so the kernel does x @ W; bf16 operands for the MXU.
    wih0 = gate_cols(params["wih0"].T.astype(f32)).astype(bf16)                # (D, Gp)
    whh0 = pad_rows(gate_cols(params["whh0"].T.astype(f32)), Hp).astype(bf16)  # (Hp, Gp)
    b0 = gate_cols((params["bih0"] + params["bhh0"])[None, :].astype(f32))     # (1, Gp) f32

    wih1 = pad_rows(gate_cols(params["wih1"].T.astype(f32), perm), Hp)
    whh1_t = params["whh1"].T.astype(f32)[perm, :]       # permute recurrent input rows too
    whh1 = pad_rows(gate_cols(whh1_t, perm), Hp)
    w1 = jnp.concatenate([wih1, whh1], axis=0).astype(bf16)                    # (2Hp, Gp)
    b1 = gate_cols((params["bih1"] + params["bhh1"])[None, :].astype(f32), perm)  # (1, Gp)

    # ---- batch tile: fill the MXU, keep >=2 grid steps when possible (v7x 2 TCs),
    #      shrink until the VMEM footprint fits a chip-safe budget. ----
    if b_tile is None:
        B8 = _round_up(B, 8)
        if B8 >= 512:
            b_tile = 256                         # 256-row MXU on v6e/v7x
        elif B8 >= 256:
            b_tile = 128
        elif B8 >= 16:
            b_tile = _round_up(B8 // 2, 8)       # >= 2 grid steps -> both v7x cores busy
        else:
            b_tile = B8
    b_tile = max(8, _round_up(b_tile, 8))

    def _vmem_est(bt):
        it = x.dtype.itemsize
        return (2 * T * _round_up(bt, 8) * _round_up(D, 128) * it           # x block (dbl buf)
                + 2 * bt * _round_up(L, 8) * _round_up(D, 128) * it         # out block (dbl buf)
                + 2 * (_round_up(D, 8) * Gp + Hp * Gp + 2 * Hp * Gp) * 2    # bf16 weights (dbl buf)
                + 2 * 2 * 8 * Gp * 4                                        # biases
                + T * _round_up(bt, 8) * Gp * 2                             # xproj scratch (bf16)
                + T * _round_up(bt, 8) * Hp * 2)                            # seq scratch (bf16)

    while b_tile > 8 and _vmem_est(b_tile) > (48 << 20):   # leave headroom under v7x 64 MiB
        b_tile = max(8, _round_up(b_tile // 2, 8))
    Bp = _round_up(B, b_tile)
    vmem_limit = min(64 << 20, max(32 << 20, int(1.25 * _vmem_est(b_tile)) + (4 << 20)))

    # Time-major x, batch padded up to a multiple of the batch tile.
    xt = jnp.transpose(x, (1, 0, 2))                                       # (T, B, D)
    if Bp != B:
        xt = jnp.pad(xt, ((0, 0), (0, Bp - B), (0, 0)))

    # NOTE: weight inputs are grid-invariant; bf16 halves their (double-buffered) VMEM.
    full = lambda a: pl.BlockSpec(a.shape, lambda b: (0,) * a.ndim)

    out = pl.pallas_call(
        ctc_kernel,
        out_shape=jax.ShapeDtypeStruct((Bp, L, D), x.dtype),
        grid=(Bp // b_tile,),
        in_specs=[
            pl.BlockSpec((T, b_tile, D), lambda b: (0, b, 0)),             # x (time-major)
            full(wih0), full(whh0), full(b0), full(w1), full(b1),
        ],
        out_specs=pl.BlockSpec((b_tile, L, D), lambda b: (b, 0, 0)),
        scratch_shapes=[
            pltpu.VMEM((T, b_tile, Gp), jnp.bfloat16),                     # x @ Wih0 + b0
            pltpu.VMEM((T, b_tile, Hp), jnp.bfloat16),                     # layer-2 h history
        ],
        compiler_params=pltpu.CompilerParams(
            dimension_semantics=("parallel",),                             # batch tiles independent
            vmem_limit_bytes=vmem_limit),
    )(xt, wih0, whh0, b0, w1, b1)

    return out[:B]


# ---------------------------------------------------------------------------
# Pure-JAX reference (mirrors torch.nn.LSTM semantics) for verification.
# ---------------------------------------------------------------------------
def _lstm_layer_ref(x, wih, whh, bih, bhh):
    B, T, _ = x.shape
    H = whh.shape[1]

    def cell(carry, x_t):
        h, c = carry
        gates = x_t @ wih.T + bih + h @ whh.T + bhh
        i, f, g, o = jnp.split(gates, 4, axis=-1)
        i, f, o = jax.nn.sigmoid(i), jax.nn.sigmoid(f), jax.nn.sigmoid(o)
        g = jnp.tanh(g)
        c = f * c + i * g
        h = o * jnp.tanh(c)
        return (h, c), h

    init = (jnp.zeros((B, H), x.dtype), jnp.zeros((B, H), x.dtype))
    _, hs = lax.scan(cell, init, jnp.swapaxes(x, 0, 1))
    return jnp.swapaxes(hs, 0, 1)


def ctc_module_ref(x, p):
    h1 = _lstm_layer_ref(x, p["wih0"], p["whh0"], p["bih0"], p["bhh0"])
    h2 = _lstm_layer_ref(h1, p["wih1"], p["whh1"], p["bih1"], p["bhh1"])
    probs = jax.nn.softmax(h2, axis=2)
    probs_nb = probs[:, :, 1:]
    return jnp.einsum("btl,btd->bld", probs_nb, x)


# ---------------------------------------------------------------------------
if __name__ == "__main__":
    # Small shapes consistent with the module: x is (B, T, in_dim)
    B, T, in_dim, out_seq_len = 2, 8, 16, 7
    H = out_seq_len + 1

    key = jax.random.PRNGKey(0)
    keys = jax.random.split(key, 9)
    k = 1.0 / jnp.sqrt(jnp.float32(H))
    u = lambda kk, shape: jax.random.uniform(kk, shape, jnp.float32, -k, k)

    # Deterministic synthetic LSTM parameters (PyTorch shapes, gate order i,f,g,o).
    params = {
        "wih0": u(keys[0], (4 * H, in_dim)),
        "whh0": u(keys[1], (4 * H, H)),
        "bih0": u(keys[2], (4 * H,)),
        "bhh0": u(keys[3], (4 * H,)),
        "wih1": u(keys[4], (4 * H, H)),
        "whh1": u(keys[5], (4 * H, H)),
        "bih1": u(keys[6], (4 * H,)),
        "bhh1": u(keys[7], (4 * H,)),
    }
    x = jax.random.normal(keys[8], (B, T, in_dim), jnp.float32)

    out = jax.block_until_ready(ctc_module_forward(x, params))
    ref = jax.block_until_ready(ctc_module_ref(x, params))

    assert out.shape == (B, out_seq_len, in_dim)
    # bf16 MXU operands / bf16 recurrence intermediates -> looser tolerance than f32.
    assert jnp.allclose(out, ref, atol=3e-2, rtol=3e-2), (
        f"max abs err = {jnp.max(jnp.abs(out - ref))}")
    print("KERNEL_OK")
</pallas_src>

<mosaic_0001>
module attributes {stable_mosaic.version = 11 : i64} {
  func.func @ctc_kernel(%arg0: i32, %arg1: memref<8x8x16xf32, #tpu.memory_space<vmem>>, %arg2: memref<16x128xbf16, #tpu.memory_space<vmem>>, %arg3: memref<128x128xbf16, #tpu.memory_space<vmem>>, %arg4: memref<1x128xf32, #tpu.memory_space<vmem>>, %arg5: memref<256x128xbf16, #tpu.memory_space<vmem>>, %arg6: memref<1x128xf32, #tpu.memory_space<vmem>>, %arg7: memref<8x7x16xf32, #tpu.memory_space<vmem>>, %arg8: memref<8x8x128xbf16, #tpu.memory_space<vmem>>, %arg9: memref<8x8x128xbf16, #tpu.memory_space<vmem>>) attributes {dimension_semantics = [#tpu.dimension_semantics<parallel>], iteration_bounds = array<i64: 1>, scalar_prefetch = 0 : i64, scratch_operands = 2 : i64, tpu.core_type = #tpu.core_type<tc>, window_params = [{transform_indices = @transform_0, window_bounds = array<i64: 8, 8, 16>}, {pipeline_mode = #tpu.pipeline_mode<synchronous>, transform_indices = @transform_1, window_bounds = array<i64: 16, 128>}, {pipeline_mode = #tpu.pipeline_mode<synchronous>, transform_indices = @transform_2, window_bounds = array<i64: 128, 128>}, {pipeline_mode = #tpu.pipeline_mode<synchronous>, transform_indices = @transform_3, window_bounds = array<i64: 1, 128>}, {pipeline_mode = #tpu.pipeline_mode<synchronous>, transform_indices = @transform_4, window_bounds = array<i64: 256, 128>}, {pipeline_mode = #tpu.pipeline_mode<synchronous>, transform_indices = @transform_5, window_bounds = array<i64: 1, 128>}, {transform_indices = @transform_6, window_bounds = array<i64: 8, 7, 16>}]} {
    %c0 = arith.constant 0 : index
    %c0_0 = arith.constant 0 : index
    %c0_1 = arith.constant 0 : index
    %0 = vector.load %arg1[%c0, %c0_0, %c0_1] : memref<8x8x16xf32, #tpu.memory_space<vmem>>, vector<8x8x16xf32>
    %1 = arith.truncf %0 : vector<8x8x16xf32> to vector<8x8x16xbf16>
    %2 = vector.shape_cast %1 : vector<8x8x16xbf16> to vector<64x16xbf16>
    %c0_2 = arith.constant 0 : index
    %c0_3 = arith.constant 0 : index
    %3 = vector.load %arg2[%c0_2, %c0_3] : memref<16x128xbf16, #tpu.memory_space<vmem>>, vector<16x128xbf16>
    %cst = arith.constant dense<0.000000e+00> : vector<64x128xf32>
    %4 = tpu.matmul %2, %3, %cst {dimension_numbers = #tpu.dot_dimension_numbers<[1], [0], [0], [1], [0, 0, 1, 1], [], []>} : vector<64x16xbf16>, vector<16x128xbf16>, vector<64x128xf32> -> vector<64x128xf32>
    %c0_4 = arith.constant 0 : index
    %c0_5 = arith.constant 0 : index
    %5 = vector.load %arg4[%c0_4, %c0_5] : memref<1x128xf32, #tpu.memory_space<vmem>>, vector<1x128xf32>
    %6 = vector.broadcast %5 : vector<1x128xf32> to vector<64x128xf32>
    %7 = arith.addf %4, %6 : vector<64x128xf32>
    %8 = vector.shape_cast %7 : vector<64x128xf32> to vector<8x8x128xf32>
    %9 = arith.truncf %8 : vector<8x8x128xf32> to vector<8x8x128xbf16>
    %c0_6 = arith.constant 0 : index
    %c0_7 = arith.constant 0 : index
    %c0_8 = arith.constant 0 : index
    %10 = vector.load %arg8[%c0_6, %c0_7, %c0_8] : memref<8x8x128xbf16, #tpu.memory_space<vmem>>, vector<8x8x128xbf16>
    tpu.vector_store %arg8[%c0_6, %c0_7, %c0_8], %9 {strides = array<i32>} : memref<8x8x128xbf16, #tpu.memory_space<vmem>>, vector<8x8x128xbf16>,
    %c0_9 = arith.constant 0 : index
    %c0_10 = arith.constant 0 : index
    %11 = vector.load %arg3[%c0_9, %c0_10] : memref<128x128xbf16, #tpu.memory_space<vmem>>, vector<128x128xbf16>
    %c0_11 = arith.constant 0 : index
    %c0_12 = arith.constant 0 : index
    %12 = vector.load %arg5[%c0_11, %c0_12] : memref<256x128xbf16, #tpu.memory_space<vmem>>, vector<256x128xbf16>
    %c0_13 = arith.constant 0 : index
    %c0_14 = arith.constant 0 : index
    %13 = vector.load %arg6[%c0_13, %c0_14] : memref<1x128xf32, #tpu.memory_space<vmem>>, vector<1x128xf32>
    %14 = vector.shape_cast %13 : vector<1x128xf32> to vector<1x128xf32>
    %15 = vector.broadcast %14 : vector<1x128xf32> to vector<8x128xf32>
    %16 = tpu.iota {dimensions = array<i32: 1>} : vector<1x128xi32>
    %c16_i32 = arith.constant 16 : i32
    %17 = vector.broadcast %c16_i32 : i32 to vector<1x128xi32>
    %18 = arith.cmpi sge, %16, %17 : vector<1x128xi32>
    %c24_i32 = arith.constant 24 : i32
    %19 = vector.broadcast %c24_i32 : i32 to vector<1x128xi32>
    %20 = arith.cmpi slt, %16, %19 : vector<1x128xi32>
    %21 = arith.andi %18, %20 : vector<1x128xi1>
    %22 = tpu.iota {dimensions = array<i32: 1>} : vector<1x128xi32>
    %c8_i32 = arith.constant 8 : i32
    %23 = vector.broadcast %c8_i32 : i32 to vector<1x128xi32>
    %24 = arith.cmpi slt, %22, %23 : vector<1x128xi32>
    %cst_15 = arith.constant 0.000000e+00 : bf16
    %25 = vector.broadcast %cst_15 : bf16 to vector<8x128xbf16>
    %cst_16 = arith.constant 0.000000e+00 : f32
    %26 = vector.broadcast %cst_16 : f32 to vector<8x128xf32>
    %c0_i32 = arith.constant 0 : i32
    %27 = arith.index_cast %c0_i32 : i32 to index
    %c0_17 = arith.constant 0 : index
    %c0_18 = arith.constant 0 : index
    %28 = vector.load %arg8[%27, %c0_17, %c0_18] : memref<8x8x128xbf16, #tpu.memory_space<vmem>>, vector<1x8x128xbf16>
    %29 = vector.shape_cast %28 : vector<1x8x128xbf16> to vector<8x128xbf16>
    %30 = arith.extf %29 : vector<8x128xbf16> to vector<8x128xf32>
    %cst_19 = arith.constant dense<0.000000e+00> : vector<8x128xf32>
    %31 = tpu.matmul %25, %11, %cst_19 {dimension_numbers = #tpu.dot_dimension_numbers<[1], [0], [0], [1], [0, 0, 1, 1], [], []>} : vector<8x128xbf16>, vector<128x128xbf16>, vector<8x128xf32> -> vector<8x128xf32>
    %32 = arith.addf %30, %31 : vector<8x128xf32>
    %33 = arith.addf %32, %32 : vector<8x128xf32>
    %34 = vector.shape_cast %21 : vector<1x128xi1> to vector<1x128xi1>
    %35 = vector.broadcast %34 : vector<1x128xi1> to vector<8x128xi1>
    %36 = arith.select %35, %33, %32 : vector<8x128xi1>, vector<8x128xf32>
    %37 = arith.negf %36 : vector<8x128xf32>
    %38 = math.exp %37 : vector<8x128xf32>
    %cst_20 = arith.constant 1.000000e+00 : f32
    %39 = vector.broadcast %cst_20 : f32 to vector<8x128xf32>
    %40 = arith.addf %39, %38 : vector<8x128xf32>
    %41 = arith.divf %39, %40 : vector<8x128xf32>
    %42 = arith.addf %41, %41 : vector<8x128xf32>
    %cst_21 = arith.constant 1.000000e+00 : f32
    %43 = vector.broadcast %cst_21 : f32 to vector<8x128xf32>
    %44 = arith.subf %42, %43 : vector<8x128xf32>
    %45 = vector.shape_cast %21 : vector<1x128xi1> to vector<1x128xi1>
    %46 = vector.broadcast %45 : vector<1x128xi1> to vector<8x128xi1>
    %47 = arith.select %46, %44, %41 : vector<8x128xi1>, vector<8x128xf32>
    %c120_i32 = arith.constant 120 : i32
    %48 = tpu.dynamic_rotate %47 by %c120_i32 dim 1 : vector<8x128xf32>, i32 -> vector<8x128xf32>
    %c112_i32 = arith.constant 112 : i32
    %49 = tpu.dynamic_rotate %47 by %c112_i32 dim 1 : vector<8x128xf32>, i32 -> vector<8x128xf32>
    %c104_i32 = arith.constant 104 : i32
    %50 = tpu.dynamic_rotate %47 by %c104_i32 dim 1 : vector<8x128xf32>, i32 -> vector<8x128xf32>
    %cst_22 = arith.constant 0.000000e+00 : f32
    %51 = vector.shape_cast %24 : vector<1x128xi1> to vector<1x128xi1>
    %52 = vector.broadcast %51 : vector<1x128xi1> to vector<8x128xi1>
    %53 = vector.broadcast %cst_22 : f32 to vector<8x128xf32>
    %54 = arith.select %52, %47, %53 : vector<8x128xi1>, vector<8x128xf32>
    %55 = arith.mulf %48, %26 : vector<8x128xf32>
    %56 = arith.mulf %54, %49 : vector<8x128xf32>
    %57 = arith.addf %55, %56 : vector<8x128xf32>
    %58 = math.tanh %57 : vector<8x128xf32>
    %59 = arith.mulf %50, %58 : vector<8x128xf32>
    %60 = arith.truncf %59 : vector<8x128xf32> to vector<8x128xbf16>
    %61 = tpu.concatenate %60, %25 in 1 : vector<8x128xbf16>, vector<8x128xbf16> -> vector<8x256xbf16>
    %cst_23 = arith.constant dense<0.000000e+00> : vector<8x128xf32>
    %62 = tpu.matmul %61, %12, %cst_23 {dimension_numbers = #tpu.dot_dimension_numbers<[1], [0], [0], [1], [0, 0, 1, 1], [], []>} : vector<8x256xbf16>, vector<256x128xbf16>, vector<8x128xf32> -> vector<8x128xf32>
    %63 = arith.addf %62, %15 : vector<8x128xf32>
    %64 = arith.addf %63, %63 : vector<8x128xf32>
    %65 = vector.shape_cast %21 : vector<1x128xi1> to vector<1x128xi1>
    %66 = vector.broadcast %65 : vector<1x128xi1> to vector<8x128xi1>
    %67 = arith.select %66, %64, %63 : vector<8x128xi1>, vector<8x128xf32>
    %68 = arith.negf %67 : vector<8x128xf32>
    %69 = math.exp %68 : vector<8x128xf32>
    %cst_24 = arith.constant 1.000000e+00 : f32
    %70 = vector.broadcast %cst_24 : f32 to vector<8x128xf32>
    %71 = arith.addf %70, %69 : vector<8x128xf32>
    %72 = arith.divf %70, %71 : vector<8x128xf32>
    %73 = arith.addf %72, %72 : vector<8x128xf32>
    %cst_25 = arith.constant 1.000000e+00 : f32
    %74 = vector.broadcast %cst_25 : f32 to vector<8x128xf32>
    %75 = arith.subf %73, %74 : vector<8x128xf32>
    %76 = vector.shape_cast %21 : vector<1x128xi1> to vector<1x128xi1>
    %77 = vector.broadcast %76 : vector<1x128xi1> to vector<8x128xi1>
    %78 = arith.select %77, %75, %72 : vector<8x128xi1>, vector<8x128xf32>
    %c120_i32_26 = arith.constant 120 : i32
    %79 = tpu.dynamic_rotate %78 by %c120_i32_26 dim 1 : vector<8x128xf32>, i32 -> vector<8x128xf32>
    %c112_i32_27 = arith.constant 112 : i32
    %80 = tpu.dynamic_rotate %78 by %c112_i32_27 dim 1 : vector<8x128xf32>, i32 -> vector<8x128xf32>
    %c104_i32_28 = arith.constant 104 : i32
    %81 = tpu.dynamic_rotate %78 by %c104_i32_28 dim 1 : vector<8x128xf32>, i32 -> vector<8x128xf32>
    %cst_29 = arith.constant 0.000000e+00 : f32
    %82 = vector.shape_cast %24 : vector<1x128xi1> to vector<1x128xi1>
    %83 = vector.broadcast %82 : vector<1x128xi1> to vector<8x128xi1>
    %84 = vector.broadcast %cst_29 : f32 to vector<8x128xf32>
    %85 = arith.select %83, %78, %84 : vector<8x128xi1>, vector<8x128xf32>
    %86 = arith.mulf %79, %26 : vector<8x128xf32>
    %87 = arith.mulf %85, %80 : vector<8x128xf32>
    %88 = arith.addf %86, %87 : vector<8x128xf32>
    %89 = math.tanh %88 : vector<8x128xf32>
    %90 = arith.mulf %81, %89 : vector<8x128xf32>
    %91 = arith.truncf %90 : vector<8x128xf32> to vector<8x128xbf16>
    %92 = arith.index_cast %c0_i32 : i32 to index
    %c0_30 = arith.constant 0 : index
    %c0_31 = arith.constant 0 : index
    %93 = vector.load %arg9[%92, %c0_30, %c0_31] : memref<8x8x128xbf16, #tpu.memory_space<vmem>>, vector<1x8x128xbf16>
    %94 = vector.shape_cast %93 : vector<1x8x128xbf16> to vector<8x128xbf16>
    %95 = vector.shape_cast %91 : vector<8x128xbf16> to vector<1x8x128xbf16>
    tpu.vector_store %arg9[%92, %c0_30, %c0_31], %95 {strides = array<i32>} : memref<8x8x128xbf16, #tpu.memory_space<vmem>>, vector<1x8x128xbf16>,
    %c1_i32 = arith.constant 1 : i32
    %96 = arith.index_cast %c1_i32 : i32 to index
    %c0_32 = arith.constant 0 : index
    %c0_33 = arith.constant 0 : index
    %97 = vector.load %arg8[%96, %c0_32, %c0_33] : memref<8x8x128xbf16, #tpu.memory_space<vmem>>, vector<1x8x128xbf16>
    %98 = vector.shape_cast %97 : vector<1x8x128xbf16> to vector<8x128xbf16>
    %99 = arith.extf %98 : vector<8x128xbf16> to vector<8x128xf32>
    %cst_34 = arith.constant dense<0.000000e+00> : vector<8x128xf32>
    %100 = tpu.matmul %60, %11, %cst_34 {dimension_numbers = #tpu.dot_dimension_numbers<[1], [0], [0], [1], [0, 0, 1, 1], [], []>} : vector<8x128xbf16>, vector<128x128xbf16>, vector<8x128xf32> -> vector<8x128xf32>
    %101 = arith.addf %99, %100 : vector<8x128xf32>
    %102 = arith.addf %101, %101 : vector<8x128xf32>
    %103 = vector.shape_cast %21 : vector<1x128xi1> to vector<1x128xi1>
    %104 = vector.broadcast %103 : vector<1x128xi1> to vector<8x128xi1>
    %105 = arith.select %104, %102, %101 : vector<8x128xi1>, vector<8x128xf32>
    %106 = arith.negf %105 : vector<8x128xf32>
    %107 = math.exp %106 : vector<8x128xf32>
    %cst_35 = arith.constant 1.000000e+00 : f32
    %108 = vector.broadcast %cst_35 : f32 to vector<8x128xf32>
    %109 = arith.addf %108, %107 : vector<8x128xf32>
    %110 = arith.divf %108, %109 : vector<8x128xf32>
    %111 = arith.addf %110, %110 : vector<8x128xf32>
    %cst_36 = arith.constant 1.000000e+00 : f32
    %112 = vector.broadcast %cst_36 : f32 to vector<8x128xf32>
    %113 = arith.subf %111, %112 : vector<8x128xf32>
    %114 = vector.shape_cast %21 : vector<1x128xi1> to vector<1x128xi1>
    %115 = vector.broadcast %114 : vector<1x128xi1> to vector<8x128xi1>
    %116 = arith.select %115, %113, %110 : vector<8x128xi1>, vector<8x128xf32>
    %c120_i32_37 = arith.constant 120 : i32
    %117 = tpu.dynamic_rotate %116 by %c120_i32_37 dim 1 : vector<8x128xf32>, i32 -> vector<8x128xf32>
    %c112_i32_38 = arith.constant 112 : i32
    %118 = tpu.dynamic_rotate %116 by %c112_i32_38 dim 1 : vector<8x128xf32>, i32 -> vector<8x128xf32>
    %c104_i32_39 = arith.constant 104 : i32
    %119 = tpu.dynamic_rotate %116 by %c104_i32_39 dim 1 : vector<8x128xf32>, i32 -> vector<8x128xf32>
    %cst_40 = arith.constant 0.000000e+00 : f32
    %120 = vector.shape_cast %24 : vector<1x128xi1> to vector<1x128xi1>
    %121 = vector.broadcast %120 : vector<1x128xi1> to vector<8x128xi1>
    %122 = vector.broadcast %cst_40 : f32 to vector<8x128xf32>
    %123 = arith.select %121, %116, %122 : vector<8x128xi1>, vector<8x128xf32>
    %124 = arith.mulf %117, %57 : vector<8x128xf32>
    %125 = arith.mulf %123, %118 : vector<8x128xf32>
    %126 = arith.addf %124, %125 : vector<8x128xf32>
    %127 = math.tanh %126 : vector<8x128xf32>
    %128 = arith.mulf %119, %127 : vector<8x128xf32>
    %129 = arith.truncf %128 : vector<8x128xf32> to vector<8x128xbf16>
    %130 = tpu.concatenate %129, %91 in 1 : vector<8x128xbf16>, vector<8x128xbf16> -> vector<8x256xbf16>
    %cst_41 = arith.constant dense<0.000000e+00> : vector<8x128xf32>
    %131 = tpu.matmul %130, %12, %cst_41 {dimension_numbers = #tpu.dot_dimension_numbers<[1], [0], [0], [1], [0, 0, 1, 1], [], []>} : vector<8x256xbf16>, vector<256x128xbf16>, vector<8x128xf32> -> vector<8x128xf32>
    %132 = arith.addf %131, %15 : vector<8x128xf32>
    %133 = arith.addf %132, %132 : vector<8x128xf32>
    %134 = vector.shape_cast %21 : vector<1x128xi1> to vector<1x128xi1>
    %135 = vector.broadcast %134 : vector<1x128xi1> to vector<8x128xi1>
    %136 = arith.select %135, %133, %132 : vector<8x128xi1>, vector<8x128xf32>
    %137 = arith.negf %136 : vector<8x128xf32>
    %138 = math.exp %137 : vector<8x128xf32>
    %cst_42 = arith.constant 1.000000e+00 : f32
    %139 = vector.broadcast %cst_42 : f32 to vector<8x128xf32>
    %140 = arith.addf %139, %138 : vector<8x128xf32>
    %141 = arith.divf %139, %140 : vector<8x128xf32>
    %142 = arith.addf %141, %141 : vector<8x128xf32>
    %cst_43 = arith.constant 1.000000e+00 : f32
    %143 = vector.broadcast %cst_43 : f32 to vector<8x128xf32>
    %144 = arith.subf %142, %143 : vector<8x128xf32>
    %145 = vector.shape_cast %21 : vector<1x128xi1> to vector<1x128xi1>
    %146 = vector.broadcast %145 : vector<1x128xi1> to vector<8x128xi1>
    %147 = arith.select %146, %144, %141 : vector<8x128xi1>, vector<8x128xf32>
    %c120_i32_44 = arith.constant 120 : i32
    %148 = tpu.dynamic_rotate %147 by %c120_i32_44 dim 1 : vector<8x128xf32>, i32 -> vector<8x128xf32>
    %c112_i32_45 = arith.constant 112 : i32
    %149 = tpu.dynamic_rotate %147 by %c112_i32_45 dim 1 : vector<8x128xf32>, i32 -> vector<8x128xf32>
    %c104_i32_46 = arith.constant 104 : i32
    %150 = tpu.dynamic_rotate %147 by %c104_i32_46 dim 1 : vector<8x128xf32>, i32 -> vector<8x128xf32>
    %cst_47 = arith.constant 0.000000e+00 : f32
    %151 = vector.shape_cast %24 : vector<1x128xi1> to vector<1x128xi1>
    %152 = vector.broadcast %151 : vector<1x128xi1> to vector<8x128xi1>
    %153 = vector.broadcast %cst_47 : f32 to vector<8x128xf32>
    %154 = arith.select %152, %147, %153 : vector<8x128xi1>, vector<8x128xf32>
    %155 = arith.mulf %148, %88 : vector<8x128xf32>
    %156 = arith.mulf %154, %149 : vector<8x128xf32>
    %157 = arith.addf %155, %156 : vector<8x128xf32>
    %158 = math.tanh %157 : vector<8x128xf32>
    %159 = arith.mulf %150, %158 : vector<8x128xf32>
    %160 = arith.truncf %159 : vector<8x128xf32> to vector<8x128xbf16>
    %161 = arith.index_cast %c1_i32 : i32 to index
    %c0_48 = arith.constant 0 : index
    %c0_49 = arith.constant 0 : index
    %162 = vector.load %arg9[%161, %c0_48, %c0_49] : memref<8x8x128xbf16, #tpu.memory_space<vmem>>, vector<1x8x128xbf16>
    %163 = vector.shape_cast %162 : vector<1x8x128xbf16> to vector<8x128xbf16>
    %164 = vector.shape_cast %160 : vector<8x128xbf16> to vector<1x8x128xbf16>
    tpu.vector_store %arg9[%161, %c0_48, %c0_49], %164 {strides = array<i32>} : memref<8x8x128xbf16, #tpu.memory_space<vmem>>, vector<1x8x128xbf16>,
    %c2_i32 = arith.constant 2 : i32
    %165 = arith.index_cast %c2_i32 : i32 to index
    %c0_50 = arith.constant 0 : index
    %c0_51 = arith.constant 0 : index
    %166 = vector.load %arg8[%165, %c0_50, %c0_51] : memref<8x8x128xbf16, #tpu.memory_space<vmem>>, vector<1x8x128xbf16>
    %167 = vector.shape_cast %166 : vector<1x8x128xbf16> to vector<8x128xbf16>
    %168 = arith.extf %167 : vector<8x128xbf16> to vector<8x128xf32>
    %cst_52 = arith.constant dense<0.000000e+00> : vector<8x128xf32>
    %169 = tpu.matmul %129, %11, %cst_52 {dimension_numbers = #tpu.dot_dimension_numbers<[1], [0], [0], [1], [0, 0, 1, 1], [], []>} : vector<8x128xbf16>, vector<128x128xbf16>, vector<8x128xf32> -> vector<8x128xf32>
    %170 = arith.addf %168, %169 : vector<8x128xf32>
    %171 = arith.addf %170, %170 : vector<8x128xf32>
    %172 = vector.shape_cast %21 : vector<1x128xi1> to vector<1x128xi1>
    %173 = vector.broadcast %172 : vector<1x128xi1> to vector<8x128xi1>
    %174 = arith.select %173, %171, %170 : vector<8x128xi1>, vector<8x128xf32>
    %175 = arith.negf %174 : vector<8x128xf32>
    %176 = math.exp %175 : vector<8x128xf32>
    %cst_53 = arith.constant 1.000000e+00 : f32
    %177 = vector.broadcast %cst_53 : f32 to vector<8x128xf32>
    %178 = arith.addf %177, %176 : vector<8x128xf32>
    %179 = arith.divf %177, %178 : vector<8x128xf32>
    %180 = arith.addf %179, %179 : vector<8x128xf32>
    %cst_54 = arith.constant 1.000000e+00 : f32
    %181 = vector.broadcast %cst_54 : f32 to vector<8x128xf32>
    %182 = arith.subf %180, %181 : vector<8x128xf32>
    %183 = vector.shape_cast %21 : vector<1x128xi1> to vector<1x128xi1>
    %184 = vector.broadcast %183 : vector<1x128xi1> to vector<8x128xi1>
    %185 = arith.select %184, %182, %179 : vector<8x128xi1>, vector<8x128xf32>
    %c120_i32_55 = arith.constant 120 : i32
    %186 = tpu.dynamic_rotate %185 by %c120_i32_55 dim 1 : vector<8x128xf32>, i32 -> vector<8x128xf32>
    %c112_i32_56 = arith.constant 112 : i32
    %187 = tpu.dynamic_rotate %185 by %c112_i32_56 dim 1 : vector<8x128xf32>, i32 -> vector<8x128xf32>
    %c104_i32_57 = arith.constant 104 : i32
    %188 = tpu.dynamic_rotate %185 by %c104_i32_57 dim 1 : vector<8x128xf32>, i32 -> vector<8x128xf32>
    %cst_58 = arith.constant 0.000000e+00 : f32
    %189 = vector.shape_cast %24 : vector<1x128xi1> to vector<1x128xi1>
    %190 = vector.broadcast %189 : vector<1x128xi1> to vector<8x128xi1>
    %191 = vector.broadcast %cst_58 : f32 to vector<8x128xf32>
    %192 = arith.select %190, %185, %191 : vector<8x128xi1>, vector<8x128xf32>
    %193 = arith.mulf %186, %126 : vector<8x128xf32>
    %194 = arith.mulf %192, %187 : vector<8x128xf32>
    %195 = arith.addf %193, %194 : vector<8x128xf32>
    %196 = math.tanh %195 : vector<8x128xf32>
    %197 = arith.mulf %188, %196 : vector<8x128xf32>
    %198 = arith.truncf %197 : vector<8x128xf32> to vector<8x128xbf16>
    %199 = tpu.concatenate %198, %160 in 1 : vector<8x128xbf16>, vector<8x128xbf16> -> vector<8x256xbf16>
    %cst_59 = arith.constant dense<0.000000e+00> : vector<8x128xf32>
    %200 = tpu.matmul %199, %12, %cst_59 {dimension_numbers = #tpu.dot_dimension_numbers<[1], [0], [0], [1], [0, 0, 1, 1], [], []>} : vector<8x256xbf16>, vector<256x128xbf16>, vector<8x128xf32> -> vector<8x128xf32>
    %201 = arith.addf %200, %15 : vector<8x128xf32>
    %202 = arith.addf %201, %201 : vector<8x128xf32>
    %203 = vector.shape_cast %21 : vector<1x128xi1> to vector<1x128xi1>
    %204 = vector.broadcast %203 : vector<1x128xi1> to vector<8x128xi1>
    %205 = arith.select %204, %202, %201 : vector<8x128xi1>, vector<8x128xf32>
    %206 = arith.negf %205 : vector<8x128xf32>
    %207 = math.exp %206 : vector<8x128xf32>
    %cst_60 = arith.constant 1.000000e+00 : f32
    %208 = vector.broadcast %cst_60 : f32 to vector<8x128xf32>
    %209 = arith.addf %208, %207 : vector<8x128xf32>
    %210 = arith.divf %208, %209 : vector<8x128xf32>
    %211 = arith.addf %210, %210 : vector<8x128xf32>
    %cst_61 = arith.constant 1.000000e+00 : f32
    %212 = vector.broadcast %cst_61 : f32 to vector<8x128xf32>
    %213 = arith.subf %211, %212 : vector<8x128xf32>
    %214 = vector.shape_cast %21 : vector<1x128xi1> to vector<1x128xi1>
    %215 = vector.broadcast %214 : vector<1x128xi1> to vector<8x128xi1>
    %216 = arith.select %215, %213, %210 : vector<8x128xi1>, vector<8x128xf32>
    %c120_i32_62 = arith.constant 120 : i32
    %217 = tpu.dynamic_rotate %216 by %c120_i32_62 dim 1 : vector<8x128xf32>, i32 -> vector<8x128xf32>
    %c112_i32_63 = arith.constant 112 : i32
    %218 = tpu.dynamic_rotate %216 by %c112_i32_63 dim 1 : vector<8x128xf32>, i32 -> vector<8x128xf32>
    %c104_i32_64 = arith.constant 104 : i32
    %219 = tpu.dynamic_rotate %216 by %c104_i32_64 dim 1 : vector<8x128xf32>, i32 -> vector<8x128xf32>
    %cst_65 = arith.constant 0.000000e+00 : f32
    %220 = vector.shape_cast %24 : vector<1x128xi1> to vector<1x128xi1>
    %221 = vector.broadcast %220 : vector<1x128xi1> to vector<8x128xi1>
    %222 = vector.broadcast %cst_65 : f32 to vector<8x128xf32>
    %223 = arith.select %221, %216, %222 : vector<8x128xi1>, vector<8x128xf32>
    %224 = arith.mulf %217, %157 : vector<8x128xf32>
    %225 = arith.mulf %223, %218 : vector<8x128xf32>
    %226 = arith.addf %224, %225 : vector<8x128xf32>
    %227 = math.tanh %226 : vector<8x128xf32>
    %228 = arith.mulf %219, %227 : vector<8x128xf32>
    %229 = arith.truncf %228 : vector<8x128xf32> to vector<8x128xbf16>
    %230 = arith.index_cast %c2_i32 : i32 to index
    %c0_66 = arith.constant 0 : index
    %c0_67 = arith.constant 0 : index
    %231 = vector.load %arg9[%230, %c0_66, %c0_67] : memref<8x8x128xbf16, #tpu.memory_space<vmem>>, vector<1x8x128xbf16>
    %232 = vector.shape_cast %231 : vector<1x8x128xbf16> to vector<8x128xbf16>
    %233 = vector.shape_cast %229 : vector<8x128xbf16> to vector<1x8x128xbf16>
    tpu.vector_store %arg9[%230, %c0_66, %c0_67], %233 {strides = array<i32>} : memref<8x8x128xbf16, #tpu.memory_space<vmem>>, vector<1x8x128xbf16>,
    %c3_i32 = arith.constant 3 : i32
    %234 = arith.index_cast %c3_i32 : i32 to index
    %c0_68 = arith.constant 0 : index
    %c0_69 = arith.constant 0 : index
    %235 = vector.load %arg8[%234, %c0_68, %c0_69] : memref<8x8x128xbf16, #tpu.memory_space<vmem>>, vector<1x8x128xbf16>
    %236 = vector.shape_cast %235 : vector<1x8x128xbf16> to vector<8x128xbf16>
    %237 = arith.extf %236 : vector<8x128xbf16> to vector<8x128xf32>
    %cst_70 = arith.constant dense<0.000000e+00> : vector<8x128xf32>
    %238 = tpu.matmul %198, %11, %cst_70 {dimension_numbers = #tpu.dot_dimension_numbers<[1], [0], [0], [1], [0, 0, 1, 1], [], []>} : vector<8x128xbf16>, vector<128x128xbf16>, vector<8x128xf32> -> vector<8x128xf32>
    %239 = arith.addf %237, %238 : vector<8x128xf32>
    %240 = arith.addf %239, %239 : vector<8x128xf32>
    %241 = vector.shape_cast %21 : vector<1x128xi1> to vector<1x128xi1>
    %242 = vector.broadcast %241 : vector<1x128xi1> to vector<8x128xi1>
    %243 = arith.select %242, %240, %239 : vector<8x128xi1>, vector<8x128xf32>
    %244 = arith.negf %243 : vector<8x128xf32>
    %245 = math.exp %244 : vector<8x128xf32>
    %cst_71 = arith.constant 1.000000e+00 : f32
    %246 = vector.broadcast %cst_71 : f32 to vector<8x128xf32>
    %247 = arith.addf %246, %245 : vector<8x128xf32>
    %248 = arith.divf %246, %247 : vector<8x128xf32>
    %249 = arith.addf %248, %248 : vector<8x128xf32>
    %cst_72 = arith.constant 1.000000e+00 : f32
    %250 = vector.broadcast %cst_72 : f32 to vector<8x128xf32>
    %251 = arith.subf %249, %250 : vector<8x128xf32>
    %252 = vector.shape_cast %21 : vector<1x128xi1> to vector<1x128xi1>
    %253 = vector.broadcast %252 : vector<1x128xi1> to vector<8x128xi1>
    %254 = arith.select %253, %251, %248 : vector<8x128xi1>, vector<8x128xf32>
    %c120_i32_73 = arith.constant 120 : i32
    %255 = tpu.dynamic_rotate %254 by %c120_i32_73 dim 1 : vector<8x128xf32>, i32 -> vector<8x128xf32>
    %c112_i32_74 = arith.constant 112 : i32
    %256 = tpu.dynamic_rotate %254 by %c112_i32_74 dim 1 : vector<8x128xf32>, i32 -> vector<8x128xf32>
    %c104_i32_75 = arith.constant 104 : i32
    %257 = tpu.dynamic_rotate %254 by %c104_i32_75 dim 1 : vector<8x128xf32>, i32 -> vector<8x128xf32>
    %cst_76 = arith.constant 0.000000e+00 : f32
    %258 = vector.shape_cast %24 : vector<1x128xi1> to vector<1x128xi1>
    %259 = vector.broadcast %258 : vector<1x128xi1> to vector<8x128xi1>
    %260 = vector.broadcast %cst_76 : f32 to vector<8x128xf32>
    %261 = arith.select %259, %254, %260 : vector<8x128xi1>, vector<8x128xf32>
    %262 = arith.mulf %255, %195 : vector<8x128xf32>
    %263 = arith.mulf %261, %256 : vector<8x128xf32>
    %264 = arith.addf %262, %263 : vector<8x128xf32>
    %265 = math.tanh %264 : vector<8x128xf32>
    %266 = arith.mulf %257, %265 : vector<8x128xf32>
    %267 = arith.truncf %266 : vector<8x128xf32> to vector<8x128xbf16>
    %268 = tpu.concatenate %267, %229 in 1 : vector<8x128xbf16>, vector<8x128xbf16> -> vector<8x256xbf16>
    %cst_77 = arith.constant dense<0.000000e+00> : vector<8x128xf32>
    %269 = tpu.matmul %268, %12, %cst_77 {dimension_numbers = #tpu.dot_dimension_numbers<[1], [0], [0], [1], [0, 0, 1, 1], [], []>} : vector<8x256xbf16>, vector<256x128xbf16>, vector<8x128xf32> -> vector<8x128xf32>
    %270 = arith.addf %269, %15 : vector<8x128xf32>
    %271 = arith.addf %270, %270 : vector<8x128xf32>
    %272 = vector.shape_cast %21 : vector<1x128xi1> to vector<1x128xi1>
    %273 = vector.broadcast %272 : vector<1x128xi1> to vector<8x128xi1>
    %274 = arith.select %273, %271, %270 : vector<8x128xi1>, vector<8x128xf32>
    %275 = arith.negf %274 : vector<8x128xf32>
    %276 = math.exp %275 : vector<8x128xf32>
    %cst_78 = arith.constant 1.000000e+00 : f32
    %277 = vector.broadcast %cst_78 : f32 to vector<8x128xf32>
    %278 = arith.addf %277, %276 : vector<8x128xf32>
    %279 = arith.divf %277, %278 : vector<8x128xf32>
    %280 = arith.addf %279, %279 : vector<8x128xf32>
    %cst_79 = arith.constant 1.000000e+00 : f32
    %281 = vector.broadcast %cst_79 : f32 to vector<8x128xf32>
    %282 = arith.subf %280, %281 : vector<8x128xf32>
    %283 = vector.shape_cast %21 : vector<1x128xi1> to vector<1x128xi1>
    %284 = vector.broadcast %283 : vector<1x128xi1> to vector<8x128xi1>
    %285 = arith.select %284, %282, %279 : vector<8x128xi1>, vector<8x128xf32>
    %c120_i32_80 = arith.constant 120 : i32
    %286 = tpu.dynamic_rotate %285 by %c120_i32_80 dim 1 : vector<8x128xf32>, i32 -> vector<8x128xf32>
    %c112_i32_81 = arith.constant 112 : i32
    %287 = tpu.dynamic_rotate %285 by %c112_i32_81 dim 1 : vector<8x128xf32>, i32 -> vector<8x128xf32>
    %c104_i32_82 = arith.constant 104 : i32
    %288 = tpu.dynamic_rotate %285 by %c104_i32_82 dim 1 : vector<8x128xf32>, i32 -> vector<8x128xf32>
    %cst_83 = arith.constant 0.000000e+00 : f32
    %289 = vector.shape_cast %24 : vector<1x128xi1> to vector<1x128xi1>
    %290 = vector.broadcast %289 : vector<1x128xi1> to vector<8x128xi1>
    %291 = vector.broadcast %cst_83 : f32 to vector<8x128xf32>
    %292 = arith.select %290, %285, %291 : vector<8x128xi1>, vector<8x128xf32>
    %293 = arith.mulf %286, %226 : vector<8x128xf32>
    %294 = arith.mulf %292, %287 : vector<8x128xf32>
    %295 = arith.addf %293, %294 : vector<8x128xf32>
    %296 = math.tanh %295 : vector<8x128xf32>
    %297 = arith.mulf %288, %296 : vector<8x128xf32>
    %298 = arith.truncf %297 : vector<8x128xf32> to vector<8x128xbf16>
    %299 = arith.index_cast %c3_i32 : i32 to index
    %c0_84 = arith.constant 0 : index
    %c0_85 = arith.constant 0 : index
    %300 = vector.load %arg9[%299, %c0_84, %c0_85] : memref<8x8x128xbf16, #tpu.memory_space<vmem>>, vector<1x8x128xbf16>
    %301 = vector.shape_cast %300 : vector<1x8x128xbf16> to vector<8x128xbf16>
    %302 = vector.shape_cast %298 : vector<8x128xbf16> to vector<1x8x128xbf16>
    tpu.vector_store %arg9[%299, %c0_84, %c0_85], %302 {strides = array<i32>} : memref<8x8x128xbf16, #tpu.memory_space<vmem>>, vector<1x8x128xbf16>,
    %c4_i32 = arith.constant 4 : i32
    %303 = arith.index_cast %c4_i32 : i32 to index
    %c0_86 = arith.constant 0 : index
    %c0_87 = arith.constant 0 : index
    %304 = vector.load %arg8[%303, %c0_86, %c0_87] : memref<8x8x128xbf16, #tpu.memory_space<vmem>>, vector<1x8x128xbf16>
    %305 = vector.shape_cast %304 : vector<1x8x128xbf16> to vector<8x128xbf16>
    %306 = arith.extf %305 : vector<8x128xbf16> to vector<8x128xf32>
    %cst_88 = arith.constant dense<0.000000e+00> : vector<8x128xf32>
    %307 = tpu.matmul %267, %11, %cst_88 {dimension_numbers = #tpu.dot_dimension_numbers<[1], [0], [0], [1], [0, 0, 1, 1], [], []>} : vector<8x128xbf16>, vector<128x128xbf16>, vector<8x128xf32> -> vector<8x128xf32>
    %308 = arith.addf %306, %307 : vector<8x128xf32>
    %309 = arith.addf %308, %308 : vector<8x128xf32>
    %310 = vector.shape_cast %21 : vector<1x128xi1> to vector<1x128xi1>
    %311 = vector.broadcast %310 : vector<1x128xi1> to vector<8x128xi1>
    %312 = arith.select %311, %309, %308 : vector<8x128xi1>, vector<8x128xf32>
    %313 = arith.negf %312 : vector<8x128xf32>
    %314 = math.exp %313 : vector<8x128xf32>
    %cst_89 = arith.constant 1.000000e+00 : f32
    %315 = vector.broadcast %cst_89 : f32 to vector<8x128xf32>
    %316 = arith.addf %315, %314 : vector<8x128xf32>
    %317 = arith.divf %315, %316 : vector<8x128xf32>
    %318 = arith.addf %317, %317 : vector<8x128xf32>
    %cst_90 = arith.constant 1.000000e+00 : f32
    %319 = vector.broadcast %cst_90 : f32 to vector<8x128xf32>
    %320 = arith.subf %318, %319 : vector<8x128xf32>
    %321 = vector.shape_cast %21 : vector<1x128xi1> to vector<1x128xi1>
    %322 = vector.broadcast %321 : vector<1x128xi1> to vector<8x128xi1>
    %323 = arith.select %322, %320, %317 : vector<8x128xi1>, vector<8x128xf32>
    %c120_i32_91 = arith.constant 120 : i32
    %324 = tpu.dynamic_rotate %323 by %c120_i32_91 dim 1 : vector<8x128xf32>, i32 -> vector<8x128xf32>
    %c112_i32_92 = arith.constant 112 : i32
    %325 = tpu.dynamic_rotate %323 by %c112_i32_92 dim 1 : vector<8x128xf32>, i32 -> vector<8x128xf32>
    %c104_i32_93 = arith.constant 104 : i32
    %326 = tpu.dynamic_rotate %323 by %c104_i32_93 dim 1 : vector<8x128xf32>, i32 -> vector<8x128xf32>
    %cst_94 = arith.constant 0.000000e+00 : f32
    %327 = vector.shape_cast %24 : vector<1x128xi1> to vector<1x128xi1>
    %328 = vector.broadcast %327 : vector<1x128xi1> to vector<8x128xi1>
    %329 = vector.broadcast %cst_94 : f32 to vector<8x128xf32>
    %330 = arith.select %328, %323, %329 : vector<8x128xi1>, vector<8x128xf32>
    %331 = arith.mulf %324, %264 : vector<8x128xf32>
    %332 = arith.mulf %330, %325 : vector<8x128xf32>
    %333 = arith.addf %331, %332 : vector<8x128xf32>
    %334 = math.tanh %333 : vector<8x128xf32>
    %335 = arith.mulf %326, %334 : vector<8x128xf32>
    %336 = arith.truncf %335 : vector<8x128xf32> to vector<8x128xbf16>
    %337 = tpu.concatenate %336, %298 in 1 : vector<8x128xbf16>, vector<8x128xbf16> -> vector<8x256xbf16>
    %cst_95 = arith.constant dense<0.000000e+00> : vector<8x128xf32>
    %338 = tpu.matmul %337, %12, %cst_95 {dimension_numbers = #tpu.dot_dimension_numbers<[1], [0], [0], [1], [0, 0, 1, 1], [], []>} : vector<8x256xbf16>, vector<256x128xbf16>, vector<8x128xf32> -> vector<8x128xf32>
    %339 = arith.addf %338, %15 : vector<8x128xf32>
    %340 = arith.addf %339, %339 : vector<8x128xf32>
    %341 = vector.shape_cast %21 : vector<1x128xi1> to vector<1x128xi1>
    %342 = vector.broadcast %341 : vector<1x128xi1> to vector<8x128xi1>
    %343 = arith.select %342, %340, %339 : vector<8x128xi1>, vector<8x128xf32>
    %344 = arith.negf %343 : vector<8x128xf32>
    %345 = math.exp %344 : vector<8x128xf32>
    %cst_96 = arith.constant 1.000000e+00 : f32
    %346 = vector.broadcast %cst_96 : f32 to vector<8x128xf32>
    %347 = arith.addf %346, %345 : vector<8x128xf32>
    %348 = arith.divf %346, %347 : vector<8x128xf32>
    %349 = arith.addf %348, %348 : vector<8x128xf32>
    %cst_97 = arith.constant 1.000000e+00 : f32
    %350 = vector.broadcast %cst_97 : f32 to vector<8x128xf32>
    %351 = arith.subf %349, %350 : vector<8x128xf32>
    %352 = vector.shape_cast %21 : vector<1x128xi1> to vector<1x128xi1>
    %353 = vector.broadcast %352 : vector<1x128xi1> to vector<8x128xi1>
    %354 = arith.select %353, %351, %348 : vector<8x128xi1>, vector<8x128xf32>
    %c120_i32_98 = arith.constant 120 : i32
    %355 = tpu.dynamic_rotate %354 by %c120_i32_98 dim 1 : vector<8x128xf32>, i32 -> vector<8x128xf32>
    %c112_i32_99 = arith.constant 112 : i32
    %356 = tpu.dynamic_rotate %354 by %c112_i32_99 dim 1 : vector<8x128xf32>, i32 -> vector<8x128xf32>
    %c104_i32_100 = arith.constant 104 : i32
    %357 = tpu.dynamic_rotate %354 by %c104_i32_100 dim 1 : vector<8x128xf32>, i32 -> vector<8x128xf32>
    %cst_101 = arith.constant 0.000000e+00 : f32
    %358 = vector.shape_cast %24 : vector<1x128xi1> to vector<1x128xi1>
    %359 = vector.broadcast %358 : vector<1x128xi1> to vector<8x128xi1>
    %360 = vector.broadcast %cst_101 : f32 to vector<8x128xf32>
    %361 = arith.select %359, %354, %360 : vector<8x128xi1>, vector<8x128xf32>
    %362 = arith.mulf %355, %295 : vector<8x128xf32>
    %363 = arith.mulf %361, %356 : vector<8x128xf32>
    %364 = arith.addf %362, %363 : vector<8x128xf32>
    %365 = math.tanh %364 : vector<8x128xf32>
    %366 = arith.mulf %357, %365 : vector<8x128xf32>
    %367 = arith.truncf %366 : vector<8x128xf32> to vector<8x128xbf16>
    %368 = arith.index_cast %c4_i32 : i32 to index
    %c0_102 = arith.constant 0 : index
    %c0_103 = arith.constant 0 : index
    %369 = vector.load %arg9[%368, %c0_102, %c0_103] : memref<8x8x128xbf16, #tpu.memory_space<vmem>>, vector<1x8x128xbf16>
    %370 = vector.shape_cast %369 : vector<1x8x128xbf16> to vector<8x128xbf16>
    %371 = vector.shape_cast %367 : vector<8x128xbf16> to vector<1x8x128xbf16>
    tpu.vector_store %arg9[%368, %c0_102, %c0_103], %371 {strides = array<i32>} : memref<8x8x128xbf16, #tpu.memory_space<vmem>>, vector<1x8x128xbf16>,
    %c5_i32 = arith.constant 5 : i32
    %372 = arith.index_cast %c5_i32 : i32 to index
    %c0_104 = arith.constant 0 : index
    %c0_105 = arith.constant 0 : index
    %373 = vector.load %arg8[%372, %c0_104, %c0_105] : memref<8x8x128xbf16, #tpu.memory_space<vmem>>, vector<1x8x128xbf16>
    %374 = vector.shape_cast %373 : vector<1x8x128xbf16> to vector<8x128xbf16>
    %375 = arith.extf %374 : vector<8x128xbf16> to vector<8x128xf32>
    %cst_106 = arith.constant dense<0.000000e+00> : vector<8x128xf32>
    %376 = tpu.matmul %336, %11, %cst_106 {dimension_numbers = #tpu.dot_dimension_numbers<[1], [0], [0], [1], [0, 0, 1, 1], [], []>} : vector<8x128xbf16>, vector<128x128xbf16>, vector<8x128xf32> -> vector<8x128xf32>
    %377 = arith.addf %375, %376 : vector<8x128xf32>
    %378 = arith.addf %377, %377 : vector<8x128xf32>
    %379 = vector.shape_cast %21 : vector<1x128xi1> to vector<1x128xi1>
    %380 = vector.broadcast %379 : vector<1x128xi1> to vector<8x128xi1>
    %381 = arith.select %380, %378, %377 : vector<8x128xi1>, vector<8x128xf32>
    %382 = arith.negf %381 : vector<8x128xf32>
    %383 = math.exp %382 : vector<8x128xf32>
    %cst_107 = arith.constant 1.000000e+00 : f32
    %384 = vector.broadcast %cst_107 : f32 to vector<8x128xf32>
    %385 = arith.addf %384, %383 : vector<8x128xf32>
    %386 = arith.divf %384, %385 : vector<8x128xf32>
    %387 = arith.addf %386, %386 : vector<8x128xf32>
    %cst_108 = arith.constant 1.000000e+00 : f32
    %388 = vector.broadcast %cst_108 : f32 to vector<8x128xf32>
    %389 = arith.subf %387, %388 : vector<8x128xf32>
    %390 = vector.shape_cast %21 : vector<1x128xi1> to vector<1x128xi1>
    %391 = vector.broadcast %390 : vector<1x128xi1> to vector<8x128xi1>
    %392 = arith.select %391, %389, %386 : vector<8x128xi1>, vector<8x128xf32>
    %c120_i32_109 = arith.constant 120 : i32
    %393 = tpu.dynamic_rotate %392 by %c120_i32_109 dim 1 : vector<8x128xf32>, i32 -> vector<8x128xf32>
    %c112_i32_110 = arith.constant 112 : i32
    %394 = tpu.dynamic_rotate %392 by %c112_i32_110 dim 1 : vector<8x128xf32>, i32 -> vector<8x128xf32>
    %c104_i32_111 = arith.constant 104 : i32
    %395 = tpu.dynamic_rotate %392 by %c104_i32_111 dim 1 : vector<8x128xf32>, i32 -> vector<8x128xf32>
    %cst_112 = arith.constant 0.000000e+00 : f32
    %396 = vector.shape_cast %24 : vector<1x128xi1> to vector<1x128xi1>
    %397 = vector.broadcast %396 : vector<1x128xi1> to vector<8x128xi1>
    %398 = vector.broadcast %cst_112 : f32 to vector<8x128xf32>
    %399 = arith.select %397, %392, %398 : vector<8x128xi1>, vector<8x128xf32>
    %400 = arith.mulf %393, %333 : vector<8x128xf32>
    %401 = arith.mulf %399, %394 : vector<8x128xf32>
    %402 = arith.addf %400, %401 : vector<8x128xf32>
    %403 = math.tanh %402 : vector<8x128xf32>
    %404 = arith.mulf %395, %403 : vector<8x128xf32>
    %405 = arith.truncf %404 : vector<8x128xf32> to vector<8x128xbf16>
    %406 = tpu.concatenate %405, %367 in 1 : vector<8x128xbf16>, vector<8x128xbf16> -> vector<8x256xbf16>
    %cst_113 = arith.constant dense<0.000000e+00> : vector<8x128xf32>
    %407 = tpu.matmul %406, %12, %cst_113 {dimension_numbers = #tpu.dot_dimension_numbers<[1], [0], [0], [1], [0, 0, 1, 1], [], []>} : vector<8x256xbf16>, vector<256x128xbf16>, vector<8x128xf32> -> vector<8x128xf32>
    %408 = arith.addf %407, %15 : vector<8x128xf32>
    %409 = arith.addf %408, %408 : vector<8x128xf32>
    %410 = vector.shape_cast %21 : vector<1x128xi1> to vector<1x128xi1>
    %411 = vector.broadcast %410 : vector<1x128xi1> to vector<8x128xi1>
    %412 = arith.select %411, %409, %408 : vector<8x128xi1>, vector<8x128xf32>
    %413 = arith.negf %412 : vector<8x128xf32>
    %414 = math.exp %413 : vector<8x128xf32>
    %cst_114 = arith.constant 1.000000e+00 : f32
    %415 = vector.broadcast %cst_114 : f32 to vector<8x128xf32>
    %416 = arith.addf %415, %414 : vector<8x128xf32>
    %417 = arith.divf %415, %416 : vector<8x128xf32>
    %418 = arith.addf %417, %417 : vector<8x128xf32>
    %cst_115 = arith.constant 1.000000e+00 : f32
    %419 = vector.broadcast %cst_115 : f32 to vector<8x128xf32>
    %420 = arith.subf %418, %419 : vector<8x128xf32>
    %421 = vector.shape_cast %21 : vector<1x128xi1> to vector<1x128xi1>
    %422 = vector.broadcast %421 : vector<1x128xi1> to vector<8x128xi1>
    %423 = arith.select %422, %420, %417 : vector<8x128xi1>, vector<8x128xf32>
    %c120_i32_116 = arith.constant 120 : i32
    %424 = tpu.dynamic_rotate %423 by %c120_i32_116 dim 1 : vector<8x128xf32>, i32 -> vector<8x128xf32>
    %c112_i32_117 = arith.constant 112 : i32
    %425 = tpu.dynamic_rotate %423 by %c112_i32_117 dim 1 : vector<8x128xf32>, i32 -> vector<8x128xf32>
    %c104_i32_118 = arith.constant 104 : i32
    %426 = tpu.dynamic_rotate %423 by %c104_i32_118 dim 1 : vector<8x128xf32>, i32 -> vector<8x128xf32>
    %cst_119 = arith.constant 0.000000e+00 : f32
    %427 = vector.shape_cast %24 : vector<1x128xi1> to vector<1x128xi1>
    %428 = vector.broadcast %427 : vector<1x128xi1> to vector<8x128xi1>
    %429 = vector.broadcast %cst_119 : f32 to vector<8x128xf32>
    %430 = arith.select %428, %423, %429 : vector<8x128xi1>, vector<8x128xf32>
    %431 = arith.mulf %424, %364 : vector<8x128xf32>
    %432 = arith.mulf %430, %425 : vector<8x128xf32>
    %433 = arith.addf %431, %432 : vector<8x128xf32>
    %434 = math.tanh %433 : vector<8x128xf32>
    %435 = arith.mulf %426, %434 : vector<8x128xf32>
    %436 = arith.truncf %435 : vector<8x128xf32> to vector<8x128xbf16>
    %437 = arith.index_cast %c5_i32 : i32 to index
    %c0_120 = arith.constant 0 : index
    %c0_121 = arith.constant 0 : index
    %438 = vector.load %arg9[%437, %c0_120, %c0_121] : memref<8x8x128xbf16, #tpu.memory_space<vmem>>, vector<1x8x128xbf16>
    %439 = vector.shape_cast %438 : vector<1x8x128xbf16> to vector<8x128xbf16>
    %440 = vector.shape_cast %436 : vector<8x128xbf16> to vector<1x8x128xbf16>
    tpu.vector_store %arg9[%437, %c0_120, %c0_121], %440 {strides = array<i32>} : memref<8x8x128xbf16, #tpu.memory_space<vmem>>, vector<1x8x128xbf16>,
    %c6_i32 = arith.constant 6 : i32
    %441 = arith.index_cast %c6_i32 : i32 to index
    %c0_122 = arith.constant 0 : index
    %c0_123 = arith.constant 0 : index
    %442 = vector.load %arg8[%441, %c0_122, %c0_123] : memref<8x8x128xbf16, #tpu.memory_space<vmem>>, vector<1x8x128xbf16>
    %443 = vector.shape_cast %442 : vector<1x8x128xbf16> to vector<8x128xbf16>
    %444 = arith.extf %443 : vector<8x128xbf16> to vector<8x128xf32>
    %cst_124 = arith.constant dense<0.000000e+00> : vector<8x128xf32>
    %445 = tpu.matmul %405, %11, %cst_124 {dimension_numbers = #tpu.dot_dimension_numbers<[1], [0], [0], [1], [0, 0, 1, 1], [], []>} : vector<8x128xbf16>, vector<128x128xbf16>, vector<8x128xf32> -> vector<8x128xf32>
    %446 = arith.addf %444, %445 : vector<8x128xf32>
    %447 = arith.addf %446, %446 : vector<8x128xf32>
    %448 = vector.shape_cast %21 : vector<1x128xi1> to vector<1x128xi1>
    %449 = vector.broadcast %448 : vector<1x128xi1> to vector<8x128xi1>
    %450 = arith.select %449, %447, %446 : vector<8x128xi1>, vector<8x128xf32>
    %451 = arith.negf %450 : vector<8x128xf32>
    %452 = math.exp %451 : vector<8x128xf32>
    %cst_125 = arith.constant 1.000000e+00 : f32
    %453 = vector.broadcast %cst_125 : f32 to vector<8x128xf32>
    %454 = arith.addf %453, %452 : vector<8x128xf32>
    %455 = arith.divf %453, %454 : vector<8x128xf32>
    %456 = arith.addf %455, %455 : vector<8x128xf32>
    %cst_126 = arith.constant 1.000000e+00 : f32
    %457 = vector.broadcast %cst_126 : f32 to vector<8x128xf32>
    %458 = arith.subf %456, %457 : vector<8x128xf32>
    %459 = vector.shape_cast %21 : vector<1x128xi1> to vector<1x128xi1>
    %460 = vector.broadcast %459 : vector<1x128xi1> to vector<8x128xi1>
    %461 = arith.select %460, %458, %455 : vector<8x128xi1>, vector<8x128xf32>
    %c120_i32_127 = arith.constant 120 : i32
    %462 = tpu.dynamic_rotate %461 by %c120_i32_127 dim 1 : vector<8x128xf32>, i32 -> vector<8x128xf32>
    %c112_i32_128 = arith.constant 112 : i32
    %463 = tpu.dynamic_rotate %461 by %c112_i32_128 dim 1 : vector<8x128xf32>, i32 -> vector<8x128xf32>
    %c104_i32_129 = arith.constant 104 : i32
    %464 = tpu.dynamic_rotate %461 by %c104_i32_129 dim 1 : vector<8x128xf32>, i32 -> vector<8x128xf32>
    %cst_130 = arith.constant 0.000000e+00 : f32
    %465 = vector.shape_cast %24 : vector<1x128xi1> to vector<1x128xi1>
    %466 = vector.broadcast %465 : vector<1x128xi1> to vector<8x128xi1>
    %467 = vector.broadcast %cst_130 : f32 to vector<8x128xf32>
    %468 = arith.select %466, %461, %467 : vector<8x128xi1>, vector<8x128xf32>
    %469 = arith.mulf %462, %402 : vector<8x128xf32>
    %470 = arith.mulf %468, %463 : vector<8x128xf32>
    %471 = arith.addf %469, %470 : vector<8x128xf32>
    %472 = math.tanh %471 : vector<8x128xf32>
    %473 = arith.mulf %464, %472 : vector<8x128xf32>
    %474 = arith.truncf %473 : vector<8x128xf32> to vector<8x128xbf16>
    %475 = tpu.concatenate %474, %436 in 1 : vector<8x128xbf16>, vector<8x128xbf16> -> vector<8x256xbf16>
    %cst_131 = arith.constant dense<0.000000e+00> : vector<8x128xf32>
    %476 = tpu.matmul %475, %12, %cst_131 {dimension_numbers = #tpu.dot_dimension_numbers<[1], [0], [0], [1], [0, 0, 1, 1], [], []>} : vector<8x256xbf16>, vector<256x128xbf16>, vector<8x128xf32> -> vector<8x128xf32>
    %477 = arith.addf %476, %15 : vector<8x128xf32>
    %478 = arith.addf %477, %477 : vector<8x128xf32>
    %479 = vector.shape_cast %21 : vector<1x128xi1> to vector<1x128xi1>
    %480 = vector.broadcast %479 : vector<1x128xi1> to vector<8x128xi1>
    %481 = arith.select %480, %478, %477 : vector<8x128xi1>, vector<8x128xf32>
    %482 = arith.negf %481 : vector<8x128xf32>
    %483 = math.exp %482 : vector<8x128xf32>
    %cst_132 = arith.constant 1.000000e+00 : f32
    %484 = vector.broadcast %cst_132 : f32 to vector<8x128xf32>
    %485 = arith.addf %484, %483 : vector<8x128xf32>
    %486 = arith.divf %484, %485 : vector<8x128xf32>
    %487 = arith.addf %486, %486 : vector<8x128xf32>
    %cst_133 = arith.constant 1.000000e+00 : f32
    %488 = vector.broadcast %cst_133 : f32 to vector<8x128xf32>
    %489 = arith.subf %487, %488 : vector<8x128xf32>
    %490 = vector.shape_cast %21 : vector<1x128xi1> to vector<1x128xi1>
    %491 = vector.broadcast %490 : vector<1x128xi1> to vector<8x128xi1>
    %492 = arith.select %491, %489, %486 : vector<8x128xi1>, vector<8x128xf32>
    %c120_i32_134 = arith.constant 120 : i32
    %493 = tpu.dynamic_rotate %492 by %c120_i32_134 dim 1 : vector<8x128xf32>, i32 -> vector<8x128xf32>
    %c112_i32_135 = arith.constant 112 : i32
    %494 = tpu.dynamic_rotate %492 by %c112_i32_135 dim 1 : vector<8x128xf32>, i32 -> vector<8x128xf32>
    %c104_i32_136 = arith.constant 104 : i32
    %495 = tpu.dynamic_rotate %492 by %c104_i32_136 dim 1 : vector<8x128xf32>, i32 -> vector<8x128xf32>
    %cst_137 = arith.constant 0.000000e+00 : f32
    %496 = vector.shape_cast %24 : vector<1x128xi1> to vector<1x128xi1>
    %497 = vector.broadcast %496 : vector<1x128xi1> to vector<8x128xi1>
    %498 = vector.broadcast %cst_137 : f32 to vector<8x128xf32>
    %499 = arith.select %497, %492, %498 : vector<8x128xi1>, vector<8x128xf32>
    %500 = arith.mulf %493, %433 : vector<8x128xf32>
    %501 = arith.mulf %499, %494 : vector<8x128xf32>
    %502 = arith.addf %500, %501 : vector<8x128xf32>
    %503 = math.tanh %502 : vector<8x128xf32>
    %504 = arith.mulf %495, %503 : vector<8x128xf32>
    %505 = arith.truncf %504 : vector<8x128xf32> to vector<8x128xbf16>
    %506 = arith.index_cast %c6_i32 : i32 to index
    %c0_138 = arith.constant 0 : index
    %c0_139 = arith.constant 0 : index
    %507 = vector.load %arg9[%506, %c0_138, %c0_139] : memref<8x8x128xbf16, #tpu.memory_space<vmem>>, vector<1x8x128xbf16>
    %508 = vector.shape_cast %507 : vector<1x8x128xbf16> to vector<8x128xbf16>
    %509 = vector.shape_cast %505 : vector<8x128xbf16> to vector<1x8x128xbf16>
    tpu.vector_store %arg9[%506, %c0_138, %c0_139], %509 {strides = array<i32>} : memref<8x8x128xbf16, #tpu.memory_space<vmem>>, vector<1x8x128xbf16>,
    %c7_i32 = arith.constant 7 : i32
    %510 = arith.index_cast %c7_i32 : i32 to index
    %c0_140 = arith.constant 0 : index
    %c0_141 = arith.constant 0 : index
    %511 = vector.load %arg8[%510, %c0_140, %c0_141] : memref<8x8x128xbf16, #tpu.memory_space<vmem>>, vector<1x8x128xbf16>
    %512 = vector.shape_cast %511 : vector<1x8x128xbf16> to vector<8x128xbf16>
    %513 = arith.extf %512 : vector<8x128xbf16> to vector<8x128xf32>
    %cst_142 = arith.constant dense<0.000000e+00> : vector<8x128xf32>
    %514 = tpu.matmul %474, %11, %cst_142 {dimension_numbers = #tpu.dot_dimension_numbers<[1], [0], [0], [1], [0, 0, 1, 1], [], []>} : vector<8x128xbf16>, vector<128x128xbf16>, vector<8x128xf32> -> vector<8x128xf32>
    %515 = arith.addf %513, %514 : vector<8x128xf32>
    %516 = arith.addf %515, %515 : vector<8x128xf32>
    %517 = vector.shape_cast %21 : vector<1x128xi1> to vector<1x128xi1>
    %518 = vector.broadcast %517 : vector<1x128xi1> to vector<8x128xi1>
    %519 = arith.select %518, %516, %515 : vector<8x128xi1>, vector<8x128xf32>
    %520 = arith.negf %519 : vector<8x128xf32>
    %521 = math.exp %520 : vector<8x128xf32>
    %cst_143 = arith.constant 1.000000e+00 : f32
    %522 = vector.broadcast %cst_143 : f32 to vector<8x128xf32>
    %523 = arith.addf %522, %521 : vector<8x128xf32>
    %524 = arith.divf %522, %523 : vector<8x128xf32>
    %525 = arith.addf %524, %524 : vector<8x128xf32>
    %cst_144 = arith.constant 1.000000e+00 : f32
    %526 = vector.broadcast %cst_144 : f32 to vector<8x128xf32>
    %527 = arith.subf %525, %526 : vector<8x128xf32>
    %528 = vector.shape_cast %21 : vector<1x128xi1> to vector<1x128xi1>
    %529 = vector.broadcast %528 : vector<1x128xi1> to vector<8x128xi1>
    %530 = arith.select %529, %527, %524 : vector<8x128xi1>, vector<8x128xf32>
    %c120_i32_145 = arith.constant 120 : i32
    %531 = tpu.dynamic_rotate %530 by %c120_i32_145 dim 1 : vector<8x128xf32>, i32 -> vector<8x128xf32>
    %c112_i32_146 = arith.constant 112 : i32
    %532 = tpu.dynamic_rotate %530 by %c112_i32_146 dim 1 : vector<8x128xf32>, i32 -> vector<8x128xf32>
    %c104_i32_147 = arith.constant 104 : i32
    %533 = tpu.dynamic_rotate %530 by %c104_i32_147 dim 1 : vector<8x128xf32>, i32 -> vector<8x128xf32>
    %cst_148 = arith.constant 0.000000e+00 : f32
    %534 = vector.shape_cast %24 : vector<1x128xi1> to vector<1x128xi1>
    %535 = vector.broadcast %534 : vector<1x128xi1> to vector<8x128xi1>
    %536 = vector.broadcast %cst_148 : f32 to vector<8x128xf32>
    %537 = arith.select %535, %530, %536 : vector<8x128xi1>, vector<8x128xf32>
    %538 = arith.mulf %531, %471 : vector<8x128xf32>
    %539 = arith.mulf %537, %532 : vector<8x128xf32>
    %540 = arith.addf %538, %539 : vector<8x128xf32>
    %541 = math.tanh %540 : vector<8x128xf32>
    %542 = arith.mulf %533, %541 : vector<8x128xf32>
    %543 = arith.truncf %542 : vector<8x128xf32> to vector<8x128xbf16>
    %544 = tpu.concatenate %543, %505 in 1 : vector<8x128xbf16>, vector<8x128xbf16> -> vector<8x256xbf16>
    %cst_149 = arith.constant dense<0.000000e+00> : vector<8x128xf32>
    %545 = tpu.matmul %544, %12, %cst_149 {dimension_numbers = #tpu.dot_dimension_numbers<[1], [0], [0], [1], [0, 0, 1, 1], [], []>} : vector<8x256xbf16>, vector<256x128xbf16>, vector<8x128xf32> -> vector<8x128xf32>
    %546 = arith.addf %545, %15 : vector<8x128xf32>
    %547 = arith.addf %546, %546 : vector<8x128xf32>
    %548 = vector.shape_cast %21 : vector<1x128xi1> to vector<1x128xi1>
    %549 = vector.broadcast %548 : vector<1x128xi1> to vector<8x128xi1>
    %550 = arith.select %549, %547, %546 : vector<8x128xi1>, vector<8x128xf32>
    %551 = arith.negf %550 : vector<8x128xf32>
    %552 = math.exp %551 : vector<8x128xf32>
    %cst_150 = arith.constant 1.000000e+00 : f32
    %553 = vector.broadcast %cst_150 : f32 to vector<8x128xf32>
    %554 = arith.addf %553, %552 : vector<8x128xf32>
    %555 = arith.divf %553, %554 : vector<8x128xf32>
    %556 = arith.addf %555, %555 : vector<8x128xf32>
    %cst_151 = arith.constant 1.000000e+00 : f32
    %557 = vector.broadcast %cst_151 : f32 to vector<8x128xf32>
    %558 = arith.subf %556, %557 : vector<8x128xf32>
    %559 = vector.shape_cast %21 : vector<1x128xi1> to vector<1x128xi1>
    %560 = vector.broadcast %559 : vector<1x128xi1> to vector<8x128xi1>
    %561 = arith.select %560, %558, %555 : vector<8x128xi1>, vector<8x128xf32>
    %c120_i32_152 = arith.constant 120 : i32
    %562 = tpu.dynamic_rotate %561 by %c120_i32_152 dim 1 : vector<8x128xf32>, i32 -> vector<8x128xf32>
    %c112_i32_153 = arith.constant 112 : i32
    %563 = tpu.dynamic_rotate %561 by %c112_i32_153 dim 1 : vector<8x128xf32>, i32 -> vector<8x128xf32>
    %c104_i32_154 = arith.constant 104 : i32
    %564 = tpu.dynamic_rotate %561 by %c104_i32_154 dim 1 : vector<8x128xf32>, i32 -> vector<8x128xf32>
    %cst_155 = arith.constant 0.000000e+00 : f32
    %565 = vector.shape_cast %24 : vector<1x128xi1> to vector<1x128xi1>
    %566 = vector.broadcast %565 : vector<1x128xi1> to vector<8x128xi1>
    %567 = vector.broadcast %cst_155 : f32 to vector<8x128xf32>
    %568 = arith.select %566, %561, %567 : vector<8x128xi1>, vector<8x128xf32>
    %569 = arith.mulf %562, %502 : vector<8x128xf32>
    %570 = arith.mulf %568, %563 : vector<8x128xf32>
    %571 = arith.addf %569, %570 : vector<8x128xf32>
    %572 = math.tanh %571 : vector<8x128xf32>
    %573 = arith.mulf %564, %572 : vector<8x128xf32>
    %574 = arith.truncf %573 : vector<8x128xf32> to vector<8x128xbf16>
    %575 = arith.index_cast %c7_i32 : i32 to index
    %c0_156 = arith.constant 0 : index
    %c0_157 = arith.constant 0 : index
    %576 = vector.load %arg9[%575, %c0_156, %c0_157] : memref<8x8x128xbf16, #tpu.memory_space<vmem>>, vector<1x8x128xbf16>
    %577 = vector.shape_cast %576 : vector<1x8x128xbf16> to vector<8x128xbf16>
    %578 = vector.shape_cast %574 : vector<8x128xbf16> to vector<1x8x128xbf16>
    tpu.vector_store %arg9[%575, %c0_156, %c0_157], %578 {strides = array<i32>} : memref<8x8x128xbf16, #tpu.memory_space<vmem>>, vector<1x8x128xbf16>,
    %c8_i32_158 = arith.constant 8 : i32
    %c0_159 = arith.constant 0 : index
    %c0_160 = arith.constant 0 : index
    %c0_161 = arith.constant 0 : index
    %579 = vector.load %arg9[%c0_159, %c0_160, %c0_161] : memref<8x8x128xbf16, #tpu.memory_space<vmem>>, vector<8x8x128xbf16>
    %580 = arith.extf %579 : vector<8x8x128xbf16> to vector<8x8x128xf32>
    %581 = tpu.iota {dimensions = array<i32: 2>} : vector<1x1x128xi32>
    %c8_i32_162 = arith.constant 8 : i32
    %582 = vector.broadcast %c8_i32_162 : i32 to vector<1x1x128xi32>
    %583 = arith.cmpi slt, %581, %582 : vector<1x1x128xi32>
    %cst_163 = arith.constant -3.40282347E+38 : f32
    %584 = vector.shape_cast %583 : vector<1x1x128xi1> to vector<1x1x128xi1>
    %585 = vector.broadcast %584 : vector<1x1x128xi1> to vector<8x8x128xi1>
    %586 = vector.broadcast %cst_163 : f32 to vector<8x8x128xf32>
    %587 = arith.select %585, %580, %586 : vector<8x8x128xi1>, vector<8x8x128xf32>
    %cst_164 = arith.constant dense<0xFF800000> : vector<8x8xf32>
    %588 = vector.multi_reduction <maximumf>, %587, %cst_164 [2] : vector<8x8x128xf32> to vector<8x8xf32>
    %589 = vector.shape_cast %588 : vector<8x8xf32> to vector<8x8x1xf32>
    %590 = vector.broadcast %589 : vector<8x8x1xf32> to vector<8x8x128xf32>
    %591 = arith.subf %580, %590 : vector<8x8x128xf32>
    %592 = math.exp %591 : vector<8x8x128xf32>
    %cst_165 = arith.constant 0.000000e+00 : f32
    %593 = vector.shape_cast %583 : vector<1x1x128xi1> to vector<1x1x128xi1>
    %594 = vector.broadcast %593 : vector<1x1x128xi1> to vector<8x8x128xi1>
    %595 = vector.broadcast %cst_165 : f32 to vector<8x8x128xf32>
    %596 = arith.select %594, %592, %595 : vector<8x8x128xi1>, vector<8x8x128xf32>
    %cst_166 = arith.constant dense<0.000000e+00> : vector<8x8xf32>
    %597 = vector.multi_reduction <add>, %596, %cst_166 [2] : vector<8x8x128xf32> to vector<8x8xf32>
    %598 = vector.shape_cast %597 : vector<8x8xf32> to vector<8x8x1xf32>
    %599 = vector.broadcast %598 : vector<8x8x1xf32> to vector<8x8x128xf32>
    %600 = arith.divf %596, %599 : vector<8x8x128xf32>
    %601 = vector.extract_strided_slice %600 {offsets = [0, 0, 0], sizes = [8, 8, 7], strides = [1, 1, 1]} : vector<8x8x128xf32> to vector<8x8x7xf32>
    %cst_167 = arith.constant dense<0.000000e+00> : vector<8x7x16xf32>
    %602 = tpu.matmul %601, %0, %cst_167 {dimension_numbers = #tpu.dot_dimension_numbers<[0], [0], [2], [2], [0, 1, 0, 2, 1, 2], [1], [1]>} : vector<8x8x7xf32>, vector<8x8x16xf32>, vector<8x7x16xf32> -> vector<8x7x16xf32>
    %c0_168 = arith.constant 0 : index
    %c0_169 = arith.constant 0 : index
    %c0_170 = arith.constant 0 : index
    %603 = vector.load %arg7[%c0_168, %c0_169, %c0_170] : memref<8x7x16xf32, #tpu.memory_space<vmem>>, vector<8x7x16xf32>
    tpu.vector_store %arg7[%c0_168, %c0_169, %c0_170], %602 {strides = array<i32>} : memref<8x7x16xf32, #tpu.memory_space<vmem>>, vector<8x7x16xf32>,
    return
  }
  func.func @transform_0(%arg0: i32) -> (i32, i32, i32) {
    %c0_i32 = arith.constant 0 : i32
    %c0_i32_0 = arith.constant 0 : i32
    %c0_i32_1 = arith.constant 0 : i32
    return %c0_i32, %arg0, %c0_i32_0 : i32, i32, i32
  }
  func.func @transform_1(%arg0: i32) -> (i32, i32) {
    %c0_i32 = arith.constant 0 : i32
    %c0_i32_0 = arith.constant 0 : i32
    %c0_i32_1 = arith.constant 0 : i32
    return %c0_i32, %c0_i32_0 : i32, i32
  }
  func.func @transform_2(%arg0: i32) -> (i32, i32) {
    %c0_i32 = arith.constant 0 : i32
    %c0_i32_0 = arith.constant 0 : i32
    %c0_i32_1 = arith.constant 0 : i32
    return %c0_i32, %c0_i32_0 : i32, i32
  }
  func.func @transform_3(%arg0: i32) -> (i32, i32) {
    %c0_i32 = arith.constant 0 : i32
    %c0_i32_0 = arith.constant 0 : i32
    %c0_i32_1 = arith.constant 0 : i32
    return %c0_i32, %c0_i32_0 : i32, i32
  }
  func.func @transform_4(%arg0: i32) -> (i32, i32) {
    %c0_i32 = arith.constant 0 : i32
    %c0_i32_0 = arith.constant 0 : i32
    %c0_i32_1 = arith.constant 0 : i32
    return %c0_i32, %c0_i32_0 : i32, i32
  }
  func.func @transform_5(%arg0: i32) -> (i32, i32) {
    %c0_i32 = arith.constant 0 : i32
    %c0_i32_0 = arith.constant 0 : i32
    %c0_i32_1 = arith.constant 0 : i32
    return %c0_i32, %c0_i32_0 : i32, i32
  }
  func.func @transform_6(%arg0: i32) -> (i32, i32, i32) {
    %c0_i32 = arith.constant 0 : i32
    %c0_i32_0 = arith.constant 0 : i32
    %c0_i32_1 = arith.constant 0 : i32
    return %arg0, %c0_i32, %c0_i32_0 : i32, i32, i32
  }
}

</mosaic_0001>

<bundles_post_ra>
// kernel: tpu_custom_call.1
= control target key start
LH: loop header
LB: loop body
LE: loop exit
PB: predicated region body
PF: predicated region fallthrough
CT: control target
= control target key end

     0   :  { %11 = vsyncpa [#allocation5], 0  ;;  %s3876_s0 = inlined_call_operand.hbm [shape: f32[8,8,16], index: 0, kind: input, shape index: {}]   ;;  %s3877_s1 = inlined_call_operand.hbm [shape: bf16[16,128], index: 1, kind: input, shape index: {}]   ;;  %s3878_s2 = inlined_call_operand.hbm [shape: bf16[128,128], index: 2, kind: input, shape index: {}]   ;;  %s3879_s3 = inlined_call_operand.vmem [shape: f32[1,128], index: 3, kind: input, shape index: {}]   ;;  %s3880_s4 = inlined_call_operand.hbm [shape: bf16[256,128], index: 4, kind: input, shape index: {}]   ;;  %s3881_s5 = inlined_call_operand.vmem [shape: f32[1,128], index: 5, kind: input, shape index: {}]   ;;  %s3882_s6 = inlined_call_operand.vmem [shape: f32[8,7,16], index: 6, kind: output, shape index: {}]  }
   0x1   :  { %12 = vsyncpa [#allocation7], 0  ;;  %s31_s23 = sshll.u32 %s3877_s1, 4  ;;  %s32_s23 = int_to_ptr.hbm [resolvable:$true] %s31_s23 }
   0x2   :  { %13 = vsyncpa [#allocation10], 0  ;;  %s3062_s24 = smov [#allocation6]   ;;  %s18_s28 = sshll.u32 %s3876_s0, 4  ;;  %s19_s28 = int_to_ptr.hbm [resolvable:$true] %s18_s28 }
   0x3   :  { %s33_s25 = sshll.u32 %s3062_s24, 4  ;;  %s3063_s29 = smov 64   ;;  %s34_s25 = int_to_ptr.vmem [resolvable:$true] %s33_s25 }
   0x4   :  { %s3064_s30 = smov 4   ;;  %s3065_s7 = smov [#allocation4]  }
   0x5   :  { %39 = dma.hbm_to_vmem [thread:$0]  %s32_s23, 128, %s34_s25, [#allocation7], %s3063_s29, %s3063_s29, %s3064_s30  }
   0x6   :  { %s20_s8 = sshll.u32 %s3065_s7, 4  ;;  %s3066_s9 = smov 128   ;;  %s21_s8 = int_to_ptr.vmem [resolvable:$true] %s20_s8 }
   0x7   :  { %s3067_s10 = smov 8   ;;  %s44_s12 = sshll.u32 %s3878_s2, 4  ;;  %s45_s12 = int_to_ptr.hbm [resolvable:$true] %s44_s12 }
   0x8   :  { %26 = dma.hbm_to_vmem [thread:$0]  %s19_s28, 1024, %s21_s8, [#allocation5], %s3066_s9, %s3066_s9, %s3067_s10  }
   0x9   :  { %s3068_s13 = smov [#allocation8]   ;;  %s59_s16 = sshll.u32 %s3880_s4, 4  ;;  %s60_s16 = int_to_ptr.hbm [resolvable:$true] %s59_s16 }
   0xa   :  { %s46_s14 = sshll.u32 %s3068_s13, 4  ;;  %s3069_s17 = smov [#allocation9]   ;;  %s47_s14 = int_to_ptr.vmem [resolvable:$true] %s46_s14 }
   0xb   :  { %52 = dma.hbm_to_vmem [thread:$0]  %s45_s12, 1024, %s47_s14, [#allocation7], %s3063_s29, %s3063_s29, %s3064_s30  }
   0xc   :  { %s61_s18 = sshll.u32 %s3069_s17, 4  ;;  %s62_s18 = int_to_ptr.vmem [resolvable:$true] %s61_s18 }
   0xd   :  { %67 = dma.hbm_to_vmem [thread:$0]  %s60_s16, 2048, %s62_s18, [#allocation10], %s3063_s29, %s3063_s29, %s3064_s30  }
   0xe   :  { %3056 = dma.done.wait [#allocation5], 1024  }
   0xf   :  { %3057 = vsyncadd [#allocation5], 4294966272 }
  0x10   :  { %3058 = dma.done.wait [#allocation7], 1152  }
  0x11   :  { %3059 = vsyncadd [#allocation7], 4294966144 }
  0x12   :  { %3060 = dma.done.wait [#allocation10], 2048  }
  0x13   :  { %3061 = vsyncadd [#allocation10], 4294965248  ;;  %v3123_v0 = vld [vmem:[#allocation8 + $0x38] sm:$0xff]  ;;  %v88_v3 = vld [vmem:[#allocation4 + $0x8] sm:$0xff]  ;;  %vm135_vm0 = vcmask 130048   ;;  %v3070_v16 = vmov 0   ;;  %v245_v23 = vlaneseq }
  0x14   :  { %v2715_v1 = vld [vmem:[#allocation6] sm:$0xff]  ;;  %301 = vmatpush.bf16.msra.mxu1 %v3123_v0  ;;  %v96_v5 = vpack.c.bf16 %v88_v3, %v88_v3  ;;  %v3126_v6 = vld [vmem:[#allocation8 + $0x30] sm:$0xff]  ;;  %v3130_v10 = vld [vmem:[#allocation8 + $0x28] sm:$0xff]  ;;  %s3072_s19 = smov 120   ;;  %s3073_s20 = smov 112  }
  0x15   :  { %v87_v2 = vld [vmem:[#allocation4] sm:$0xff]  ;;  %155 = vmatpush.bf16.msra.mxu0 %v2715_v1  ;;  %v3135_v11 = vld [vmem:[#allocation8 + $0x20] sm:$0xff]  ;;  %v3143_v13 = vld [vmem:[#allocation8 + $0x10] sm:$0xff]  ;;  %v3172_v24 = vand.u32 127, %v245_v23 }
  0x16   :  { %v95_v4 = vpack.c.bf16 %v87_v2, %v87_v2  ;;  %v118_v8 = vunpack.c.l.b16 %v96_v5  ;;  %v3139_v12 = vld [vmem:[#allocation8 + $0x18] sm:$0xff]  ;;  %v3147_v14 = vld [vmem:[#allocation8 + $0x8] sm:$0xff]  ;;  %v3151_v15 = vld [vmem:[#allocation8] sm:$0xff] }
  0x17   :  { %v3168_v18 = vld [vmem:[%s3879_s3] ss:$0 sm:$0xff]  ;;  %vm247_vm1 = vcmp.ge.s32.totalorder %v3172_v24, 16  ;;  %vm248_vm2 = vcmp.lt.s32.totalorder %v3172_v24, 24  ;;  %v3190_v38 = vld [vmem:[#allocation9 + $0x70] sm:$0xff]  ;;  %v3198_v40 = vld [vmem:[#allocation9 + $0x68] sm:$0xff] }
  0x18   :  { %v117_v7 = vunpack.c.l.b16 %v95_v4  ;;  %302 = vmatpush.bf16.msra.mxu1 %v3126_v6  ;;  %vm3179_vm3 = vmand %vm247_vm1, %vm248_vm2  ;;  %v3185_v36 = vld [vmem:[#allocation9 + $0x78] sm:$0xff]  ;;  %v3193_v39 = vld [vmem:[#allocation9 + $0x30] sm:$0xff]  ;;  %s3071_s3 = smov 104   ;;  %vm250_vm8 = vcmp.lt.s32.totalorder %v3172_v24, 8 }
  0x19   :  { %638 = vmatpush.bf16.msrb.mxu0 %v3123_v0  ;;  %v3187_v37 = vld [vmem:[#allocation9 + $0x38] sm:$0xff]  ;;  %465 = vmatpush.bf16.msra.mxu3 %v3185_v36  ;;  %v3204_v43 = vld [vmem:[#allocation9 + $0x60] sm:$0xff]  ;;  %v3212_v55 = vld [vmem:[#allocation9 + $0x28] sm:$0xff] }
  0x1a   :  { %v125_v9 = vpack.c.b16 %v118_v8, %v117_v7  ;;  %452 = vmatpush.bf16.msra.mxu2 %v3187_v37  ;;  %v3214_v56 = vld [vmem:[#allocation9 + $0x58] sm:$0xff]  ;;  %v3217_v57 = vld [vmem:[#allocation9 + $0x20] sm:$0xff]  ;;  %v3221_v58 = vld [vmem:[#allocation9 + $0x50] sm:$0xff] }
  0x1b   :  { %v3228_v59 = vld [vmem:[#allocation9 + $0x18] sm:$0xff]  ;;  %v3231_v60 = vld [vmem:[#allocation9 + $0x48] sm:$0xff]  ;;  %v3236_v61 = vld [vmem:[#allocation9 + $0x10] sm:$0xff] }
  0x1c   :  { %2575 = vmatmul.msk.bf16.vlgmr.msra.gmra.mxu0 %vm135_vm0, %v125_v9  ;;  %303 = vmatpush.bf16.msra.mxu1 %v3130_v10  ;;  %v3238_v62 = vld [vmem:[#allocation9 + $0x40] sm:$0xff]  ;;  %v3241_v63 = vld [vmem:[#allocation9 + $0x8] sm:$0xff] }
  0x1d   :  { %639 = vmatpush.bf16.msrb.mxu0 %v3126_v6  ;;  %466 = vmatpush.bf16.msra.mxu3 %v3190_v38  ;;  %v3248_v1 = vld [vmem:[#allocation9] sm:$0xff] }
  0x1e   :  { %453 = vmatpush.bf16.msra.mxu2 %v3193_v39 }
  0x20   :  { %304 = vmatpush.bf16.msra.mxu1 %v3135_v11 }
  0x21   :  { %640 = vmatpush.bf16.msrb.mxu0 %v3130_v10  ;;  %467 = vmatpush.bf16.msra.mxu3 %v3198_v40 }
  0x22   :  { %454 = vmatpush.bf16.msra.mxu2 %v3212_v55 }
  0x24   :  { %305 = vmatpush.bf16.msra.mxu1 %v3139_v12 }
  0x25   :  { %641 = vmatpush.bf16.msrb.mxu0 %v3135_v11  ;;  %468 = vmatpush.bf16.msra.mxu3 %v3204_v43 }
  0x26   :  { %455 = vmatpush.bf16.msra.mxu2 %v3217_v57 }
  0x28   :  { %306 = vmatpush.bf16.msra.mxu1 %v3143_v13 }
  0x29   :  { %642 = vmatpush.bf16.msrb.mxu0 %v3139_v12  ;;  %469 = vmatpush.bf16.msra.mxu3 %v3214_v56 }
  0x2a   :  { %456 = vmatpush.bf16.msra.mxu2 %v3228_v59 }
  0x2c   :  { %307 = vmatpush.bf16.msra.mxu1 %v3147_v14 }
  0x2d   :  { %643 = vmatpush.bf16.msrb.mxu0 %v3143_v13  ;;  %470 = vmatpush.bf16.msra.mxu3 %v3221_v58 }
  0x2e   :  { %457 = vmatpush.bf16.msra.mxu2 %v3236_v61 }
  0x30   :  { %308 = vmatpush.bf16.msra.mxu1 %v3151_v15 }
  0x31   :  { %644 = vmatpush.bf16.msrb.mxu0 %v3147_v14  ;;  %471 = vmatpush.bf16.msra.mxu3 %v3231_v60 }
  0x32   :  { %458 = vmatpush.bf16.msra.mxu2 %v3241_v63 }
  0x33   :  { %309 = vmatmul.bf16.vlgmr.msra.gmra.mxu1 %v3070_v16 }
  0x34   :  { %519 = vmatpush.bf16.msrb.mxu1 %v3123_v0 }
  0x35   :  { %645 = vmatpush.bf16.msrb.mxu0 %v3151_v15  ;;  %472 = vmatpush.bf16.msra.mxu3 %v3238_v62 }
  0x36   :  { %459 = vmatpush.bf16.msra.mxu2 %v3248_v1 }
  0x38   :  { %520 = vmatpush.bf16.msrb.mxu1 %v3126_v6  ;;  %473 = vmatmul.bf16.vlgmr.msra.gmra.mxu3 %v3070_v16 }
  0x39   :  { %808 = vmatpush.bf16.msra.mxu0 %v3187_v37  ;;  %583 = vmatpush.bf16.msrb.mxu3 %v3185_v36 }
  0x3a   :  { %570 = vmatpush.bf16.msrb.mxu2 %v3187_v37 }
  0x3c   :  { %521 = vmatpush.bf16.msrb.mxu1 %v3130_v10 }
  0x3d   :  { %809 = vmatpush.bf16.msra.mxu0 %v3193_v39  ;;  %584 = vmatpush.bf16.msrb.mxu3 %v3190_v38 }
  0x3e   :  { %571 = vmatpush.bf16.msrb.mxu2 %v3193_v39 }
  0x40   :  { %522 = vmatpush.bf16.msrb.mxu1 %v3135_v11 }
  0x41   :  { %810 = vmatpush.bf16.msra.mxu0 %v3212_v55  ;;  %585 = vmatpush.bf16.msrb.mxu3 %v3198_v40 }
  0x42   :  { %572 = vmatpush.bf16.msrb.mxu2 %v3212_v55 }
  0x44   :  { %523 = vmatpush.bf16.msrb.mxu1 %v3139_v12 }
  0x45   :  { %811 = vmatpush.bf16.msra.mxu0 %v3217_v57  ;;  %586 = vmatpush.bf16.msrb.mxu3 %v3204_v43 }
  0x46   :  { %573 = vmatpush.bf16.msrb.mxu2 %v3217_v57 }
  0x48   :  { %524 = vmatpush.bf16.msrb.mxu1 %v3143_v13 }
  0x49   :  { %812 = vmatpush.bf16.msra.mxu0 %v3228_v59  ;;  %587 = vmatpush.bf16.msrb.mxu3 %v3214_v56 }
  0x4a   :  { %574 = vmatpush.bf16.msrb.mxu2 %v3228_v59 }
  0x4c   :  { %525 = vmatpush.bf16.msrb.mxu1 %v3147_v14 }
  0x4d   :  { %813 = vmatpush.bf16.msra.mxu0 %v3236_v61  ;;  %588 = vmatpush.bf16.msrb.mxu3 %v3221_v58 }
  0x4e   :  { %575 = vmatpush.bf16.msrb.mxu2 %v3236_v61 }
  0x50   :  { %526 = vmatpush.bf16.msrb.mxu1 %v3151_v15 }
  0x51   :  { %814 = vmatpush.bf16.msra.mxu0 %v3241_v63  ;;  %589 = vmatpush.bf16.msrb.mxu3 %v3231_v60 }
  0x52   :  { %576 = vmatpush.bf16.msrb.mxu2 %v3241_v63 }
  0x54   :  { %689 = vmatpush.bf16.msra.mxu1 %v3187_v37 }
  0x55   :  { %815 = vmatpush.bf16.msra.mxu0 %v3248_v1  ;;  %590 = vmatpush.bf16.msrb.mxu3 %v3238_v62 }
  0x56   :  { %577 = vmatpush.bf16.msrb.mxu2 %v3248_v1 }
  0x58   :  { %690 = vmatpush.bf16.msra.mxu1 %v3193_v39 }
  0x59   :  { %757 = vmatpush.bf16.msra.mxu3 %v3123_v0 }
  0x5c   :  { %691 = vmatpush.bf16.msra.mxu1 %v3212_v55 }
  0x5d   :  { %758 = vmatpush.bf16.msra.mxu3 %v3126_v6 }
  0x60   :  { %692 = vmatpush.bf16.msra.mxu1 %v3217_v57 }
  0x61   :  { %759 = vmatpush.bf16.msra.mxu3 %v3130_v10 }
  0x64   :  { %693 = vmatpush.bf16.msra.mxu1 %v3228_v59 }
  0x65   :  { %760 = vmatpush.bf16.msra.mxu3 %v3135_v11 }
  0x68   :  { %694 = vmatpush.bf16.msra.mxu1 %v3236_v61 }
  0x69   :  { %761 = vmatpush.bf16.msra.mxu3 %v3139_v12 }
  0x6c   :  { %695 = vmatpush.bf16.msra.mxu1 %v3241_v63 }
  0x6d   :  { %762 = vmatpush.bf16.msra.mxu3 %v3143_v13 }
  0x70   :  { %696 = vmatpush.bf16.msra.mxu1 %v3248_v1 }
  0x71   :  { %763 = vmatpush.bf16.msra.mxu3 %v3147_v14 }
  0x75   :  { %764 = vmatpush.bf16.msra.mxu3 %v3151_v15 }
  0x99   :  { %v157_v17 = vpop.f32.mrf.mxu0 }
  0x9a   :  { %v158_v20 = vadd.f32 %v3168_v18, %v157_v17 }
  0xa1   :  { %v159_v19 = vpop.f32.mrf.mxu0 }
  0xa2   :  { %v160_v21 = vadd.f32 %v3168_v18, %v159_v19 }
  0xa4   :  { %v2743_v22 = vpack.c.bf16 %v160_v21, %v158_v20 }
  0xa6   :  { %2744 = vst [vmem:[#allocation2] sm:$0xff] %v2743_v22  }
  0xad   :  { %v3174_v25 = vld [vmem:[#allocation2] sm:$0xff]  }
  0xae   :  { %v252_v26 = vunpack.c.l.bf16 %v3174_v25  ;;  %v518_v22 = vunpack.c.h.bf16 %v3174_v25 }
  0xb0   :  { %v310_v27 = vpop.f32.mrf.mxu1 }
  0xb1   :  { %v314_v28 = vadd.f32 %v310_v27, %v252_v26 }
  0xb3   :  { %v315_v30 = vadd.f32 %v314_v28, %v314_v28 }
  0xb5   :  { %v318_v31 = vsel %vm3179_vm3, %v315_v30, %v314_v28  ;;  %v3305_v28 = vld [vmem:[%s3881_s5] ss:$0 sm:$0xff] }
  0xb6   :  { %v2611_v32 = vmul.f32 -1.442695, %v318_v31 }
  0xb8   :  { %2799 = vpow2.f32 %v2611_v32  ;;  %v312_v33 = vpop.f32.mrf.mxu1 }
  0xbb   :  { %v474_v20 = vpop.f32.mrf.mxu3 }
  0xbe   :  { %v2800_v34 = vpop.eup %2799 }
  0xbf   :  { %v322_v35 = vadd.f32 1.0, %v2800_v34 }
  0xc1   :  { %2801 = vrcp.f32 %v322_v35  ;;  %v334_v45 = vand.u32 2147483648, %v322_v35  ;;  %v332_v47 = vand.u32 2147483647, %v322_v35  ;;  %vm328_vm5 = vweird.f32 %v322_v35 }
  0xc3   :  { %v335_v49 = vor.u32 1.1754944e-38, %v334_v45  ;;  %vm333_vm7 = vcmp.eq.f32.partialorder %v332_v47, 8.507059e+37  ;;  %v476_v21 = vpop.f32.mrf.mxu3 }
  0xc7   :  { %v2802_v41 = vpop.eup %2801 }
  0xc8   :  { %v324_v42 = vmul.f32 %v2802_v41, %v322_v35  ;;  %vm329_vm4 = vweird.f32 %v2802_v41 }
  0xc9   :  { %vm330_vm6 = vmor %vm328_vm5, %vm329_vm4 }
  0xca   :  { %v325_v44 = vsub.f32 1.0, %v324_v42 }
  0xcc   :  { %v326_v46 = vmul.f32 %v2802_v41, %v325_v44 }
  0xce   :  { %v327_v48 = vadd.f32 %v2802_v41, %v326_v46 }
  0xd0   :  { %v331_v50 = vsel %vm330_vm6, %v2802_v41, %v327_v48 }
  0xd1   :  { %v336_v51 = vsel %vm333_vm7, %v335_v49, %v331_v50 }
  0xd2   :  { %v338_v52 = vadd.f32 %v336_v51, %v336_v51 }
  0xd4   :  { %v2612_v53 = vadd.f32 -1.0, %v338_v52  ;;  %v90_v52 = vld [vmem:[#allocation4 + $0x18] sm:$0xff] }
  0xd6   :  { %v340_v54 = vsel %vm3179_vm3, %v2612_v53, %v336_v51  ;;  %v89_v51 = vld [vmem:[#allocation4 + $0x10] sm:$0xff] }
  0xd7   :  { %345 = vrot.lane.b32.xlu1 %v340_v54, %s3071_s3  ;;  %341 = vrot.lane.b32.xlu0 %v340_v54, %s3072_s19  ;;  %v349_v4 = vsel %vm250_vm8, %v340_v54, 0.0 }
  0xdf   :  { %343 = vrot.lane.b32.xlu0 %v340_v54, %s3073_s20  ;;  %v97_v54 = vpack.c.bf16 %v89_v51, %v89_v51 }
 0x149   :  { %v342_v2 = vpop.permute.xlu0 %341  ;;  %v346_v16 = vpop.permute.xlu1 %345 }
 0x14a   :  { %v350_v5 = vmul.f32 0.0, %v342_v2  ;;  %v98_v2 = vpack.c.bf16 %v90_v52, %v90_v52 }
 0x151   :  { %v344_v3 = vpop.permute.xlu0 %343 }
 0x152   :  { %v351_v7 = vmul.f32 %v349_v4, %v344_v3 }
 0x154   :  { %v3270_v8 = vadd.f32 %v351_v7, %v350_v5  ;;  %v119_v7 = vunpack.c.l.b16 %v97_v54 }
 0x156   :  { %2803 = vtanh.f32 %v3270_v8 }
 0x15c   :  { %v2804_v9 = vpop.eup %2803 }
 0x15d   :  { %v354_v17 = vmul.f32 %v2804_v9, %v346_v16  ;;  %v120_v9 = vunpack.c.l.b16 %v98_v2  ;;  %v94_v2 = vld [vmem:[#allocation4 + $0x38] sm:$0xff] }
 0x15f   :  { %v355_v19 = vpack.c.bf16 %v354_v17, %v354_v17  ;;  %v126_v17 = vpack.c.b16 %v120_v9, %v119_v7 }
 0x161   :  { %460 = vmatmul.bf16.vlgmr.msra.gmra.mxu2 %v355_v19  ;;  %527 = vmatmul.bf16.vlgmr.msrb.gmra.mxu1 %v355_v19 }
 0x162   :  { %702 = vmatpush.bf16.msra.mxu2 %v3185_v36  ;;  %821 = vmatpush.bf16.msrb.mxu1 %v3185_v36 }
 0x163   :  { %2576 = vmatmul.msk.bf16.gmra.mxu0 %vm135_vm0, %v126_v17 }
 0x166   :  { %703 = vmatpush.bf16.msra.mxu2 %v3190_v38  ;;  %822 = vmatpush.bf16.msrb.mxu1 %v3190_v38 }
 0x16a   :  { %704 = vmatpush.bf16.msra.mxu2 %v3198_v40  ;;  %823 = vmatpush.bf16.msrb.mxu1 %v3198_v40 }
 0x16e   :  { %705 = vmatpush.bf16.msra.mxu2 %v3204_v43  ;;  %824 = vmatpush.bf16.msrb.mxu1 %v3204_v43 }
 0x172   :  { %706 = vmatpush.bf16.msra.mxu2 %v3214_v56  ;;  %825 = vmatpush.bf16.msrb.mxu1 %v3214_v56 }
 0x176   :  { %707 = vmatpush.bf16.msra.mxu2 %v3221_v58  ;;  %826 = vmatpush.bf16.msrb.mxu1 %v3221_v58 }
 0x17a   :  { %708 = vmatpush.bf16.msra.mxu2 %v3231_v60  ;;  %827 = vmatpush.bf16.msrb.mxu1 %v3231_v60 }
 0x17e   :  { %709 = vmatpush.bf16.msra.mxu2 %v3238_v62  ;;  %828 = vmatpush.bf16.msrb.mxu1 %v3238_v62 }
 0x1de   :  { %v528_v23 = vpop.f32.mrf.mxu1 }
 0x1df   :  { %v532_v26 = vadd.f32 %v528_v23, %v518_v22  ;;  %v91_v23 = vld [vmem:[#allocation4 + $0x20] sm:$0xff] }
 0x1e1   :  { %v533_v27 = vadd.f32 %v532_v26, %v532_v26 }
 0x1e3   :  { %v534_v30 = vsel %vm3179_vm3, %v533_v27, %v532_v26  ;;  %v92_v27 = vld [vmem:[#allocation4 + $0x28] sm:$0xff] }
 0x1e4   :  { %v2679_v31 = vmul.f32 -1.442695, %v534_v30  ;;  %v461_v32 = vpop.f32.mrf.mxu2 }
 0x1e5   :  { %v462_v33 = vadd.f32 %v3305_v28, %v461_v32 }
 0x1e6   :  { %2805 = vpow2.f32 %v2679_v31  ;;  %v530_v34 = vpop.f32.mrf.mxu1 }
 0x1e7   :  { %v475_v35 = vadd.f32 %v474_v20, %v462_v33  ;;  %v99_v34 = vpack.c.bf16 %v91_v23, %v91_v23  ;;  %v162_v23 = vpop.f32.mrf.mxu0 }
 0x1e9   :  { %v478_v41 = vadd.f32 %v475_v35, %v475_v35 }
 0x1eb   :  { %v479_v25 = vsel %vm3179_vm3, %v478_v41, %v475_v35 }
 0x1ec   :  { %v2806_v42 = vpop.eup %2805  ;;  %v2677_v44 = vmul.f32 -1.442695, %v479_v25  ;;  %v463_v45 = vpop.f32.mrf.mxu2  ;;  %v100_v25 = vpack.c.bf16 %v92_v27, %v92_v27 }
 0x1ed   :  { %v538_v46 = vadd.f32 1.0, %v2806_v42 }
 0x1ee   :  { %2807 = vpow2.f32 %v2677_v44 }
 0x1ef   :  { %2809 = vrcp.f32 %v538_v46  ;;  %v548_v3 = vand.u32 2147483647, %v538_v46  ;;  %v550_v4 = vand.u32 2147483648, %v538_v46  ;;  %vm544_vm10 = vweird.f32 %v538_v46 }
 0x1f1   :  { %v551_v20 = vor.u32 1.1754944e-38, %v550_v4  ;;  %vm549_vm12 = vcmp.eq.f32.partialorder %v548_v3, 8.507059e+37  ;;  %v102_v4 = vpack.c.bf16 %v94_v2, %v94_v2 }
 0x1f3   :  { %v124_v7 = vunpack.c.l.b16 %v102_v4 }
 0x1f4   :  { %v2808_v47 = vpop.eup %2807 }
 0x1f5   :  { %v2810_v48 = vpop.eup %2809  ;;  %v483_v49 = vadd.f32 1.0, %v2808_v47  ;;  %v121_v47 = vunpack.c.l.b16 %v99_v34 }
 0x1f6   :  { %v540_v50 = vmul.f32 %v2810_v48, %v538_v46  ;;  %vm545_vm9 = vweird.f32 %v2810_v48 }
 0x1f7   :  { %2811 = vrcp.f32 %v483_v49  ;;  %vm546_vm11 = vmor %vm544_vm10, %vm545_vm9  ;;  %v493_v32 = vand.u32 2147483647, %v483_v49  ;;  %v495_v33 = vand.u32 2147483648, %v483_v49  ;;  %vm489_vm14 = vweird.f32 %v483_v49 }
 0x1f8   :  { %v541_v53 = vsub.f32 1.0, %v540_v50 }
 0x1f9   :  { %v496_v45 = vor.u32 1.1754944e-38, %v495_v33  ;;  %vm494_vm1 = vcmp.eq.f32.partialorder %v493_v32, 8.507059e+37 }
 0x1fa   :  { %v542_v5 = vmul.f32 %v2810_v48, %v541_v53 }
 0x1fc   :  { %v543_v16 = vadd.f32 %v2810_v48, %v542_v5 }
 0x1fd   :  { %v2812_v19 = vpop.eup %2811 }
 0x1fe   :  { %v547_v21 = vsel %vm546_vm11, %v2810_v48, %v543_v16  ;;  %v485_v22 = vmul.f32 %v2812_v19, %v483_v49  ;;  %vm490_vm13 = vweird.f32 %v2812_v19  ;;  %v122_v48 = vunpack.c.l.b16 %v100_v25  ;;  %v93_v49 = vld [vmem:[#allocation4 + $0x30] sm:$0xff] }
 0x1ff   :  { %v552_v26 = vsel %vm549_vm12, %v551_v20, %v547_v21  ;;  %vm491_vm15 = vmor %vm489_vm14, %vm490_vm13  ;;  %v101_v3 = vpack.c.bf16 %v93_v49, %v93_v49 }
 0x200   :  { %v554_v30 = vadd.f32 %v552_v26, %v552_v26  ;;  %v486_v31 = vsub.f32 1.0, %v485_v22  ;;  %v127_v53 = vpack.c.b16 %v122_v48, %v121_v47 }
 0x201   :  { %v123_v5 = vunpack.c.l.b16 %v101_v3 }
 0x202   :  { %v2680_v35 = vadd.f32 -1.0, %v554_v30  ;;  %v487_v41 = vmul.f32 %v2812_v19, %v486_v31  ;;  %2577 = vmatmul.msk.bf16.gmra.mxu0 %vm135_vm0, %v127_v53 }
 0x203   :  { %v128_v9 = vpack.c.b16 %v124_v7, %v123_v5 }
 0x204   :  { %v556_v42 = vsel %vm3179_vm3, %v2680_v35, %v552_v26  ;;  %v488_v44 = vadd.f32 %v2812_v19, %v487_v41  ;;  %v163_v41 = vadd.f32 %v3168_v18, %v162_v23 }
 0x205   :  { %559 = vrot.lane.b32.xlu2 %v556_v42, %s3073_s20  ;;  %557 = vrot.lane.b32.xlu1 %v556_v42, %s3072_s19  ;;  %v563_v17 = vsel %vm250_vm8, %v556_v42, 0.0 }
 0x206   :  { %v492_v46 = vsel %vm491_vm15, %v2812_v19, %v488_v44 }
 0x207   :  { %v497_v50 = vsel %vm494_vm1, %v496_v45, %v492_v46 }
 0x208   :  { %v499_v51 = vadd.f32 %v497_v50, %v497_v50 }
 0x20a   :  { %v2678_v52 = vadd.f32 -1.0, %v499_v51 }
 0x20c   :  { %v501_v54 = vsel %vm3179_vm3, %v2678_v52, %v497_v50 }
 0x20d   :  { %561 = vrot.lane.b32.xlu1 %v556_v42, %s3071_s3  ;;  %504 = vrot.lane.b32.xlu0 %v501_v54, %s3073_s20  ;;  %v508_v30 = vsel %vm250_vm8, %v501_v54, 0.0 }
 0x20e   :  { %502 = vrot.lane.b32.xlu2 %v501_v54, %s3072_s19 }
 0x212   :  { %2578 = vmatmul.msk.bf16.gmra.mxu0 %vm135_vm0, %v128_v9 }
 0x216   :  { %506 = vrot.lane.b32.xlu2 %v501_v54, %s3071_s3 }
 0x25f   :  { %v560_v16 = vpop.permute.xlu2 %559 }
 0x260   :  { %v565_v20 = vmul.f32 %v563_v17, %v560_v16 }
 0x268   :  { %v503_v26 = vpop.permute.xlu2 %502 }
 0x269   :  { %v509_v31 = vmul.f32 0.0, %v503_v26 }
 0x270   :  { %v507_v47 = vpop.permute.xlu2 %506 }
 0x277   :  { %v558_v19 = vpop.permute.xlu1 %557 }
 0x278   :  { %v564_v21 = vmul.f32 %v558_v19, %v3270_v8  ;;  %v164_v8 = vpop.f32.mrf.mxu0 }
 0x279   :  { %v165_v42 = vadd.f32 %v3168_v18, %v164_v8 }
 0x27a   :  { %v3328_v22 = vadd.f32 %v565_v20, %v564_v21 }
 0x27b   :  { %v2748_v45 = vpack.c.bf16 %v165_v42, %v163_v41 }
 0x27c   :  { %2813 = vtanh.f32 %v3328_v22 }
 0x27d   :  { %2776 = vst [vmem:[#allocation2 + $0x8] sm:$0xff] %v2748_v45  }
 0x27f   :  { %v505_v27 = vpop.permute.xlu0 %504  ;;  %v562_v34 = vpop.permute.xlu1 %561 }
 0x280   :  { %v510_v32 = vmul.f32 %v508_v30, %v505_v27  ;;  %v167_v50 = vpop.f32.mrf.mxu0 }
 0x281   :  { %v168_v52 = vadd.f32 %v3168_v18, %v167_v50 }
 0x282   :  { %v2814_v33 = vpop.eup %2813  ;;  %v3333_v35 = vadd.f32 %v510_v32, %v509_v31 }
 0x283   :  { %v568_v25 = vmul.f32 %v2814_v33, %v562_v34 }
 0x284   :  { %2815 = vtanh.f32 %v3333_v35  ;;  %v3366_v9 = vld [vmem:[#allocation2 + $0x8] sm:$0xff]  }
 0x285   :  { %v569_v44 = vpack.c.bf16 %v568_v25, %v568_v25  ;;  %v637_v16 = vunpack.c.l.bf16 %v3366_v9 }
 0x287   :  { %578 = vmatmul.bf16.vlgmr.msrb.gmra.mxu2 %v569_v44  ;;  %646 = vmatmul.bf16.vlgmr.msrb.gmra.mxu0 %v569_v44 }
 0x288   :  { %876 = vmatpush.bf16.msrb.mxu2 %v3123_v0  ;;  %940 = vmatpush.bf16.msrb.mxu0 %v3185_v36  ;;  %v169_v53 = vpop.f32.mrf.mxu0 }
 0x289   :  { %v170_v54 = vadd.f32 %v3168_v18, %v169_v53 }
 0x28a   :  { %v2816_v46 = vpop.eup %2815 }
 0x28b   :  { %v513_v48 = vmul.f32 %v2816_v46, %v507_v47  ;;  %v2753_v49 = vpack.c.bf16 %v170_v54, %v168_v52 }
 0x28c   :  { %877 = vmatpush.bf16.msrb.mxu2 %v3126_v6  ;;  %941 = vmatpush.bf16.msrb.mxu0 %v3190_v38 }
 0x28d   :  { %v514_v51 = vpack.c.bf16 %v513_v48, %v513_v48  ;;  %2777 = vst [vmem:[#allocation2 + $0x10] sm:$0xff] %v2753_v49  }
 0x28f   :  { %515 = vst [vmem:[#allocation3] sm:$0xf] %v514_v51  ;;  %591 = vmatmul.bf16.vlgmr.msrb.gmra.mxu3 %v514_v51 }
 0x290   :  { %878 = vmatpush.bf16.msrb.mxu2 %v3130_v10  ;;  %927 = vmatpush.bf16.msrb.mxu3 %v3187_v37  ;;  %v172_v2 = vpop.f32.mrf.mxu0 }
 0x291   :  { %942 = vmatpush.bf16.msrb.mxu0 %v3198_v40  ;;  %v173_v3 = vadd.f32 %v3168_v18, %v172_v2 }
 0x294   :  { %879 = vmatpush.bf16.msrb.mxu2 %v3135_v11  ;;  %928 = vmatpush.bf16.msrb.mxu3 %v3193_v39 }
 0x295   :  { %943 = vmatpush.bf16.msrb.mxu0 %v3204_v43 }
 0x298   :  { %880 = vmatpush.bf16.msrb.mxu2 %v3139_v12  ;;  %929 = vmatpush.bf16.msrb.mxu3 %v3212_v55  ;;  %v174_v4 = vpop.f32.mrf.mxu0 }
 0x299   :  { %944 = vmatpush.bf16.msrb.mxu0 %v3214_v56  ;;  %v175_v5 = vadd.f32 %v3168_v18, %v174_v4 }
 0x29b   :  { %v2758_v7 = vpack.c.bf16 %v175_v5, %v173_v3 }
 0x29c   :  { %881 = vmatpush.bf16.msrb.mxu2 %v3143_v13  ;;  %930 = vmatpush.bf16.msrb.mxu3 %v3217_v57 }
 0x29d   :  { %945 = vmatpush.bf16.msrb.mxu0 %v3221_v58  ;;  %2778 = vst [vmem:[#allocation2 + $0x18] sm:$0xff] %v2758_v7  }
 0x2a0   :  { %882 = vmatpush.bf16.msrb.mxu2 %v3147_v14  ;;  %931 = vmatpush.bf16.msrb.mxu3 %v3228_v59 }
 0x2a1   :  { %946 = vmatpush.bf16.msrb.mxu0 %v3231_v60 }
 0x2a4   :  { %883 = vmatpush.bf16.msrb.mxu2 %v3151_v15  ;;  %932 = vmatpush.bf16.msrb.mxu3 %v3236_v61 }
 0x2a5   :  { %947 = vmatpush.bf16.msrb.mxu0 %v3238_v62 }
 0x2a8   :  { %933 = vmatpush.bf16.msrb.mxu3 %v3241_v63 }
 0x2ac   :  { %934 = vmatpush.bf16.msrb.mxu3 %v3248_v1 }
 0x304   :  { %v647_v17 = vpop.f32.mrf.mxu0 }
 0x305   :  { %v651_v19 = vadd.f32 %v647_v17, %v637_v16 }
 0x307   :  { %v652_v20 = vadd.f32 %v651_v19, %v651_v19 }
 0x309   :  { %v653_v21 = vsel %vm3179_vm3, %v652_v20, %v651_v19 }
 0x30a   :  { %v2683_v23 = vmul.f32 -1.442695, %v653_v21  ;;  %v579_v26 = vpop.f32.mrf.mxu2 }
 0x30b   :  { %v580_v30 = vadd.f32 %v3305_v28, %v579_v26 }
 0x30c   :  { %2817 = vpow2.f32 %v2683_v23  ;;  %v649_v27 = vpop.f32.mrf.mxu0 }
 0x312   :  { %v2818_v31 = vpop.eup %2817  ;;  %v581_v18 = vpop.f32.mrf.mxu2 }
 0x313   :  { %v592_v32 = vpop.f32.mrf.mxu3  ;;  %v657_v33 = vadd.f32 1.0, %v2818_v31 }
 0x314   :  { %v593_v34 = vadd.f32 %v592_v32, %v580_v30 }
 0x315   :  { %2819 = vrcp.f32 %v657_v33  ;;  %v669_v47 = vand.u32 2147483648, %v657_v33  ;;  %v667_v51 = vand.u32 2147483647, %v657_v33  ;;  %vm663_vm2 = vweird.f32 %v657_v33 }
 0x316   :  { %v596_v41 = vadd.f32 %v593_v34, %v593_v34 }
 0x317   :  { %v670_v54 = vor.u32 1.1754944e-38, %v669_v47  ;;  %vm668_vm5 = vcmp.eq.f32.partialorder %v667_v51, 8.507059e+37 }
 0x318   :  { %v597_v25 = vsel %vm3179_vm3, %v596_v41, %v593_v34 }
 0x319   :  { %v2681_v8 = vmul.f32 -1.442695, %v597_v25 }
 0x31b   :  { %2821 = vpow2.f32 %v2681_v8  ;;  %v594_v42 = vpop.f32.mrf.mxu3  ;;  %v2820_v44 = vpop.eup %2819 }
 0x31c   :  { %v659_v45 = vmul.f32 %v2820_v44, %v657_v33  ;;  %vm664_vm0 = vweird.f32 %v2820_v44 }
 0x31d   :  { %vm665_vm4 = vmor %vm663_vm2, %vm664_vm0 }
 0x31e   :  { %v660_v46 = vsub.f32 1.0, %v659_v45 }
 0x320   :  { %v661_v50 = vmul.f32 %v2820_v44, %v660_v46 }
 0x321   :  { %v2822_v48 = vpop.eup %2821 }
 0x322   :  { %v601_v52 = vadd.f32 1.0, %v2822_v48  ;;  %v662_v53 = vadd.f32 %v2820_v44, %v661_v50 }
 0x324   :  { %2823 = vrcp.f32 %v601_v52  ;;  %v666_v49 = vsel %vm665_vm4, %v2820_v44, %v662_v53  ;;  %v613_v19 = vand.u32 2147483648, %v601_v52  ;;  %v611_v21 = vand.u32 2147483647, %v601_v52 }
 0x325   :  { %v671_v2 = vsel %vm668_vm5, %v670_v54, %v666_v49  ;;  %vm607_vm7 = vweird.f32 %v601_v52 }
 0x326   :  { %v673_v3 = vadd.f32 %v671_v2, %v671_v2  ;;  %v614_v26 = vor.u32 1.1754944e-38, %v613_v19  ;;  %vm612_vm10 = vcmp.eq.f32.partialorder %v611_v21, 8.507059e+37 }
 0x328   :  { %v2684_v4 = vadd.f32 -1.0, %v673_v3 }
 0x32a   :  { %v2824_v5 = vpop.eup %2823  ;;  %v675_v7 = vsel %vm3179_vm3, %v2684_v4, %v671_v2 }
 0x32b   :  { %v603_v16 = vmul.f32 %v2824_v5, %v601_v52  ;;  %678 = vrot.lane.b32.xlu1 %v675_v7, %s3073_s20  ;;  %676 = vrot.lane.b32.xlu0 %v675_v7, %s3072_s19  ;;  %vm608_vm6 = vweird.f32 %v2824_v5  ;;  %v682_v34 = vsel %vm250_vm8, %v675_v7, 0.0 }
 0x32c   :  { %680 = vrot.lane.b32.xlu2 %v675_v7, %s3071_s3  ;;  %vm609_vm9 = vmor %vm607_vm7, %vm608_vm6 }
 0x32d   :  { %v604_v17 = vsub.f32 1.0, %v603_v16 }
 0x32f   :  { %v605_v20 = vmul.f32 %v2824_v5, %v604_v17 }
 0x331   :  { %v606_v23 = vadd.f32 %v2824_v5, %v605_v20 }
 0x333   :  { %v610_v27 = vsel %vm609_vm9, %v2824_v5, %v606_v23 }
 0x334   :  { %v615_v30 = vsel %vm612_vm10, %v614_v26, %v610_v27 }
 0x335   :  { %v617_v31 = vadd.f32 %v615_v30, %v615_v30 }
 0x337   :  { %v2682_v18 = vadd.f32 -1.0, %v617_v31 }
 0x339   :  { %v619_v32 = vsel %vm3179_vm3, %v2682_v18, %v615_v30 }
 0x33a   :  { %624 = vrot.lane.b32.xlu2 %v619_v32, %s3071_s3  ;;  %622 = vrot.lane.b32.xlu1 %v619_v32, %s3073_s20  ;;  %v626_v48 = vsel %vm250_vm8, %v619_v32, 0.0 }
 0x33b   :  { %620 = vrot.lane.b32.xlu0 %v619_v32, %s3072_s19 }
 0x386   :  { %v681_v45 = vpop.permute.xlu2 %680 }
 0x39d   :  { %v679_v33 = vpop.permute.xlu1 %678  ;;  %v677_v41 = vpop.permute.xlu0 %676 }
 0x39e   :  { %v684_v25 = vmul.f32 %v682_v34, %v679_v33  ;;  %v683_v8 = vmul.f32 %v677_v41, %v3328_v22 }
 0x3a0   :  { %v3387_v42 = vadd.f32 %v684_v25, %v683_v8 }
 0x3a2   :  { %2825 = vtanh.f32 %v3387_v42 }
 0x3a8   :  { %v2826_v44 = vpop.eup %2825 }
 0x3a9   :  { %v687_v46 = vmul.f32 %v2826_v44, %v681_v45 }
 0x3ab   :  { %v688_v50 = vpack.c.bf16 %v687_v46, %v687_v46 }
 0x3ac   :  { %v623_v47 = vpop.permute.xlu1 %622 }
 0x3ad   :  { %v628_v51 = vmul.f32 %v626_v48, %v623_v47  ;;  %v621_v52 = vpop.permute.xlu0 %620  ;;  %697 = vmatmul.bf16.vlgmr.msra.gmra.mxu1 %v688_v50  ;;  %765 = vmatmul.bf16.vlgmr.msra.gmra.mxu3 %v688_v50 }
 0x3ae   :  { %v627_v53 = vmul.f32 %v621_v52, %v3333_v35  ;;  %995 = vmatpush.bf16.msra.mxu1 %v3123_v0  ;;  %1059 = vmatpush.bf16.msra.mxu3 %v3185_v36  ;;  %v625_v35 = vpop.permute.xlu2 %624 }
 0x3b0   :  { %v3395_v22 = vadd.f32 %v628_v51, %v627_v53 }
 0x3b2   :  { %2827 = vtanh.f32 %v3395_v22  ;;  %996 = vmatpush.bf16.msra.mxu1 %v3126_v6  ;;  %1060 = vmatpush.bf16.msra.mxu3 %v3190_v38  ;;  %v756_v6 = vunpack.c.h.bf16 %v3366_v9 }
 0x3b6   :  { %997 = vmatpush.bf16.msra.mxu1 %v3130_v10  ;;  %1061 = vmatpush.bf16.msra.mxu3 %v3198_v40 }
 0x3b8   :  { %v2828_v54 = vpop.eup %2827 }
 0x3b9   :  { %v631_v49 = vmul.f32 %v2828_v54, %v625_v35 }
 0x3ba   :  { %998 = vmatpush.bf16.msra.mxu1 %v3135_v11  ;;  %1062 = vmatpush.bf16.msra.mxu3 %v3204_v43 }
 0x3bb   :  { %v632_v2 = vpack.c.bf16 %v631_v49, %v631_v49 }
 0x3bd   :  { %634 = vst [vmem:[#allocation3 + $0x4] sm:$0xf] %v632_v2  ;;  %710 = vmatmul.bf16.vlgmr.msra.gmra.mxu2 %v632_v2 }
 0x3be   :  { %1046 = vmatpush.bf16.msra.mxu2 %v3187_v37  ;;  %999 = vmatpush.bf16.msra.mxu1 %v3139_v12 }
 0x3bf   :  { %1063 = vmatpush.bf16.msra.mxu3 %v3214_v56 }
 0x3c2   :  { %1047 = vmatpush.bf16.msra.mxu2 %v3193_v39  ;;  %1000 = vmatpush.bf16.msra.mxu1 %v3143_v13 }
 0x3c3   :  { %1064 = vmatpush.bf16.msra.mxu3 %v3221_v58 }
 0x3c6   :  { %1048 = vmatpush.bf16.msra.mxu2 %v3212_v55  ;;  %1001 = vmatpush.bf16.msra.mxu1 %v3147_v14 }
 0x3c7   :  { %1065 = vmatpush.bf16.msra.mxu3 %v3231_v60 }
 0x3ca   :  { %1049 = vmatpush.bf16.msra.mxu2 %v3217_v57  ;;  %1002 = vmatpush.bf16.msra.mxu1 %v3151_v15 }
 0x3cb   :  { %1066 = vmatpush.bf16.msra.mxu3 %v3238_v62 }
 0x3ce   :  { %1050 = vmatpush.bf16.msra.mxu2 %v3228_v59 }
 0x3d2   :  { %1051 = vmatpush.bf16.msra.mxu2 %v3236_v61 }
 0x3d6   :  { %1052 = vmatpush.bf16.msra.mxu2 %v3241_v63 }
 0x3da   :  { %1053 = vmatpush.bf16.msra.mxu2 %v3248_v1 }
 0x42a   :  { %v698_v0 = vpop.f32.mrf.mxu1 }
 0x42b   :  { %v699_v5 = vadd.f32 %v3305_v28, %v698_v0 }
 0x430   :  { %v766_v10 = vpop.f32.mrf.mxu3 }
 0x431   :  { %v770_v11 = vadd.f32 %v766_v10, %v756_v6 }
 0x432   :  { %v700_v12 = vpop.f32.mrf.mxu1 }
 0x433   :  { %v771_v13 = vadd.f32 %v770_v11, %v770_v11 }
 0x435   :  { %v772_v14 = vsel %vm3179_vm3, %v771_v13, %v770_v11 }
 0x436   :  { %v2687_v15 = vmul.f32 -1.442695, %v772_v14 }
 0x438   :  { %2829 = vpow2.f32 %v2687_v15  ;;  %v768_v3 = vpop.f32.mrf.mxu3 }
 0x43e   :  { %v2830_v4 = vpop.eup %2829 }
 0x43f   :  { %v776_v7 = vadd.f32 1.0, %v2830_v4 }
 0x440   :  { %v711_v16 = vpop.f32.mrf.mxu2 }
 0x441   :  { %v712_v17 = vadd.f32 %v711_v16, %v699_v5  ;;  %2831 = vrcp.f32 %v776_v7  ;;  %v788_v30 = vand.u32 2147483648, %v776_v7  ;;  %v786_v18 = vand.u32 2147483647, %v776_v7 }
 0x442   :  { %vm782_vm12 = vweird.f32 %v776_v7 }
 0x443   :  { %v715_v19 = vadd.f32 %v712_v17, %v712_v17  ;;  %v789_v41 = vor.u32 1.1754944e-38, %v788_v30  ;;  %vm787_vm14 = vcmp.eq.f32.partialorder %v786_v18, 8.507059e+37  ;;  %v3460_v18 = vld [vmem:[#allocation8 + $0x20] sm:$0xff] }
 0x445   :  { %v716_v9 = vsel %vm3179_vm3, %v715_v19, %v712_v17 }
 0x446   :  { %v2685_v20 = vmul.f32 -1.442695, %v716_v9 }
 0x447   :  { %v2832_v21 = vpop.eup %2831 }
 0x448   :  { %2833 = vpow2.f32 %v2685_v20  ;;  %v713_v23 = vpop.f32.mrf.mxu2  ;;  %v778_v26 = vmul.f32 %v2832_v21, %v776_v7  ;;  %vm783_vm11 = vweird.f32 %v2832_v21 }
 0x449   :  { %vm784_vm13 = vmor %vm782_vm12, %vm783_vm11  ;;  %v3445_v23 = vld [vmem:[#allocation8 + $0x38] sm:$0xff] }
 0x44a   :  { %v779_v27 = vsub.f32 1.0, %v778_v26  ;;  %v3452_v26 = vld [vmem:[#allocation8 + $0x30] sm:$0xff] }
 0x44c   :  { %v780_v31 = vmul.f32 %v2832_v21, %v779_v27  ;;  %v3456_v27 = vld [vmem:[#allocation8 + $0x28] sm:$0xff] }
 0x44e   :  { %v2834_v32 = vpop.eup %2833  ;;  %v781_v34 = vadd.f32 %v2832_v21, %v780_v31 }
 0x44f   :  { %v720_v33 = vadd.f32 1.0, %v2834_v32 }
 0x450   :  { %v785_v25 = vsel %vm784_vm13, %v2832_v21, %v781_v34 }
 0x451   :  { %2835 = vrcp.f32 %v720_v33  ;;  %v790_v8 = vsel %vm787_vm14, %v789_v41, %v785_v25  ;;  %v732_v51 = vand.u32 2147483648, %v720_v33  ;;  %v730_v53 = vand.u32 2147483647, %v720_v33 }
 0x452   :  { %v792_v44 = vadd.f32 %v790_v8, %v790_v8  ;;  %vm726_vm1 = vweird.f32 %v720_v33 }
 0x453   :  { %v733_v35 = vor.u32 1.1754944e-38, %v732_v51  ;;  %vm731_vm2 = vcmp.eq.f32.partialorder %v730_v53, 8.507059e+37 }
 0x454   :  { %v2688_v45 = vadd.f32 -1.0, %v792_v44 }
 0x456   :  { %v794_v47 = vsel %vm3179_vm3, %v2688_v45, %v790_v8 }
 0x457   :  { %v2836_v46 = vpop.eup %2835  ;;  %799 = vrot.lane.b32.xlu2 %v794_v47, %s3071_s3  ;;  %797 = vrot.lane.b32.xlu1 %v794_v47, %s3073_s20  ;;  %v801_v11 = vsel %vm250_vm8, %v794_v47, 0.0 }
 0x458   :  { %v722_v48 = vmul.f32 %v2836_v46, %v720_v33  ;;  %795 = vrot.lane.b32.xlu0 %v794_v47, %s3072_s19  ;;  %vm727_vm15 = vweird.f32 %v2836_v46 }
 0x459   :  { %vm728_vm0 = vmor %vm726_vm1, %vm727_vm15 }
 0x45a   :  { %v723_v50 = vsub.f32 1.0, %v722_v48 }
 0x45c   :  { %v724_v52 = vmul.f32 %v2836_v46, %v723_v50 }
 0x45e   :  { %v725_v54 = vadd.f32 %v2836_v46, %v724_v52 }
 0x460   :  { %v729_v49 = vsel %vm728_vm0, %v2836_v46, %v725_v54 }
 0x461   :  { %v734_v2 = vsel %vm731_vm2, %v733_v35, %v729_v49 }
 0x462   :  { %v736_v0 = vadd.f32 %v734_v2, %v734_v2 }
 0x464   :  { %v2686_v6 = vadd.f32 -1.0, %v736_v0 }
 0x466   :  { %v738_v10 = vsel %vm3179_vm3, %v2686_v6, %v734_v2 }
 0x467   :  { %743 = vrot.lane.b32.xlu2 %v738_v10, %s3071_s3  ;;  %741 = vrot.lane.b32.xlu1 %v738_v10, %s3073_s20  ;;  %v745_v17 = vsel %vm250_vm8, %v738_v10, 0.0 }
 0x468   :  { %739 = vrot.lane.b32.xlu0 %v738_v10, %s3072_s19 }
 0x4b1   :  { %v800_v5 = vpop.permute.xlu2 %799 }
 0x4c1   :  { %v744_v30 = vpop.permute.xlu2 %743 }
 0x4c9   :  { %v798_v12 = vpop.permute.xlu1 %797 }
 0x4ca   :  { %v803_v13 = vmul.f32 %v801_v11, %v798_v12  ;;  %v796_v14 = vpop.permute.xlu0 %795 }
 0x4cb   :  { %v802_v15 = vmul.f32 %v796_v14, %v3387_v42 }
 0x4cd   :  { %v3439_v3 = vadd.f32 %v803_v13, %v802_v15 }
 0x4cf   :  { %2837 = vtanh.f32 %v3439_v3 }
 0x4d5   :  { %v2838_v4 = vpop.eup %2837 }
 0x4d6   :  { %v806_v7 = vmul.f32 %v2838_v4, %v800_v5 }
 0x4d8   :  { %v807_v19 = vpack.c.bf16 %v806_v7, %v806_v7 }
 0x4d9   :  { %v742_v16 = vpop.permute.xlu1 %741 }
 0x4da   :  { %v747_v9 = vmul.f32 %v745_v17, %v742_v16  ;;  %v740_v20 = vpop.permute.xlu0 %739  ;;  %816 = vmatmul.bf16.vlgmr.msra.gmra.mxu0 %v807_v19  ;;  %884 = vmatmul.bf16.vlgmr.msrb.gmra.mxu2 %v807_v19 }
 0x4db   :  { %v746_v21 = vmul.f32 %v740_v20, %v3395_v22  ;;  %1114 = vmatpush.bf16.msra.mxu0 %v3445_v23  ;;  %1178 = vmatpush.bf16.msrb.mxu2 %v3185_v36 }
 0x4dd   :  { %v3449_v42 = vadd.f32 %v747_v9, %v746_v21 }
 0x4df   :  { %2839 = vtanh.f32 %v3449_v42  ;;  %1115 = vmatpush.bf16.msra.mxu0 %v3452_v26  ;;  %1179 = vmatpush.bf16.msrb.mxu2 %v3190_v38  ;;  %v3465_v38 = vld [vmem:[#allocation8 + $0x18] sm:$0xff] }
 0x4e3   :  { %1116 = vmatpush.bf16.msra.mxu0 %v3456_v27  ;;  %1180 = vmatpush.bf16.msrb.mxu2 %v3198_v40  ;;  %v3470_v40 = vld [vmem:[#allocation8 + $0x10] sm:$0xff] }
 0x4e5   :  { %v2840_v22 = vpop.eup %2839 }
 0x4e6   :  { %v750_v31 = vmul.f32 %v2840_v22, %v744_v30 }
 0x4e7   :  { %1117 = vmatpush.bf16.msra.mxu0 %v3460_v18  ;;  %1181 = vmatpush.bf16.msrb.mxu2 %v3204_v43  ;;  %v3475_v43 = vld [vmem:[#allocation8 + $0x8] sm:$0xff] }
 0x4e8   :  { %v751_v36 = vpack.c.bf16 %v750_v31, %v750_v31 }
 0x4ea   :  { %753 = vst [vmem:[#allocation3 + $0x8] sm:$0xf] %v751_v36  ;;  %829 = vmatmul.bf16.vlgmr.msrb.gmra.mxu1 %v751_v36 }
 0x4eb   :  { %1165 = vmatpush.bf16.msrb.mxu1 %v3187_v37  ;;  %1118 = vmatpush.bf16.msra.mxu0 %v3465_v38  ;;  %v3480_v37 = vld [vmem:[#allocation8] sm:$0xff] }
 0x4ec   :  { %1182 = vmatpush.bf16.msrb.mxu2 %v3214_v56 }
 0x4ef   :  { %1166 = vmatpush.bf16.msrb.mxu1 %v3193_v39  ;;  %1119 = vmatpush.bf16.msra.mxu0 %v3470_v40 }
 0x4f0   :  { %1183 = vmatpush.bf16.msrb.mxu2 %v3221_v58 }
 0x4f3   :  { %1167 = vmatpush.bf16.msrb.mxu1 %v3212_v55  ;;  %1120 = vmatpush.bf16.msra.mxu0 %v3475_v43  ;;  %v3488_v55 = vld [vmem:[#allocation2 + $0x10] sm:$0xff]  }
 0x4f4   :  { %1184 = vmatpush.bf16.msrb.mxu2 %v3231_v60  ;;  %v875_v56 = vunpack.c.l.bf16 %v3488_v55 }
 0x4f7   :  { %1168 = vmatpush.bf16.msrb.mxu1 %v3217_v57  ;;  %1121 = vmatpush.bf16.msra.mxu0 %v3480_v37 }
 0x4f8   :  { %1185 = vmatpush.bf16.msrb.mxu2 %v3238_v62 }
 0x4fb   :  { %1169 = vmatpush.bf16.msrb.mxu1 %v3228_v59 }
 0x4ff   :  { %1170 = vmatpush.bf16.msrb.mxu1 %v3236_v61 }
 0x503   :  { %1171 = vmatpush.bf16.msrb.mxu1 %v3241_v63 }
 0x507   :  { %1172 = vmatpush.bf16.msrb.mxu1 %v3248_v1 }
 0x557   :  { %v817_v39 = vpop.f32.mrf.mxu0 }
 0x558   :  { %v818_v59 = vadd.f32 %v3305_v28, %v817_v39 }
 0x55d   :  { %v885_v57 = vpop.f32.mrf.mxu2 }
 0x55e   :  { %v889_v58 = vadd.f32 %v885_v57, %v875_v56 }
 0x55f   :  { %v819_v60 = vpop.f32.mrf.mxu0 }
 0x560   :  { %v890_v32 = vadd.f32 %v889_v58, %v889_v58 }
 0x562   :  { %v891_v62 = vsel %vm3179_vm3, %v890_v32, %v889_v58 }
 0x563   :  { %v2691_v33 = vmul.f32 -1.442695, %v891_v62 }
 0x565   :  { %2841 = vpow2.f32 %v2691_v33  ;;  %v887_v61 = vpop.f32.mrf.mxu2 }
 0x567   :  { %v830_v63 = vpop.f32.mrf.mxu1 }
 0x568   :  { %v831_v34 = vadd.f32 %v830_v63, %v818_v59 }
 0x56a   :  { %v834_v1 = vadd.f32 %v831_v34, %v831_v34 }
 0x56b   :  { %v2842_v41 = vpop.eup %2841 }
 0x56c   :  { %v835_v25 = vsel %vm3179_vm3, %v834_v1, %v831_v34  ;;  %v895_v8 = vadd.f32 1.0, %v2842_v41 }
 0x56d   :  { %v2689_v44 = vmul.f32 -1.442695, %v835_v25  ;;  %v2936_v25 = vld [vmem:[#allocation9 + $0x70] sm:$0xff] }
 0x56e   :  { %2843 = vrcp.f32 %v895_v8  ;;  %v907_v52 = vand.u32 2147483648, %v895_v8  ;;  %v905_v54 = vand.u32 2147483647, %v895_v8  ;;  %vm901_vm5 = vweird.f32 %v895_v8 }
 0x56f   :  { %v832_v45 = vpop.f32.mrf.mxu1  ;;  %2845 = vpow2.f32 %v2689_v44  ;;  %v2937_v44 = vld [vmem:[#allocation9 + $0x68] sm:$0xff] }
 0x570   :  { %v908_v49 = vor.u32 1.1754944e-38, %v907_v52  ;;  %vm906_vm7 = vcmp.eq.f32.partialorder %v905_v54, 8.507059e+37  ;;  %v2938_v45 = vld [vmem:[#allocation9 + $0x38] sm:$0xff]  ;;  %v2949_v52 = vld [vmem:[#allocation9 + $0x8] sm:$0xff] }
 0x574   :  { %v2844_v46 = vpop.eup %2843 }
 0x575   :  { %v2846_v47 = vpop.eup %2845  ;;  %v897_v48 = vmul.f32 %v2844_v46, %v895_v8  ;;  %vm902_vm4 = vweird.f32 %v2844_v46 }
 0x576   :  { %v839_v50 = vadd.f32 1.0, %v2846_v47  ;;  %vm903_vm6 = vmor %vm901_vm5, %vm902_vm4  ;;  %v2942_v47 = vld [vmem:[#allocation9 + $0x28] sm:$0xff] }
 0x577   :  { %v898_v51 = vsub.f32 1.0, %v897_v48  ;;  %v2944_v48 = vld [vmem:[#allocation9 + $0x20] sm:$0xff] }
 0x578   :  { %2847 = vrcp.f32 %v839_v50  ;;  %v851_v14 = vand.u32 2147483648, %v839_v50  ;;  %v849_v5 = vand.u32 2147483647, %v839_v50  ;;  %vm845_vm10 = vweird.f32 %v839_v50 }
 0x579   :  { %v899_v53 = vmul.f32 %v2844_v46, %v898_v51  ;;  %v2947_v51 = vld [vmem:[#allocation9 + $0x40] sm:$0xff] }
 0x57a   :  { %v852_v16 = vor.u32 1.1754944e-38, %v851_v14  ;;  %vm850_vm12 = vcmp.eq.f32.partialorder %v849_v5, 8.507059e+37 }
 0x57b   :  { %v900_v35 = vadd.f32 %v2844_v46, %v899_v53  ;;  %v2950_v53 = vld [vmem:[#allocation9] sm:$0xff] }
 0x57d   :  { %v904_v2 = vsel %vm903_vm6, %v2844_v46, %v900_v35  ;;  %v2940_v46 = vld [vmem:[#allocation9 + $0x30] sm:$0xff] }
 0x57e   :  { %v2848_v0 = vpop.eup %2847  ;;  %v909_v6 = vsel %vm906_vm7, %v908_v49, %v904_v2 }
 0x57f   :  { %v911_v10 = vadd.f32 %v909_v6, %v909_v6  ;;  %v841_v11 = vmul.f32 %v2848_v0, %v839_v50  ;;  %vm846_vm9 = vweird.f32 %v2848_v0  ;;  %v2945_v50 = vld [vmem:[#allocation9 + $0x48] sm:$0xff] }
 0x580   :  { %vm847_vm11 = vmor %vm845_vm10, %vm846_vm9 }
 0x581   :  { %v2692_v12 = vadd.f32 -1.0, %v911_v10  ;;  %v842_v13 = vsub.f32 1.0, %v841_v11 }
 0x583   :  { %v913_v15 = vsel %vm3179_vm3, %v2692_v12, %v909_v6  ;;  %v843_v4 = vmul.f32 %v2848_v0, %v842_v13 }
 0x584   :  { %916 = vrot.lane.b32.xlu1 %v913_v15, %s3073_s20  ;;  %914 = vrot.lane.b32.xlu0 %v913_v15, %s3072_s19  ;;  %v920_v22 = vsel %vm250_vm8, %v913_v15, 0.0 }
 0x585   :  { %v844_v7 = vadd.f32 %v2848_v0, %v843_v4 }
 0x587   :  { %v848_v17 = vsel %vm847_vm11, %v2848_v0, %v844_v7 }
 0x588   :  { %v853_v19 = vsel %vm850_vm12, %v852_v16, %v848_v17 }
 0x589   :  { %v855_v9 = vadd.f32 %v853_v19, %v853_v19 }
 0x58b   :  { %v2690_v20 = vadd.f32 -1.0, %v855_v9 }
 0x58c   :  { %918 = vrot.lane.b32.xlu1 %v913_v15, %s3071_s3 }
 0x58d   :  { %v857_v21 = vsel %vm3179_vm3, %v2690_v20, %v853_v19 }
 0x58e   :  { %860 = vrot.lane.b32.xlu0 %v857_v21, %s3073_s20  ;;  %858 = vrot.lane.b32.xlu2 %v857_v21, %s3072_s19  ;;  %v864_v60 = vsel %vm250_vm8, %v857_v21, 0.0 }
 0x596   :  { %862 = vrot.lane.b32.xlu2 %v857_v21, %s3071_s3 }
 0x5e8   :  { %v859_v57 = vpop.permute.xlu2 %858 }
 0x5e9   :  { %v865_v62 = vmul.f32 %v859_v57, %v3449_v42 }
 0x5f0   :  { %v863_v41 = vpop.permute.xlu2 %862 }
 0x5f6   :  { %v917_v30 = vpop.permute.xlu1 %916  ;;  %v915_v31 = vpop.permute.xlu0 %914 }
 0x5f7   :  { %v922_v36 = vmul.f32 %v920_v22, %v917_v30  ;;  %v921_v39 = vmul.f32 %v915_v31, %v3439_v3  ;;  %v2935_v3 = vld [vmem:[#allocation9 + $0x78] sm:$0xff] }
 0x5f9   :  { %v3509_v56 = vadd.f32 %v922_v36, %v921_v39 }
 0x5fb   :  { %2849 = vtanh.f32 %v3509_v56 }
 0x5fe   :  { %v919_v33 = vpop.permute.xlu1 %918 }
 0x600   :  { %v861_v58 = vpop.permute.xlu0 %860 }
 0x601   :  { %v2850_v32 = vpop.eup %2849  ;;  %v866_v59 = vmul.f32 %v864_v60, %v861_v58 }
 0x602   :  { %v925_v61 = vmul.f32 %v2850_v32, %v919_v33 }
 0x603   :  { %v3515_v63 = vadd.f32 %v866_v59, %v865_v62 }
 0x604   :  { %v926_v34 = vpack.c.bf16 %v925_v61, %v925_v61 }
 0x605   :  { %2851 = vtanh.f32 %v3515_v63 }
 0x606   :  { %935 = vmatmul.bf16.vlgmr.msrb.gmra.mxu3 %v926_v34  ;;  %1003 = vmatmul.bf16.vlgmr.msra.gmra.mxu1 %v926_v34 }
 0x607   :  { %1233 = vmatpush.bf16.msrb.mxu3 %v3445_v23  ;;  %1297 = vmatpush.bf16.msra.mxu1 %v2935_v3  ;;  %v2939_v23 = vld [vmem:[#allocation9 + $0x60] sm:$0xff] }
 0x60b   :  { %v2852_v1 = vpop.eup %2851  ;;  %1234 = vmatpush.bf16.msrb.mxu3 %v3452_v26  ;;  %1298 = vmatpush.bf16.msra.mxu1 %v2936_v25  ;;  %v2941_v26 = vld [vmem:[#allocation9 + $0x58] sm:$0xff] }
 0x60c   :  { %v869_v42 = vmul.f32 %v2852_v1, %v863_v41 }
 0x60e   :  { %v870_v8 = vpack.c.bf16 %v869_v42, %v869_v42 }
 0x60f   :  { %1235 = vmatpush.bf16.msrb.mxu3 %v3456_v27  ;;  %1299 = vmatpush.bf16.msra.mxu1 %v2937_v44  ;;  %v2943_v27 = vld [vmem:[#allocation9 + $0x50] sm:$0xff] }
 0x610   :  { %872 = vst [vmem:[#allocation3 + $0xc] sm:$0xf] %v870_v8  ;;  %948 = vmatmul.bf16.vlgmr.msrb.gmra.mxu0 %v870_v8 }
 0x611   :  { %1284 = vmatpush.bf16.msrb.mxu0 %v2938_v45 }
 0x613   :  { %1236 = vmatpush.bf16.msrb.mxu3 %v3460_v18  ;;  %1300 = vmatpush.bf16.msra.mxu1 %v2939_v23  ;;  %v2946_v18 = vld [vmem:[#allocation9 + $0x18] sm:$0xff] }
 0x615   :  { %1285 = vmatpush.bf16.msrb.mxu0 %v2940_v46 }
 0x617   :  { %1237 = vmatpush.bf16.msrb.mxu3 %v3465_v38  ;;  %1301 = vmatpush.bf16.msra.mxu1 %v2941_v26  ;;  %v2948_v38 = vld [vmem:[#allocation9 + $0x10] sm:$0xff] }
 0x619   :  { %1286 = vmatpush.bf16.msrb.mxu0 %v2942_v47 }
 0x61b   :  { %1238 = vmatpush.bf16.msrb.mxu3 %v3470_v40  ;;  %1302 = vmatpush.bf16.msra.mxu1 %v2943_v27  ;;  %v994_v40 = vunpack.c.h.bf16 %v3488_v55 }
 0x61d   :  { %1287 = vmatpush.bf16.msrb.mxu0 %v2944_v48 }
 0x61f   :  { %1239 = vmatpush.bf16.msrb.mxu3 %v3475_v43  ;;  %1303 = vmatpush.bf16.msra.mxu1 %v2945_v50 }
 0x621   :  { %1288 = vmatpush.bf16.msrb.mxu0 %v2946_v18 }
 0x623   :  { %1240 = vmatpush.bf16.msrb.mxu3 %v3480_v37  ;;  %1304 = vmatpush.bf16.msra.mxu1 %v2947_v51 }
 0x625   :  { %1289 = vmatpush.bf16.msrb.mxu0 %v2948_v38 }
 0x629   :  { %1290 = vmatpush.bf16.msrb.mxu0 %v2949_v52 }
 0x62d   :  { %1291 = vmatpush.bf16.msrb.mxu0 %v2950_v53 }
 0x683   :  { %v1004_v54 = vpop.f32.mrf.mxu1 }
 0x684   :  { %v1008_v35 = vadd.f32 %v1004_v54, %v994_v40 }
 0x686   :  { %v1009_v49 = vadd.f32 %v1008_v35, %v1008_v35 }
 0x688   :  { %v1010_v43 = vsel %vm3179_vm3, %v1009_v49, %v1008_v35 }
 0x689   :  { %v2695_v2 = vmul.f32 -1.442695, %v1010_v43  ;;  %v936_v0 = vpop.f32.mrf.mxu3 }
 0x68a   :  { %v937_v37 = vadd.f32 %v3305_v28, %v936_v0 }
 0x68b   :  { %2853 = vpow2.f32 %v2695_v2  ;;  %v1006_v6 = vpop.f32.mrf.mxu1  ;;  %v3554_v2 = vld [vmem:[#allocation2 + $0x18] sm:$0xff]  }
 0x68d   :  { %v949_v10 = vpop.f32.mrf.mxu0 }
 0x68e   :  { %v950_v11 = vadd.f32 %v949_v10, %v937_v37 }
 0x690   :  { %v953_v12 = vadd.f32 %v950_v11, %v950_v11 }
 0x691   :  { %v2854_v13 = vpop.eup %2853  ;;  %v938_v14 = vpop.f32.mrf.mxu3 }
 0x692   :  { %v1014_v15 = vadd.f32 1.0, %v2854_v13  ;;  %v954_v55 = vsel %vm3179_vm3, %v953_v12, %v950_v11 }
 0x693   :  { %v2693_v4 = vmul.f32 -1.442695, %v954_v55 }
 0x694   :  { %2855 = vrcp.f32 %v1014_v15  ;;  %v1026_v9 = vand.u32 2147483648, %v1014_v15  ;;  %v1024_v21 = vand.u32 2147483647, %v1014_v15  ;;  %vm1020_vm14 = vweird.f32 %v1014_v15 }
 0x695   :  { %2857 = vpow2.f32 %v2693_v4  ;;  %v951_v5 = vpop.f32.mrf.mxu0  ;;  %v3562_v4 = vld [vmem:[%s3881_s5] ss:$0 sm:$0xff] }
 0x696   :  { %v1027_v30 = vor.u32 1.1754944e-38, %v1026_v9  ;;  %vm1025_vm1 = vcmp.eq.f32.partialorder %v1024_v21, 8.507059e+37 }
 0x69a   :  { %v2856_v7 = vpop.eup %2855 }
 0x69b   :  { %v2858_v16 = vpop.eup %2857  ;;  %v1016_v17 = vmul.f32 %v2856_v7, %v1014_v15  ;;  %vm1021_vm13 = vweird.f32 %v2856_v7 }
 0x69c   :  { %v958_v19 = vadd.f32 1.0, %v2858_v16  ;;  %vm1022_vm15 = vmor %vm1020_vm14, %vm1021_vm13 }
 0x69d   :  { %v1017_v28 = vsub.f32 1.0, %v1016_v17 }
 0x69e   :  { %2859 = vrcp.f32 %v958_v19  ;;  %v970_v62 = vand.u32 2147483648, %v958_v19  ;;  %v968_v61 = vand.u32 2147483647, %v958_v19  ;;  %vm964_vm2 = vweird.f32 %v958_v19 }
 0x69f   :  { %v1018_v20 = vmul.f32 %v2856_v7, %v1017_v28 }
 0x6a0   :  { %v971_v3 = vor.u32 1.1754944e-38, %v970_v62  ;;  %vm969_vm5 = vcmp.eq.f32.partialorder %v968_v61, 8.507059e+37 }
 0x6a1   :  { %v1019_v22 = vadd.f32 %v2856_v7, %v1018_v20 }
 0x6a3   :  { %v1023_v31 = vsel %vm1022_vm15, %v2856_v7, %v1019_v22 }
 0x6a4   :  { %v2860_v36 = vpop.eup %2859  ;;  %v1028_v39 = vsel %vm1025_vm1, %v1027_v30, %v1023_v31 }
 0x6a5   :  { %v1030_v57 = vadd.f32 %v1028_v39, %v1028_v39  ;;  %v960_v58 = vmul.f32 %v2860_v36, %v958_v19  ;;  %vm965_vm0 = vweird.f32 %v2860_v36 }
 0x6a6   :  { %vm966_vm4 = vmor %vm964_vm2, %vm965_vm0 }
 0x6a7   :  { %v2696_v60 = vadd.f32 -1.0, %v1030_v57  ;;  %v961_v32 = vsub.f32 1.0, %v960_v58 }
 0x6a9   :  { %v1032_v33 = vsel %vm3179_vm3, %v2696_v60, %v1028_v39  ;;  %v962_v59 = vmul.f32 %v2860_v36, %v961_v32 }
 0x6aa   :  { %1035 = vrot.lane.b32.xlu1 %v1032_v33, %s3073_s20  ;;  %1033 = vrot.lane.b32.xlu0 %v1032_v33, %s3072_s19  ;;  %v1039_v45 = vsel %vm250_vm8, %v1032_v33, 0.0 }
 0x6ab   :  { %v963_v34 = vadd.f32 %v2860_v36, %v962_v59 }
 0x6ad   :  { %v967_v1 = vsel %vm966_vm4, %v2860_v36, %v963_v34 }
 0x6ae   :  { %v972_v41 = vsel %vm969_vm5, %v971_v3, %v967_v1 }
 0x6af   :  { %v974_v25 = vadd.f32 %v972_v41, %v972_v41 }
 0x6b1   :  { %v2694_v42 = vadd.f32 -1.0, %v974_v25 }
 0x6b2   :  { %1037 = vrot.lane.b32.xlu1 %v1032_v33, %s3071_s3 }
 0x6b3   :  { %v976_v8 = vsel %vm3179_vm3, %v2694_v42, %v972_v41 }
 0x6b4   :  { %979 = vrot.lane.b32.xlu0 %v976_v8, %s3073_s20  ;;  %977 = vrot.lane.b32.xlu2 %v976_v8, %s3072_s19  ;;  %v983_v50 = vsel %vm250_vm8, %v976_v8, 0.0 }
 0x6bc   :  { %981 = vrot.lane.b32.xlu2 %v976_v8, %s3071_s3 }
 0x70e   :  { %v978_v27 = vpop.permute.xlu2 %977 }
 0x70f   :  { %v984_v51 = vmul.f32 %v978_v27, %v3515_v63  ;;  %v1113_v63 = vunpack.c.l.bf16 %v3554_v2 }
 0x716   :  { %v982_v35 = vpop.permute.xlu2 %981 }
 0x71c   :  { %v1036_v44 = vpop.permute.xlu1 %1035  ;;  %v1034_v23 = vpop.permute.xlu0 %1033 }
 0x71d   :  { %v1041_v46 = vmul.f32 %v1039_v45, %v1036_v44  ;;  %v1040_v26 = vmul.f32 %v1034_v23, %v3509_v56 }
 0x71f   :  { %v3545_v47 = vadd.f32 %v1041_v46, %v1040_v26 }
 0x721   :  { %2861 = vtanh.f32 %v3545_v47 }
 0x724   :  { %v1038_v38 = vpop.permute.xlu1 %1037 }
 0x726   :  { %v980_v48 = vpop.permute.xlu0 %979 }
 0x727   :  { %v2862_v18 = vpop.eup %2861  ;;  %v985_v52 = vmul.f32 %v983_v50, %v980_v48 }
 0x728   :  { %v1044_v53 = vmul.f32 %v2862_v18, %v1038_v38 }
 0x729   :  { %v3551_v40 = vadd.f32 %v985_v52, %v984_v51 }
 0x72a   :  { %v1045_v54 = vpack.c.bf16 %v1044_v53, %v1044_v53 }
 0x72b   :  { %2863 = vtanh.f32 %v3551_v40 }
 0x72c   :  { %1054 = vmatmul.bf16.vlgmr.msra.gmra.mxu2 %v1045_v54  ;;  %1122 = vmatmul.bf16.vlgmr.msra.gmra.mxu0 %v1045_v54 }
 0x731   :  { %v2864_v56 = vpop.eup %2863 }
 0x732   :  { %v988_v49 = vmul.f32 %v2864_v56, %v982_v35 }
 0x734   :  { %v989_v43 = vpack.c.bf16 %v988_v49, %v988_v49 }
 0x736   :  { %991 = vst [vmem:[#allocation3 + $0x10] sm:$0xf] %v989_v43  ;;  %1067 = vmatmul.bf16.vlgmr.msra.gmra.mxu3 %v989_v43 }
 0x7a9   :  { %v1123_v0 = vpop.f32.mrf.mxu0 }
 0x7aa   :  { %v1127_v37 = vadd.f32 %v1123_v0, %v1113_v63 }
 0x7ac   :  { %v1128_v6 = vadd.f32 %v1127_v37, %v1127_v37 }
 0x7ae   :  { %v1129_v10 = vsel %vm3179_vm3, %v1128_v6, %v1127_v37 }
 0x7af   :  { %v2699_v11 = vmul.f32 -1.442695, %v1129_v10  ;;  %v1055_v12 = vpop.f32.mrf.mxu2 }
 0x7b0   :  { %v1056_v5 = vadd.f32 %v3562_v4, %v1055_v12 }
 0x7b1   :  { %2865 = vpow2.f32 %v2699_v11  ;;  %v1125_v13 = vpop.f32.mrf.mxu0 }
 0x7b7   :  { %v2866_v14 = vpop.eup %2865  ;;  %v1057_v15 = vpop.f32.mrf.mxu2 }
 0x7b8   :  { %v1133_v55 = vadd.f32 1.0, %v2866_v14  ;;  %v1232_v14 = vunpack.c.h.bf16 %v3554_v2 }
 0x7b9   :  { %v1068_v7 = vpop.f32.mrf.mxu3 }
 0x7ba   :  { %2867 = vrcp.f32 %v1133_v55  ;;  %v1069_v16 = vadd.f32 %v1068_v7, %v1056_v5  ;;  %v1145_v30 = vand.u32 2147483648, %v1133_v55  ;;  %v1143_v36 = vand.u32 2147483647, %v1133_v55 }
 0x7bb   :  { %vm1139_vm7 = vweird.f32 %v1133_v55 }
 0x7bc   :  { %v1072_v17 = vadd.f32 %v1069_v16, %v1069_v16  ;;  %v1146_v60 = vor.u32 1.1754944e-38, %v1145_v30  ;;  %vm1144_vm10 = vcmp.eq.f32.partialorder %v1143_v36, 8.507059e+37 }
 0x7be   :  { %v1073_v19 = vsel %vm3179_vm3, %v1072_v17, %v1069_v16 }
 0x7bf   :  { %v2697_v28 = vmul.f32 -1.442695, %v1073_v19 }
 0x7c0   :  { %v2868_v9 = vpop.eup %2867 }
 0x7c1   :  { %2869 = vpow2.f32 %v2697_v28  ;;  %v1070_v20 = vpop.f32.mrf.mxu3  ;;  %v1135_v21 = vmul.f32 %v2868_v9, %v1133_v55  ;;  %vm1140_vm6 = vweird.f32 %v2868_v9 }
 0x7c2   :  { %vm1141_vm9 = vmor %vm1139_vm7, %vm1140_vm6 }
 0x7c3   :  { %v1136_v22 = vsub.f32 1.0, %v1135_v21 }
 0x7c5   :  { %v1137_v31 = vmul.f32 %v2868_v9, %v1136_v22 }
 0x7c7   :  { %v2870_v39 = vpop.eup %2869  ;;  %v1138_v57 = vadd.f32 %v2868_v9, %v1137_v31 }
 0x7c8   :  { %v1077_v58 = vadd.f32 1.0, %v2870_v39 }
 0x7c9   :  { %v1142_v32 = vsel %vm1141_vm9, %v2868_v9, %v1138_v57 }
 0x7ca   :  { %2871 = vrcp.f32 %v1077_v58  ;;  %v1147_v62 = vsel %vm1144_vm10, %v1146_v60, %v1142_v32  ;;  %v1089_v41 = vand.u32 2147483648, %v1077_v58  ;;  %v1087_v42 = vand.u32 2147483647, %v1077_v58 }
 0x7cb   :  { %v1149_v33 = vadd.f32 %v1147_v62, %v1147_v62  ;;  %vm1083_vm12 = vweird.f32 %v1077_v58 }
 0x7cc   :  { %v1090_v44 = vor.u32 1.1754944e-38, %v1089_v41  ;;  %vm1088_vm14 = vcmp.eq.f32.partialorder %v1087_v42, 8.507059e+37 }
 0x7cd   :  { %v2700_v59 = vadd.f32 -1.0, %v1149_v33 }
 0x7cf   :  { %v1151_v61 = vsel %vm3179_vm3, %v2700_v59, %v1147_v62 }
 0x7d0   :  { %v2872_v34 = vpop.eup %2871  ;;  %1154 = vrot.lane.b32.xlu1 %v1151_v61, %s3073_s20  ;;  %1152 = vrot.lane.b32.xlu0 %v1151_v61, %s3072_s19  ;;  %v1158_v50 = vsel %vm250_vm8, %v1151_v61, 0.0 }
 0x7d1   :  { %v1079_v3 = vmul.f32 %v2872_v34, %v1077_v58  ;;  %vm1084_vm11 = vweird.f32 %v2872_v34 }
 0x7d2   :  { %vm1085_vm13 = vmor %vm1083_vm12, %vm1084_vm11 }
 0x7d3   :  { %v1080_v1 = vsub.f32 1.0, %v1079_v3 }
 0x7d5   :  { %v1081_v25 = vmul.f32 %v2872_v34, %v1080_v1 }
 0x7d7   :  { %v1082_v8 = vadd.f32 %v2872_v34, %v1081_v25 }
 0x7d8   :  { %1156 = vrot.lane.b32.xlu1 %v1151_v61, %s3071_s3 }
 0x7d9   :  { %v1086_v45 = vsel %vm1085_vm13, %v2872_v34, %v1082_v8 }
 0x7da   :  { %v1091_v23 = vsel %vm1088_vm14, %v1090_v44, %v1086_v45 }
 0x7db   :  { %v1093_v46 = vadd.f32 %v1091_v23, %v1091_v23 }
 0x7dd   :  { %v2698_v26 = vadd.f32 -1.0, %v1093_v46 }
 0x7df   :  { %v1095_v27 = vsel %vm3179_vm3, %v2698_v26, %v1091_v23 }
 0x7e0   :  { %1098 = vrot.lane.b32.xlu0 %v1095_v27, %s3073_s20  ;;  %1096 = vrot.lane.b32.xlu2 %v1095_v27, %s3072_s19  ;;  %v1102_v63 = vsel %vm250_vm8, %v1095_v27, 0.0 }
 0x7e8   :  { %1100 = vrot.lane.b32.xlu2 %v1095_v27, %s3071_s3 }
 0x83a   :  { %v1097_v35 = vpop.permute.xlu2 %1096 }
 0x83b   :  { %v1103_v0 = vmul.f32 %v1097_v35, %v3551_v40 }
 0x842   :  { %v1155_v48 = vpop.permute.xlu1 %1154  ;;  %v1153_v51 = vpop.permute.xlu0 %1152 }
 0x843   :  { %v1160_v18 = vmul.f32 %v1158_v50, %v1155_v48  ;;  %v1159_v38 = vmul.f32 %v1153_v51, %v3545_v47  ;;  %v1101_v10 = vpop.permute.xlu2 %1100 }
 0x845   :  { %v3580_v52 = vadd.f32 %v1160_v18, %v1159_v38 }
 0x847   :  { %2873 = vtanh.f32 %v3580_v52 }
 0x84a   :  { %v1157_v54 = vpop.permute.xlu1 %1156 }
 0x84d   :  { %v2874_v53 = vpop.eup %2873 }
 0x84e   :  { %v1163_v56 = vmul.f32 %v2874_v53, %v1157_v54 }
 0x850   :  { %v1164_v49 = vpack.c.bf16 %v1163_v56, %v1163_v56 }
 0x852   :  { %v1099_v43 = vpop.permute.xlu0 %1098  ;;  %1173 = vmatmul.bf16.vlgmr.msrb.gmra.mxu1 %v1164_v49  ;;  %1241 = vmatmul.bf16.vlgmr.msrb.gmra.mxu3 %v1164_v49 }
 0x853   :  { %v1104_v37 = vmul.f32 %v1102_v63, %v1099_v43 }
 0x855   :  { %v3586_v6 = vadd.f32 %v1104_v37, %v1103_v0 }
 0x857   :  { %2875 = vtanh.f32 %v3586_v6 }
 0x85d   :  { %v2876_v47 = vpop.eup %2875 }
 0x85e   :  { %v1107_v11 = vmul.f32 %v2876_v47, %v1101_v10 }
 0x860   :  { %v1108_v12 = vpack.c.bf16 %v1107_v11, %v1107_v11 }
 0x862   :  { %1110 = vst [vmem:[#allocation3 + $0x14] sm:$0xf] %v1108_v12  ;;  %1186 = vmatmul.bf16.vlgmr.msrb.gmra.mxu2 %v1108_v12 }
 0x869   :  { %v3626_v29 = vld [vmem:[#allocation3 + $0x10] sm:$0xff]  }
 0x8cf   :  { %v1174_v13 = vpop.f32.mrf.mxu1 }
 0x8d0   :  { %v1175_v28 = vadd.f32 %v3562_v4, %v1174_v13 }
 0x8d5   :  { %v1242_v15 = vpop.f32.mrf.mxu3 }
 0x8d6   :  { %v1246_v55 = vadd.f32 %v1242_v15, %v1232_v14 }
 0x8d7   :  { %v1176_v5 = vpop.f32.mrf.mxu1 }
 0x8d8   :  { %v1247_v40 = vadd.f32 %v1246_v55, %v1246_v55 }
 0x8da   :  { %v1248_v7 = vsel %vm3179_vm3, %v1247_v40, %v1246_v55 }
 0x8db   :  { %v2703_v16 = vmul.f32 -1.442695, %v1248_v7 }
 0x8dd   :  { %2877 = vpow2.f32 %v2703_v16  ;;  %v1244_v17 = vpop.f32.mrf.mxu3 }
 0x8e3   :  { %v2878_v19 = vpop.eup %2877 }
 0x8e4   :  { %v1252_v9 = vadd.f32 1.0, %v2878_v19 }
 0x8e5   :  { %v1187_v20 = vpop.f32.mrf.mxu2 }
 0x8e6   :  { %v1188_v21 = vadd.f32 %v1187_v20, %v1175_v28  ;;  %2879 = vrcp.f32 %v1252_v9  ;;  %v1264_v58 = vand.u32 2147483648, %v1252_v9  ;;  %v1262_v32 = vand.u32 2147483647, %v1252_v9 }
 0x8e7   :  { %vm1258_vm1 = vweird.f32 %v1252_v9 }
 0x8e8   :  { %v1191_v22 = vadd.f32 %v1188_v21, %v1188_v21  ;;  %v1265_v61 = vor.u32 1.1754944e-38, %v1264_v58  ;;  %vm1263_vm2 = vcmp.eq.f32.partialorder %v1262_v32, 8.507059e+37 }
 0x8ea   :  { %v1192_v2 = vsel %vm3179_vm3, %v1191_v22, %v1188_v21 }
 0x8eb   :  { %v2701_v30 = vmul.f32 -1.442695, %v1192_v2 }
 0x8ec   :  { %v2880_v31 = vpop.eup %2879 }
 0x8ed   :  { %2881 = vpow2.f32 %v2701_v30  ;;  %v1189_v36 = vpop.f32.mrf.mxu2  ;;  %v1254_v39 = vmul.f32 %v2880_v31, %v1252_v9  ;;  %vm1259_vm15 = vweird.f32 %v2880_v31 }
 0x8ee   :  { %vm1260_vm0 = vmor %vm1258_vm1, %vm1259_vm15 }
 0x8ef   :  { %v1255_v57 = vsub.f32 1.0, %v1254_v39 }
 0x8f1   :  { %v1256_v60 = vmul.f32 %v2880_v31, %v1255_v57 }
 0x8f3   :  { %v2882_v62 = vpop.eup %2881  ;;  %v1257_v59 = vadd.f32 %v2880_v31, %v1256_v60 }
 0x8f4   :  { %v1196_v33 = vadd.f32 1.0, %v2882_v62 }
 0x8f5   :  { %v1261_v34 = vsel %vm1260_vm0, %v2880_v31, %v1257_v59 }
 0x8f6   :  { %2883 = vrcp.f32 %v1196_v33  ;;  %v1266_v3 = vsel %vm1263_vm2, %v1265_v61, %v1261_v34  ;;  %v1208_v45 = vand.u32 2147483648, %v1196_v33  ;;  %v1206_v46 = vand.u32 2147483647, %v1196_v33  ;;  %v2779_v34 = vld [vmem:[#allocation3 + $0x8] sm:$0xff]  }
 0x8f7   :  { %v1268_v1 = vadd.f32 %v1266_v3, %v1266_v3  ;;  %vm1202_vm5 = vweird.f32 %v1196_v33 }
 0x8f8   :  { %v1209_v27 = vor.u32 1.1754944e-38, %v1208_v45  ;;  %vm1207_vm7 = vcmp.eq.f32.partialorder %v1206_v46, 8.507059e+37  ;;  %v2770_v45 = vunpack.c.l.bf16 %v3626_v29 }
 0x8f9   :  { %v2704_v41 = vadd.f32 -1.0, %v1268_v1  ;;  %v2767_v1 = vunpack.c.h.bf16 %v2779_v34 }
 0x8fa   :  { %v1369_v46 = vsel %vm250_vm8, %v2770_v45, -3.4028235e+38 }
 0x8fb   :  { %v1270_v42 = vsel %vm3179_vm3, %v2704_v41, %v1266_v3  ;;  %v2761_v3 = vld [vmem:[#allocation3] sm:$0xff]  }
 0x8fc   :  { %v2884_v25 = vpop.eup %2883  ;;  %1273 = vrot.lane.b32.xlu1 %v1270_v42, %s3073_s20  ;;  %1271 = vrot.lane.b32.xlu0 %v1270_v42, %s3072_s19  ;;  %v1277_v54 = vsel %vm250_vm8, %v1270_v42, 0.0  ;;  %v2762_v41 = vunpack.c.l.bf16 %v2761_v3 }
 0x8fd   :  { %v1198_v8 = vmul.f32 %v2884_v25, %v1196_v33  ;;  %vm1203_vm4 = vweird.f32 %v2884_v25 }
 0x8fe   :  { %vm1204_vm6 = vmor %vm1202_vm5, %vm1203_vm4 }
 0x8ff   :  { %v1199_v44 = vsub.f32 1.0, %v1198_v8  ;;  %v1365_v8 = vsel %vm250_vm8, %v2762_v41, -3.4028235e+38 }
 0x901   :  { %v1200_v23 = vmul.f32 %v2884_v25, %v1199_v44 }
 0x903   :  { %v1201_v26 = vadd.f32 %v2884_v25, %v1200_v23  ;;  %v2763_v23 = vunpack.c.h.bf16 %v2761_v3 }
 0x904   :  { %1275 = vrot.lane.b32.xlu1 %v1270_v42, %s3071_s3  ;;  %v1368_v42 = vsel %vm250_vm8, %v2767_v1, -3.4028235e+38 }
 0x905   :  { %v1205_v48 = vsel %vm1204_vm6, %v2884_v25, %v1201_v26  ;;  %v2766_v25 = vunpack.c.l.bf16 %v2779_v34  ;;  %v1366_v26 = vsel %vm250_vm8, %v2763_v23, -3.4028235e+38 }
 0x906   :  { %v1210_v50 = vsel %vm1207_vm7, %v1209_v27, %v1205_v48  ;;  %v2771_v27 = vunpack.c.h.bf16 %v3626_v29 }
 0x907   :  { %v1212_v18 = vadd.f32 %v1210_v50, %v1210_v50  ;;  %v1367_v44 = vsel %vm250_vm8, %v2766_v25, -3.4028235e+38 }
 0x908   :  { %v1370_v48 = vsel %vm250_vm8, %v2771_v27, -3.4028235e+38 }
 0x909   :  { %v2702_v51 = vadd.f32 -1.0, %v1212_v18 }
 0x90b   :  { %v1214_v38 = vsel %vm3179_vm3, %v2702_v51, %v1210_v50 }
 0x90c   :  { %1217 = vrot.lane.b32.xlu0 %v1214_v38, %s3073_s20  ;;  %1215 = vrot.lane.b32.xlu2 %v1214_v38, %s3072_s19  ;;  %v1221_v12 = vsel %vm250_vm8, %v1214_v38, 0.0 }
 0x914   :  { %1219 = vrot.lane.b32.xlu2 %v1214_v38, %s3071_s3 }
 0x966   :  { %v1216_v47 = vpop.permute.xlu2 %1215 }
 0x967   :  { %v1222_v13 = vmul.f32 %v1216_v47, %v3586_v6 }
 0x96e   :  { %v1274_v53 = vpop.permute.xlu1 %1273  ;;  %v1272_v56 = vpop.permute.xlu0 %1271 }
 0x96f   :  { %v1279_v35 = vmul.f32 %v1277_v54, %v1274_v53  ;;  %v1278_v49 = vmul.f32 %v1272_v56, %v3580_v52  ;;  %v1220_v55 = vpop.permute.xlu2 %1219 }
 0x971   :  { %v1280_v43 = vadd.f32 %v1279_v35, %v1278_v49 }
 0x973   :  { %2885 = vtanh.f32 %v1280_v43 }
 0x976   :  { %v1276_v0 = vpop.permute.xlu1 %1275 }
 0x979   :  { %v2886_v63 = vpop.eup %2885 }
 0x97a   :  { %v1282_v37 = vmul.f32 %v2886_v63, %v1276_v0 }
 0x97c   :  { %v1283_v10 = vpack.c.bf16 %v1282_v37, %v1282_v37 }
 0x97e   :  { %v1218_v11 = vpop.permute.xlu0 %1217  ;;  %1292 = vmatmul.bf16.vlgmr.msrb.gmra.mxu0 %v1283_v10 }
 0x97f   :  { %v1223_v14 = vmul.f32 %v1221_v12, %v1218_v11 }
 0x981   :  { %v3611_v15 = vadd.f32 %v1223_v14, %v1222_v13 }
 0x983   :  { %2887 = vtanh.f32 %v3611_v15 }
 0x989   :  { %v2888_v52 = vpop.eup %2887 }
 0x98a   :  { %v1226_v5 = vmul.f32 %v2888_v52, %v1220_v55 }
 0x98c   :  { %v1227_v40 = vpack.c.bf16 %v1226_v5, %v1226_v5 }
 0x98e   :  { %1229 = vst [vmem:[#allocation3 + $0x18] sm:$0xf] %v1227_v40  ;;  %1305 = vmatmul.bf16.vlgmr.msra.gmra.mxu1 %v1227_v40 }
 0x9fb   :  { %v1293_v7 = vpop.f32.mrf.mxu0 }
 0x9fc   :  { %v1294_v17 = vadd.f32 %v3562_v4, %v1293_v7 }
 0xa03   :  { %v1295_v16 = vpop.f32.mrf.mxu0 }
 0xa0b   :  { %v1306_v19 = vpop.f32.mrf.mxu1 }
 0xa0c   :  { %v1307_v28 = vadd.f32 %v1306_v19, %v1294_v17 }
 0xa0e   :  { %v1310_v9 = vadd.f32 %v1307_v28, %v1307_v28 }
 0xa10   :  { %v1311_v6 = vsel %vm3179_vm3, %v1310_v9, %v1307_v28 }
 0xa11   :  { %v2705_v20 = vmul.f32 -1.442695, %v1311_v6 }
 0xa13   :  { %2889 = vpow2.f32 %v2705_v20  ;;  %v1308_v21 = vpop.f32.mrf.mxu1 }
 0xa19   :  { %v2890_v22 = vpop.eup %2889 }
 0xa1a   :  { %v1315_v2 = vadd.f32 1.0, %v2890_v22 }
 0xa1c   :  { %2891 = vrcp.f32 %v1315_v2  ;;  %v1327_v39 = vand.u32 2147483648, %v1315_v2  ;;  %v1325_v58 = vand.u32 2147483647, %v1315_v2  ;;  %vm1321_vm10 = vweird.f32 %v1315_v2 }
 0xa1e   :  { %v1328_v60 = vor.u32 1.1754944e-38, %v1327_v39  ;;  %vm1326_vm12 = vcmp.eq.f32.partialorder %v1325_v58, 8.507059e+37 }
 0xa22   :  { %v2892_v30 = vpop.eup %2891 }
 0xa23   :  { %v1317_v31 = vmul.f32 %v2892_v30, %v1315_v2  ;;  %vm1322_vm9 = vweird.f32 %v2892_v30 }
 0xa24   :  { %vm1323_vm11 = vmor %vm1321_vm10, %vm1322_vm9 }
 0xa25   :  { %v1318_v36 = vsub.f32 1.0, %v1317_v31 }
 0xa27   :  { %v1319_v57 = vmul.f32 %v2892_v30, %v1318_v36 }
 0xa29   :  { %v1320_v4 = vadd.f32 %v2892_v30, %v1319_v57 }
 0xa2b   :  { %v1324_v32 = vsel %vm1323_vm11, %v2892_v30, %v1320_v4 }
 0xa2c   :  { %v1329_v62 = vsel %vm1326_vm12, %v1328_v60, %v1324_v32 }
 0xa2d   :  { %v1331_v33 = vadd.f32 %v1329_v62, %v1329_v62 }
 0xa2f   :  { %v2706_v59 = vadd.f32 -1.0, %v1331_v33 }
 0xa31   :  { %v1333_v61 = vsel %vm3179_vm3, %v2706_v59, %v1329_v62 }
 0xa32   :  { %1338 = vrot.lane.b32.xlu2 %v1333_v61, %s3071_s3  ;;  %1336 = vrot.lane.b32.xlu1 %v1333_v61, %s3073_s20  ;;  %v1340_v18 = vsel %vm250_vm8, %v1333_v61, 0.0 }
 0xa33   :  { %1334 = vrot.lane.b32.xlu0 %v1333_v61, %s3072_s19 }
 0xa5b   :  { %1379 = vmax.xlane.f32.xlu2 %v1368_v42 }
 0xa5c   :  { %1373 = vmax.xlane.f32.xlu1 %v1365_v8 }
 0xa5d   :  { %1377 = vmax.xlane.f32.xlu0 %v1367_v44 }
 0xa63   :  { %1381 = vmax.xlane.f32.xlu2 %v1369_v46 }
 0xa64   :  { %1375 = vmax.xlane.f32.xlu1 %v1366_v26 }
 0xa6b   :  { %1383 = vmax.xlane.f32.xlu2 %v1370_v48 }
 0xa8c   :  { %v1339_v35 = vpop.permute.xlu2 %1338 }
 0xaa4   :  { %v1337_v50 = vpop.permute.xlu1 %1336 }
 0xaa5   :  { %v1342_v51 = vmul.f32 %v1340_v18, %v1337_v50  ;;  %v1335_v38 = vpop.permute.xlu0 %1334 }
 0xaa6   :  { %v1341_v53 = vmul.f32 %v1335_v38, %v3611_v15 }
 0xaa8   :  { %v1343_v54 = vadd.f32 %v1342_v51, %v1341_v53 }
 0xaaa   :  { %2893 = vtanh.f32 %v1343_v54 }
 0xab0   :  { %v2894_v56 = vpop.eup %2893 }
 0xab1   :  { %v1345_v49 = vmul.f32 %v2894_v56, %v1339_v35 }
 0xab3   :  { %v1346_v43 = vpack.c.bf16 %v1345_v49, %v1345_v49 }
 0xab5   :  { %1348 = vst [vmem:[#allocation3 + $0x1c] sm:$0xf] %v1346_v43 }
 0xabc   :  { %v2781_v63 = vld [vmem:[#allocation3 + $0x18] sm:$0xff]  }
 0xabd   :  { %v2774_v0 = vunpack.c.l.bf16 %v2781_v63  ;;  %v2775_v47 = vunpack.c.h.bf16 %v2781_v63 }
 0xabf   :  { %v1371_v37 = vsel %vm250_vm8, %v2774_v0, -3.4028235e+38  ;;  %v1372_v10 = vsel %vm250_vm8, %v2775_v47, -3.4028235e+38 }
 0xac0   :  { %1385 = vmax.xlane.f32.xlu0 %v1371_v37 }
 0xac8   :  { %1387 = vmax.xlane.f32.xlu0 %v1372_v10 }
 0xace   :  { %v1380_v11 = vpop.xlane.xlu2 %1379 }
 0xacf   :  { %v1392_v12 = vsub.f32 %v2767_v1, %v1380_v11  ;;  %v1374_v13 = vpop.xlane.xlu1 %1373 }
 0xad0   :  { %v1378_v14 = vpop.xlane.xlu0 %1377  ;;  %v1389_v15 = vsub.f32 %v2762_v41, %v1374_v13 }
 0xad1   :  { %v1403_v52 = vmul.f32 1.442695, %v1392_v12  ;;  %v1391_v55 = vsub.f32 %v2766_v25, %v1378_v14 }
 0xad2   :  { %v1397_v5 = vmul.f32 1.442695, %v1389_v15 }
 0xad3   :  { %2895 = vpow2.f32 %v1403_v52  ;;  %v1401_v40 = vmul.f32 1.442695, %v1391_v55 }
 0xad4   :  { %2897 = vpow2.f32 %v1397_v5 }
 0xad5   :  { %2899 = vpow2.f32 %v1401_v40 }
 0xad6   :  { %v1382_v7 = vpop.xlane.xlu2 %1381 }
 0xad7   :  { %v1393_v16 = vsub.f32 %v2770_v45, %v1382_v7  ;;  %v1376_v17 = vpop.xlane.xlu1 %1375 }
 0xad8   :  { %v1390_v19 = vsub.f32 %v2763_v23, %v1376_v17 }
 0xad9   :  { %v2896_v28 = vpop.eup %2895  ;;  %v1405_v9 = vmul.f32 1.442695, %v1393_v16 }
 0xada   :  { %v2898_v6 = vpop.eup %2897  ;;  %v1399_v20 = vmul.f32 1.442695, %v1390_v19  ;;  %v3647_v21 = vsel %vm250_vm8, %v2896_v28, 0.0 }
 0xadb   :  { %v2900_v22 = vpop.eup %2899  ;;  %2901 = vpow2.f32 %v1405_v9  ;;  %1427 = vadd.xlane.f32.xlu0 %v3647_v21  ;;  %v3652_v2 = vsel %vm250_vm8, %v2898_v6, 0.0 }
 0xadc   :  { %2903 = vpow2.f32 %v1399_v20  ;;  %v3656_v30 = vsel %vm250_vm8, %v2900_v22, 0.0  ;;  %1421 = vadd.xlane.f32.xlu2 %v3652_v2 }
 0xadd   :  { %1425 = vadd.xlane.f32.xlu1 %v3656_v30 }
 0xade   :  { %v1384_v31 = vpop.xlane.xlu2 %1383 }
 0xadf   :  { %v1394_v36 = vsub.f32 %v2771_v27, %v1384_v31 }
 0xae1   :  { %v2902_v39 = vpop.eup %2901  ;;  %v1407_v57 = vmul.f32 1.442695, %v1394_v36 }
 0xae2   :  { %v2904_v58 = vpop.eup %2903  ;;  %v3662_v4 = vsel %vm250_vm8, %v2902_v39, 0.0 }
 0xae3   :  { %2905 = vpow2.f32 %v1407_v57  ;;  %v3666_v60 = vsel %vm250_vm8, %v2904_v58, 0.0 }
 0xae4   :  { %1423 = vadd.xlane.f32.xlu0 %v3666_v60 }
 0xae5   :  { %1429 = vadd.xlane.f32.xlu1 %v3662_v4 }
 0xae9   :  { %v2906_v32 = vpop.eup %2905 }
 0xaea   :  { %v3672_v62 = vsel %vm250_vm8, %v2906_v32, 0.0 }
 0xaed   :  { %1431 = vadd.xlane.f32.xlu1 %v3672_v62 }
 0xb33   :  { %v1386_v33 = vpop.xlane.xlu0 %1385 }
 0xb34   :  { %v1395_v59 = vsub.f32 %v2774_v0, %v1386_v33 }
 0xb36   :  { %v1409_v61 = vmul.f32 1.442695, %v1395_v59 }
 0xb38   :  { %2907 = vpow2.f32 %v1409_v61 }
 0xb3b   :  { %v1388_v34 = vpop.xlane.xlu0 %1387 }
 0xb3c   :  { %v1396_v3 = vsub.f32 %v2775_v47, %v1388_v34 }
 0xb3e   :  { %v2908_v1 = vpop.eup %2907  ;;  %v1411_v41 = vmul.f32 1.442695, %v1396_v3 }
 0xb3f   :  { %v3677_v25 = vsel %vm250_vm8, %v2908_v1, 0.0 }
 0xb40   :  { %2909 = vpow2.f32 %v1411_v41  ;;  %1433 = vadd.xlane.f32.xlu2 %v3677_v25 }
 0xb46   :  { %v2910_v42 = vpop.eup %2909 }
 0xb47   :  { %v3682_v8 = vsel %vm250_vm8, %v2910_v42, 0.0 }
 0xb48   :  { %1435 = vadd.xlane.f32.xlu2 %v3682_v8 }
 0xb4e   :  { %v3685_v29 = vpop.xlane.xlu0 %1427 }
 0xb4f   :  { %2911 = vrcp.f32 %v3685_v29  ;;  %v1422_v44 = vpop.xlane.xlu2 %1421  ;;  %v1493_v36 = vand.u32 2147483648, %v3685_v29  ;;  %vm1487_vm9 = vweird.f32 %v3685_v29 }
 0xb50   :  { %2913 = vrcp.f32 %v1422_v44  ;;  %v1426_v45 = vpop.xlane.xlu1 %1425  ;;  %v1448_v53 = vand.u32 2147483648, %v1422_v44  ;;  %v1446_v56 = vand.u32 2147483647, %v1422_v44  ;;  %vm1442_vm13 = vweird.f32 %v1422_v44 }
 0xb51   :  { %2915 = vrcp.f32 %v1426_v45  ;;  %v1478_v35 = vand.u32 2147483648, %v1426_v45  ;;  %v1476_v43 = vand.u32 2147483647, %v1426_v45  ;;  %vm1472_vm15 = vweird.f32 %v1426_v45 }
 0xb52   :  { %v1449_v47 = vor.u32 1.1754944e-38, %v1448_v53  ;;  %vm1447_vm1 = vcmp.eq.f32.partialorder %v1446_v56, 8.507059e+37  ;;  %v1494_v61 = vor.u32 1.1754944e-38, %v1493_v36 }
 0xb53   :  { %v1479_v14 = vor.u32 1.1754944e-38, %v1478_v35  ;;  %vm1477_vm2 = vcmp.eq.f32.partialorder %v1476_v43, 8.507059e+37 }
 0xb55   :  { %v3688_v23 = vpop.eup %2911 }
 0xb56   :  { %v2914_v46 = vpop.eup %2913  ;;  %v1483_v18 = vmul.f32 %v3688_v23, %v3685_v29  ;;  %vm1488_vm5 = vweird.f32 %v3688_v23 }
 0xb57   :  { %v2916_v26 = vpop.eup %2915  ;;  %v1438_v27 = vmul.f32 %v2914_v46, %v1422_v44  ;;  %v3690_v48 = vpop.xlane.xlu0 %1423  ;;  %vm1443_vm3 = vweird.f32 %v2914_v46  ;;  %vm1489_vm11 = vmor %vm1487_vm9, %vm1488_vm5 }
 0xb58   :  { %v1468_v24 = vmul.f32 %v2916_v26, %v1426_v45  ;;  %2917 = vrcp.f32 %v3690_v48  ;;  %v1430_v50 = vpop.xlane.xlu1 %1429  ;;  %vm1473_vm8 = vweird.f32 %v2916_v26  ;;  %v1484_v63 = vsub.f32 1.0, %v1483_v18  ;;  %vm1444_vm14 = vmor %vm1442_vm13, %vm1443_vm3 }
 0xb59   :  { %v1439_v51 = vsub.f32 1.0, %v1438_v27  ;;  %2919 = vrcp.f32 %v1430_v50  ;;  %vm1474_vm0 = vmor %vm1472_vm15, %vm1473_vm8  ;;  %v1508_v28 = vand.u32 2147483648, %v1430_v50  ;;  %v1506_v20 = vand.u32 2147483647, %v1430_v50 }
 0xb5a   :  { %v1469_v38 = vsub.f32 1.0, %v1468_v24  ;;  %v1485_v5 = vmul.f32 %v3688_v23, %v1484_v63  ;;  %vm1502_vm6 = vweird.f32 %v1430_v50  ;;  %v1463_v33 = vand.u32 2147483648, %v3690_v48 }
 0xb5b   :  { %v1440_v54 = vmul.f32 %v2914_v46, %v1439_v51  ;;  %vm1507_vm10 = vcmp.eq.f32.partialorder %v1506_v20, 8.507059e+37  ;;  %vm1457_vm3 = vweird.f32 %v3690_v48  ;;  %v1461_v34 = vand.u32 2147483647, %v3690_v48 }
 0xb5c   :  { %v1470_v49 = vmul.f32 %v2916_v26, %v1469_v38  ;;  %v1486_v22 = vadd.f32 %v3688_v23, %v1485_v5  ;;  %v1464_v41 = vor.u32 1.1754944e-38, %v1463_v33 }
 0xb5d   :  { %v1441_v0 = vadd.f32 %v2914_v46, %v1440_v54 }
 0xb5e   :  { %v2918_v37 = vpop.eup %2917  ;;  %v1471_v10 = vadd.f32 %v2916_v26, %v1470_v49  ;;  %v1490_v32 = vsel %vm1489_vm11, %v3688_v23, %v1486_v22 }
 0xb5f   :  { %v2920_v11 = vpop.eup %2919  ;;  %v1453_v12 = vmul.f32 %v2918_v37, %v3690_v48  ;;  %v1445_v13 = vsel %vm1444_vm14, %v2914_v46, %v1441_v0  ;;  %vm1458_vm12 = vweird.f32 %v2918_v37  ;;  %vm1462_vm14 = vcmp.eq.f32.partialorder %v1461_v34, 8.507059e+37 }
 0xb60   :  { %v1498_v15 = vmul.f32 %v2920_v11, %v1430_v50  ;;  %v1450_v52 = vsel %vm1447_vm1, %v1449_v47, %v1445_v13  ;;  %v1475_v55 = vsel %vm1474_vm0, %v2916_v26, %v1471_v10  ;;  %vm1503_vm4 = vweird.f32 %v2920_v11  ;;  %vm1459_vm13 = vmor %vm1457_vm3, %vm1458_vm12 }
 0xb61   :  { %v1454_v40 = vsub.f32 1.0, %v1453_v12  ;;  %v1451_v7 = vmul.f32 %v1450_v52, %v3652_v2  ;;  %v1480_v16 = vsel %vm1477_vm2, %v1479_v14, %v1475_v55  ;;  %vm1504_vm7 = vmor %vm1502_vm6, %vm1503_vm4  ;;  %v1509_v2 = vor.u32 1.1754944e-38, %v1508_v28 }
 0xb62   :  { %v1499_v17 = vsub.f32 1.0, %v1498_v15  ;;  %v1481_v19 = vmul.f32 %v1480_v16, %v3656_v30  ;;  %v1491_v30 = vand.u32 2147483647, %v3685_v29  ;;  %vm1814_vm3 = vcmask 1047556  }
 0xb63   :  { %1557 = vxpose.xlu1.b32.start.end [1/1] (short) (narrow) %v1451_v7, 8  ;;  %v1455_v9 = vmul.f32 %v2918_v37, %v1454_v40 }
 0xb64   :  { %v1500_v6 = vmul.f32 %v2920_v11, %v1499_v17  ;;  %1621 = vxpose.xlu0.b32.start.end [1/1] (short) (narrow) %v1481_v19, 8  ;;  %vm1492_vm8 = vcmp.eq.f32.partialorder %v1491_v30, 8.507059e+37 }
 0xb65   :  { %v1456_v57 = vadd.f32 %v2918_v37, %v1455_v9  ;;  %v1495_v3 = vsel %vm1492_vm8, %v1494_v61, %v1490_v32  ;;  %vm2370_vm8 = vcmask 64512  }
 0xb66   :  { %v1501_v31 = vadd.f32 %v2920_v11, %v1500_v6  ;;  %v1496_v42 = vmul.f32 %v1495_v3, %v3647_v21  ;;  %v3074_v6 = vmov 1983009808  }
 0xb67   :  { %v1460_v1 = vsel %vm1459_vm13, %v2918_v37, %v1456_v57  ;;  %v1819_v20 = vunpack.c.l.s4 %v3074_v6  ;;  %vm2555_vm13 = vcmask 129024  }
 0xb68   :  { %v1505_v39 = vsel %vm1504_vm7, %v2920_v11, %v1501_v31  ;;  %v1465_v29 = vsel %vm1462_vm14, %v1464_v41, %v1460_v1 }
 0xb69   :  { %v1510_v58 = vsel %vm1507_vm10, %v1509_v2, %v1505_v39  ;;  %v1466_v44 = vmul.f32 %v1465_v29, %v3666_v60 }
 0xb6a   :  { %v1511_v59 = vmul.f32 %v1510_v58, %v3662_v4  ;;  %v1432_v4 = vpop.xlane.xlu1 %1431 }
 0xb6b   :  { %2921 = vrcp.f32 %v1432_v4  ;;  %v1523_v63 = vand.u32 2147483648, %v1432_v4  ;;  %vm1517_vm5 = vweird.f32 %v1432_v4  ;;  %v1521_v47 = vand.u32 2147483647, %v1432_v4 }
 0xb6c   :  { %1685 = vxpose.xlu0.b32.start.end [1/1] (short) (narrow) %v1511_v59, 8 }
 0xb6d   :  { %v1524_v14 = vor.u32 1.1754944e-38, %v1523_v63  ;;  %vm1522_vm10 = vcmp.eq.f32.partialorder %v1521_v47, 8.507059e+37 }
 0xb71   :  { %1653 = vxpose.xlu2.b32.start.end [1/1] (short) (narrow) %v1496_v42, 8  ;;  %v2922_v23 = vpop.eup %2921  ;;  %v3075_v42 = vmov 1934713408  }
 0xb72   :  { %v1513_v46 = vmul.f32 %v2922_v23, %v1432_v4  ;;  %vm1518_vm2 = vweird.f32 %v2922_v23  ;;  %v1867_v29 = vunpack.c.l.s4 %v3075_v42 }
 0xb73   :  { %vm1519_vm6 = vmor %vm1517_vm5, %vm1518_vm2 }
 0xb74   :  { %1589 = vxpose.xlu0.b32.start.end [1/1] (short) (narrow) %v1466_v44, 8  ;;  %v1514_v27 = vsub.f32 1.0, %v1513_v46 }
 0xb76   :  { %v1515_v51 = vmul.f32 %v2922_v23, %v1514_v27 }
 0xb78   :  { %v1516_v49 = vadd.f32 %v2922_v23, %v1515_v51 }
 0xb7a   :  { %v1520_v13 = vsel %vm1519_vm6, %v2922_v23, %v1516_v49 }
 0xb7b   :  { %v1525_v55 = vsel %vm1522_vm10, %v1524_v14, %v1520_v13 }
 0xb7c   :  { %v1526_v7 = vmul.f32 %v1525_v55, %v3672_v62 }
 0xbb3   :  { %v1434_v45 = vpop.xlane.xlu2 %1433 }
 0xbb4   :  { %2923 = vrcp.f32 %v1434_v45  ;;  %v1538_v18 = vand.u32 2147483648, %v1434_v45  ;;  %v1536_v38 = vand.u32 2147483647, %v1434_v45  ;;  %vm1532_vm1 = vweird.f32 %v1434_v45 }
 0xbb6   :  { %v1539_v54 = vor.u32 1.1754944e-38, %v1538_v18  ;;  %vm1537_vm4 = vcmp.eq.f32.partialorder %v1536_v38, 8.507059e+37 }
 0xbba   :  { %v2924_v26 = vpop.eup %2923 }
 0xbbb   :  { %v1528_v48 = vmul.f32 %v2924_v26, %v1434_v45  ;;  %v1436_v24 = vpop.xlane.xlu2 %1435  ;;  %vm1533_vm15 = vweird.f32 %v2924_v26 }
 0xbbc   :  { %2925 = vrcp.f32 %v1436_v24  ;;  %vm1534_vm0 = vmor %vm1532_vm1, %vm1533_vm15  ;;  %v1553_v10 = vand.u32 2147483648, %v1436_v24  ;;  %v1551_v12 = vand.u32 2147483647, %v1436_v24  ;;  %vm1547_vm9 = vweird.f32 %v1436_v24 }
 0xbbd   :  { %v1529_v50 = vsub.f32 1.0, %v1528_v48 }
 0xbbe   :  { %v1554_v52 = vor.u32 1.1754944e-38, %v1553_v10  ;;  %vm1552_vm12 = vcmp.eq.f32.partialorder %v1551_v12, 8.507059e+37 }
 0xbbf   :  { %v1530_v21 = vmul.f32 %v2924_v26, %v1529_v50  ;;  %v3729_v50 = vunpack.c.0.s8 %v1867_v29  ;;  %v2958_v29 = vld [vmem:[#allocation4 + $0x20] sm:$0xff] }
 0xbc1   :  { %v1531_v53 = vadd.f32 %v2924_v26, %v1530_v21 }
 0xbc2   :  { %v2926_v60 = vpop.eup %2925 }
 0xbc3   :  { %v1543_v56 = vmul.f32 %v2926_v60, %v1436_v24  ;;  %v1535_v35 = vsel %vm1534_vm0, %v2924_v26, %v1531_v53  ;;  %vm1548_vm7 = vweird.f32 %v2926_v60 }
 0xbc4   :  { %v1540_v43 = vsel %vm1537_vm4, %v1539_v54, %v1535_v35  ;;  %vm1549_vm11 = vmor %vm1547_vm9, %vm1548_vm7 }
 0xbc5   :  { %v1544_v0 = vsub.f32 1.0, %v1543_v56  ;;  %v1541_v37 = vmul.f32 %v1540_v43, %v3677_v25 }
 0xbc7   :  { %v1545_v11 = vmul.f32 %v2926_v60, %v1544_v0  ;;  %1749 = vxpose.xlu2.b32.start.end [1/1] (short) (narrow) %v1541_v37, 8 }
 0xbc9   :  { %v1546_v15 = vadd.f32 %v2926_v60, %v1545_v11 }
 0xbcb   :  { %v1550_v5 = vsel %vm1549_vm11, %v2926_v60, %v1546_v15 }
 0xbcc   :  { %v1555_v40 = vsel %vm1552_vm12, %v1554_v52, %v1550_v5 }
 0xbcd   :  { %v1556_v25 = vmul.f32 %v1555_v40, %v3682_v8  ;;  %v3716_v8 = vunpack.c.0.s8 %v1819_v20 }
 0xbcf   :  { %1781 = vxpose.xlu0.b32.start.end [1/1] (short) (narrow) %v1556_v25, 8  ;;  %1717 = vxpose.xlu2.b32.start.end [1/1] (short) (narrow) %v1526_v7, 8 }
 0xc07   :  { %v1573_v36 = vpop.trf.xlu1 }
 0xc08   :  { %v1637_v16 = vpop.trf.xlu0  ;;  %v1816_v61 = vrot.slane %v1573_v36, 4 }
 0xc09   :  { %v1813_v28 = vrot.slane %v1637_v16, 4 }
 0xc0a   :  { %v1669_v17 = vpop.trf.xlu2  ;;  %v1817_v4 = vsel %vm1814_vm3, %v1637_v16, %v1816_v61 }
 0xc0b   :  { %v1826_v9 = vrot.slane %v1669_v17, 4  ;;  %v1815_v30 = vsel %vm1814_vm3, %v1813_v28, %v1573_v36  ;;  %v1825_v21 = vperm.slane %v1817_v4, %v3716_v8  ;;  %v2959_v4 = vld [vmem:[#allocation4] sm:$0xff] }
 0xc0c   :  { %v1821_v39 = vperm.slane %v1815_v30, %v3716_v8 }
 0xc0d   :  { %v1876_v10 = vrot.slane %v1825_v21, 4 }
 0xc0e   :  { %v1864_v34 = vrot.slane %v1821_v39, 4 }
 0xc10   :  { %v1701_v19 = vpop.trf.xlu0 }
 0xc11   :  { %v1840_v57 = vrot.slane %v1701_v19, 4 }
 0xc18   :  { %v1605_v31 = vpop.trf.xlu0 }
 0xc19   :  { %v1827_v2 = vsel %vm1814_vm3, %v1826_v9, %v1605_v31  ;;  %v1828_v33 = vrot.slane %v1605_v31, 4 }
 0xc1a   :  { %v1833_v62 = vperm.slane %v1827_v2, %v3716_v8 }
 0xc1b   :  { %v1829_v44 = vsel %vm1814_vm3, %v1669_v17, %v1828_v33 }
 0xc1c   :  { %v1862_v59 = vrot.slane %v1833_v62, 4  ;;  %v1865_v26 = vsel %vm1814_vm3, %v1833_v62, %v1864_v34  ;;  %v1837_v18 = vperm.slane %v1829_v44, %v3716_v8  ;;  %v2952_v62 = vld [vmem:[#allocation4 + $0x38] sm:$0xff]  ;;  %v2956_v34 = vld [vmem:[#allocation4 + $0x10] sm:$0xff] }
 0xc1d   :  { %v1873_v53 = vperm.slane %v1865_v26, %v3729_v50 }
 0xc1e   :  { %v1863_v27 = vsel %vm1814_vm3, %v1862_v59, %v1821_v39  ;;  %v1874_v49 = vrot.slane %v1837_v18, 4  ;;  %v1877_v7 = vsel %vm1814_vm3, %v1837_v18, %v1876_v10  ;;  %v2294_v39 = vrot.slane %v2952_v62, 4  ;;  %v2955_v59 = vld [vmem:[#allocation4 + $0x28] sm:$0xff] }
 0xc1f   :  { %v1869_v35 = vperm.slane %v1863_v27, %v3729_v50  ;;  %v1916_v47 = vrot.slane %v1873_v53, 4  ;;  %v1885_v28 = vperm.slane %v1877_v7, %v3729_v50 }
 0xc20   :  { %v1875_v5 = vsel %vm1814_vm3, %v1874_v49, %v1825_v21  ;;  %v2295_v61 = vsel %vm1814_vm3, %v2294_v39, %v2955_v59 }
 0xc21   :  { %v1912_v13 = vrot.slane %v1869_v35, 4 }
 0xc60   :  { %v1765_v22 = vpop.trf.xlu2 }
 0xc61   :  { %v1838_v58 = vrot.slane %v1765_v22, 4  ;;  %v1841_v1 = vsel %vm1814_vm3, %v1765_v22, %v1840_v57  ;;  %v2953_v57 = vld [vmem:[#allocation4 + $0x18] sm:$0xff] }
 0xc62   :  { %v1849_v23 = vperm.slane %v1841_v1, %v3716_v8  ;;  %v2301_v1 = vperm.slane %v2295_v61, %v3716_v8 }
 0xc63   :  { %v1839_v3 = vsel %vm1814_vm3, %v1838_v58, %v1701_v19  ;;  %v1881_v19 = vperm.slane %v1875_v5, %v3729_v50  ;;  %v2270_v58 = vrot.slane %v2953_v57, 4 }
 0xc64   :  { %v1845_v45 = vperm.slane %v1839_v3, %v3716_v8  ;;  %v1900_v54 = vrot.slane %v1849_v23, 4  ;;  %v2258_v3 = vrot.slane %v2956_v34, 4  ;;  %v2330_v26 = vrot.slane %v2301_v1, 4 }
 0xc65   :  { %v1920_v22 = vrot.slane %v1881_v19, 4 }
 0xc66   :  { %v1888_v60 = vrot.slane %v1845_v45, 4 }
 0xc68   :  { %v1733_v32 = vpop.trf.xlu2 }
 0xc69   :  { %v1852_v41 = vrot.slane %v1733_v32, 4 }
 0xc73   :  { %v1797_v46 = vpop.trf.xlu0 }
 0xc74   :  { %v1850_v48 = vrot.slane %v1797_v46, 4  ;;  %v1853_v24 = vsel %vm1814_vm3, %v1797_v46, %v1852_v41  ;;  %v2957_v41 = vld [vmem:[#allocation4 + $0x8] sm:$0xff] }
 0xc75   :  { %v1861_v51 = vperm.slane %v1853_v24, %v3716_v8  ;;  %v2271_v42 = vsel %vm1814_vm3, %v2270_v58, %v2957_v41 }
 0xc76   :  { %v1851_v38 = vsel %vm1814_vm3, %v1850_v48, %v1733_v32  ;;  %v2954_v32 = vld [vmem:[#allocation4 + $0x30] sm:$0xff]  ;;  %v2296_v48 = vrot.slane %v2955_v59, 4 }
 0xc77   :  { %v1857_v56 = vperm.slane %v1851_v38, %v3716_v8  ;;  %v1901_v0 = vsel %vm1814_vm3, %v1861_v51, %v1900_v54  ;;  %v1898_v11 = vrot.slane %v1861_v51, 4  ;;  %v2282_v33 = vrot.slane %v2954_v32, 4 }
 0xc78   :  { %v1909_v55 = vperm.slane %v1901_v0, %v3729_v50  ;;  %v2284_v54 = vrot.slane %v2958_v29, 4 }
 0xc79   :  { %v1886_v43 = vrot.slane %v1857_v56, 4  ;;  %v1889_v63 = vsel %vm1814_vm3, %v1857_v56, %v1888_v60  ;;  %v1899_v16 = vsel %vm1814_vm3, %v1898_v11, %v1849_v23  ;;  %v2283_v44 = vsel %vm1814_vm3, %v2282_v33, %v2958_v29 }
 0xc7a   :  { %v1897_v37 = vperm.slane %v1889_v63, %v3729_v50  ;;  %v1922_v17 = vrot.slane %v1909_v55, 4  ;;  %v1905_v9 = vperm.slane %v1899_v16, %v3729_v50  ;;  %v2277_v23 = vperm.slane %v2271_v42, %v3716_v8 }
 0xc7b   :  { %v1887_v12 = vsel %vm1814_vm3, %v1886_v43, %v1845_v45  ;;  %v2259_v45 = vsel %vm1814_vm3, %v2258_v3, %v2959_v4  ;;  %v2289_v46 = vperm.slane %v2283_v44, %v3716_v8  ;;  %v2272_v60 = vrot.slane %v2957_v41, 4 }
 0xc7c   :  { %v1917_v14 = vsel %vm1814_vm3, %v1897_v37, %v1916_v47  ;;  %v1914_v15 = vrot.slane %v1897_v37, 4  ;;  %v1893_v52 = vperm.slane %v1887_v12, %v3729_v50  ;;  %v1923_v20 = vsel %vm1814_vm3, %v1922_v17, %v1885_v28 }
 0xc7d   :  { %2020 = vxpose.xlu1.b32.start.end [1/1] (short) (narrow) %v1917_v14, 8  ;;  %v1921_v31 = vsel %vm1814_vm3, %v1905_v9, %v1920_v22  ;;  %v1918_v2 = vrot.slane %v1905_v9, 4  ;;  %v2265_v27 = vperm.slane %v2259_v45, %v3716_v8  ;;  %v2306_v24 = vrot.slane %v2277_v23, 4 }
 0xc7e   :  { %v1915_v40 = vsel %vm1814_vm3, %v1914_v15, %v1873_v53  ;;  %v1913_v25 = vsel %vm1814_vm3, %v1893_v52, %v1912_v13  ;;  %v1910_v6 = vrot.slane %v1893_v52, 4  ;;  %v2331_v18 = vsel %vm1814_vm3, %v2330_v26, %v2289_v46 }
 0xc7f   :  { %1988 = vxpose.xlu0.b32.start.end [1/1] (short) (narrow) %v1915_v40, 8  ;;  %1956 = vxpose.xlu2.b32.start.end [1/1] (short) (narrow) %v1913_v25, 8  ;;  %v1919_v30 = vsel %vm1814_vm3, %v1918_v2, %v1881_v19  ;;  %v2337_v51 = vperm.slane %v2331_v18, %v3729_v50  ;;  %v2307_v21 = vsel %vm1814_vm3, %v2306_v24, %v2265_v27  ;;  %v2260_v43 = vrot.slane %v2959_v4, 4 }
 0xc80   :  { %v1911_v36 = vsel %vm1814_vm3, %v1910_v6, %v1869_v35  ;;  %v2313_v38 = vperm.slane %v2307_v21, %v3729_v50  ;;  %v2297_v56 = vsel %vm1814_vm3, %v2952_v62, %v2296_v48  ;;  %v2273_v37 = vsel %vm1814_vm3, %v2953_v57, %v2272_v60 }
 0xc81   :  { %v2354_v53 = vrot.slane %v2337_v51, 4  ;;  %v2305_v63 = vperm.slane %v2297_v56, %v3716_v8  ;;  %v2285_v47 = vsel %vm1814_vm3, %v2954_v32, %v2284_v54  ;;  %v2261_v10 = vsel %vm1814_vm3, %v2956_v34, %v2260_v43 }
 0xc82   :  { %v2356_v49 = vrot.slane %v2313_v38, 4  ;;  %v2332_v11 = vrot.slane %v2289_v46, 4  ;;  %v2281_v12 = vperm.slane %v2273_v37, %v3716_v8  ;;  %v2293_v13 = vperm.slane %v2285_v47, %v3716_v8 }
 0xc83   :  { %v2355_v35 = vsel %vm1814_vm3, %v2354_v53, %v2313_v38  ;;  %v2342_v14 = vrot.slane %v2305_v63, 4  ;;  %v2308_v15 = vrot.slane %v2265_v27, 4  ;;  %v2269_v55 = vperm.slane %v2261_v10, %v3716_v8 }
 0xc84   :  { %2389 = vmatpush.msra.mxu2 %v2355_v35  ;;  %v2357_v0 = vsel %vm1814_vm3, %v2337_v51, %v2356_v49  ;;  %v2333_v52 = vsel %vm1814_vm3, %v2301_v1, %v2332_v11  ;;  %v2318_v16 = vrot.slane %v2281_v12, 4 }
 0xc85   :  { %2116 = vxpose.xlu1.b32.start.end [1/1] (short) (narrow) %v1923_v20, 8  ;;  %2412 = vmatpush.msra.mxu3 %v2357_v0  ;;  %v2341_v5 = vperm.slane %v2333_v52, %v3729_v50  ;;  %v2309_v40 = vsel %vm1814_vm3, %v2277_v23, %v2308_v15  ;;  %v2343_v17 = vsel %vm1814_vm3, %v2342_v14, %v2293_v13  ;;  %v2320_v57 = vrot.slane %v2269_v55, 4 }
 0xc86   :  { %v2317_v25 = vperm.slane %v2309_v40, %v3729_v50  ;;  %v2349_v19 = vperm.slane %v2343_v17, %v3729_v50  ;;  %v2319_v20 = vsel %vm1814_vm3, %v2318_v16, %v2269_v55 }
 0xc87   :  { %2084 = vxpose.xlu2.b32.start.end [1/1] (short) (narrow) %v1921_v31, 8  ;;  %1924 = vxpose.xlu0.b32.start.end [1/1] (short) (narrow) %v1911_v36, 8  ;;  %v2358_v7 = vrot.slane %v2341_v5, 4  ;;  %v2325_v22 = vperm.slane %v2319_v20, %v3729_v50  ;;  %v2344_v36 = vrot.slane %v2293_v13, 4  ;;  %v2321_v33 = vsel %vm1814_vm3, %v2281_v12, %v2320_v57 }
 0xc88   :  { %v2360_v6 = vrot.slane %v2317_v25, 4  ;;  %v2362_v31 = vrot.slane %v2349_v19, 4  ;;  %v2329_v61 = vperm.slane %v2321_v33, %v3729_v50 }
 0xc89   :  { %v2359_v9 = vsel %vm1814_vm3, %v2358_v7, %v2317_v25  ;;  %v2345_v32 = vsel %vm1814_vm3, %v2305_v63, %v2344_v36  ;;  %v2364_v1 = vrot.slane %v2325_v22, 4 }
 0xc8a   :  { %2435 = vmatpush.msra.mxu0 %v2359_v9  ;;  %v2361_v2 = vsel %vm1814_vm3, %v2341_v5, %v2360_v6  ;;  %v2353_v34 = vperm.slane %v2345_v32, %v3729_v50  ;;  %v2368_v42 = vrot.slane %v2329_v61, 4 }
 0xc8b   :  { %2458 = vmatpush.msrb.mxu2 %v2361_v2  ;;  %v2365_v4 = vsel %vm1814_vm3, %v2349_v19, %v2364_v1 }
 0xc8c   :  { %v2366_v41 = vrot.slane %v2353_v34, 4  ;;  %v2369_v26 = vsel %vm1814_vm3, %v2353_v34, %v2368_v42  ;;  %2504 = vmatpush.msrb.mxu0 %v2365_v4 }
 0xc8d   :  { %2052 = vxpose.xlu1.b32.start.end [1/1] (short) (narrow) %v1919_v30, 8  ;;  %v2363_v30 = vsel %vm1814_vm3, %v2362_v31, %v2325_v22 }
 0xc8e   :  { %2481 = vmatpush.msrb.mxu3 %v2363_v30  ;;  %v2367_v46 = vsel %vm1814_vm3, %v2366_v41, %v2329_v61 }
 0xd18   :  { %v1972_v28 = vpop.trf.xlu2 }
 0xd19   :  { %v2162_v38 = vrot.slane %v1972_v28, 4 }
 0xd20   :  { %v2100_v59 = vpop.trf.xlu2 }
 0xd21   :  { %v2036_v62 = vpop.trf.xlu1  ;;  %v2184_v44 = vrot.slane %v2100_v59, 4  ;;  %v2189_v21 = vperm.slane %v2100_v59, %v3716_v8 }
 0xd22   :  { %v2160_v39 = vrot.slane %v2036_v62, 4  ;;  %v2163_v43 = vsel %vm1814_vm3, %v2036_v62, %v2162_v38 }
 0xd23   :  { %v2004_v58 = vpop.trf.xlu0  ;;  %v2185_v24 = vsel %vm1814_vm3, 0.0, %v2184_v44  ;;  %v2218_v35 = vrot.slane %v2189_v21, 4  ;;  %v2171_v14 = vperm.slane %v2163_v43, %v3716_v8 }
 0xd24   :  { %v2161_v3 = vsel %vm1814_vm3, %v2160_v39, %v1972_v28  ;;  %v2148_v29 = vrot.slane %v2004_v58, 4  ;;  %v2193_v60 = vperm.slane %v2185_v24, %v3716_v8 }
 0xd25   :  { %v2167_v45 = vperm.slane %v2161_v3, %v3716_v8  ;;  %v2206_v20 = vrot.slane %v2171_v14, 4 }
 0xd26   :  { %v2230_v10 = vrot.slane %v2193_v60, 4 }
 0xd27   :  { %v2194_v18 = vrot.slane %v2167_v45, 4 }
 0xd29   :  { %v2132_v23 = vpop.trf.xlu1 }
 0xd2a   :  { %v2172_v54 = vrot.slane %v2132_v23, 4 }
 0xd2b   :  { %v1940_v27 = vpop.trf.xlu0 }
 0xd2c   :  { %v2149_v48 = vsel %vm1814_vm3, %v2148_v29, %v1940_v27  ;;  %v2150_v56 = vrot.slane %v1940_v27, 4 }
 0xd2d   :  { %v2155_v51 = vperm.slane %v2149_v48, %v3716_v8 }
 0xd2e   :  { %v2151_v12 = vsel %vm1814_vm3, %v2004_v58, %v2150_v56 }
 0xd2f   :  { %v2195_v53 = vsel %vm1814_vm3, %v2194_v18, %v2155_v51  ;;  %v2196_v47 = vrot.slane %v2155_v51, 4  ;;  %v2159_v25 = vperm.slane %v2151_v12, %v3716_v8 }
 0xd30   :  { %v2201_v63 = vperm.slane %v2195_v53, %v3729_v50 }
 0xd31   :  { %v2068_v49 = vpop.trf.xlu1  ;;  %v2197_v7 = vsel %vm1814_vm3, %v2167_v45, %v2196_v47  ;;  %v2207_v36 = vsel %vm1814_vm3, %v2206_v20, %v2159_v25  ;;  %v2208_v2 = vrot.slane %v2159_v25, 4 }
 0xd32   :  { %v2173_v0 = vsel %vm1814_vm3, %v2172_v54, %v2068_v49  ;;  %v2174_v37 = vrot.slane %v2068_v49, 4  ;;  %v2244_v40 = vrot.slane %v2201_v63, 4  ;;  %v2213_v57 = vperm.slane %v2207_v36, %v3729_v50 }
 0xd33   :  { %v2179_v11 = vperm.slane %v2173_v0, %v3716_v8  ;;  %v2209_v58 = vsel %vm1814_vm3, %v2171_v14, %v2208_v2 }
 0xd34   :  { %v2175_v13 = vsel %vm1814_vm3, %v2132_v23, %v2174_v37  ;;  %v2252_v34 = vrot.slane %v2213_v57, 4  ;;  %v2217_v3 = vperm.slane %v2209_v58, %v3729_v50 }
 0xd35   :  { %v2183_v15 = vperm.slane %v2175_v13, %v3716_v8  ;;  %v2219_v52 = vsel %vm1814_vm3, %v2218_v35, %v2179_v11  ;;  %v2220_v55 = vrot.slane %v2179_v11, 4  ;;  %v2205_v8 = vperm.slane %v2197_v7, %v3729_v50 }
 0xd36   :  { %v2225_v5 = vperm.slane %v2219_v52, %v3729_v50  ;;  %v2256_v42 = vrot.slane %v2217_v3, 4 }
 0xd37   :  { %v2221_v16 = vsel %vm1814_vm3, %v2189_v21, %v2220_v55  ;;  %v2231_v17 = vsel %vm1814_vm3, %v2230_v10, %v2183_v15  ;;  %v2232_v30 = vrot.slane %v2183_v15, 4  ;;  %v2248_v59 = vrot.slane %v2205_v8, 4 }
 0xd38   :  { %v2229_v19 = vperm.slane %v2221_v16, %v3729_v50  ;;  %v2237_v28 = vperm.slane %v2231_v17, %v3729_v50  ;;  %v2245_v9 = vsel %vm1814_vm3, %v2225_v5, %v2244_v40  ;;  %v2242_v6 = vrot.slane %v2225_v5, 4 }
 0xd39   :  { %2708 = vmatmul.msk.f32.vlgmr.msra.gmra.mxu3 %vm2370_vm8, %v2245_v9  ;;  %v2233_v32 = vsel %vm1814_vm3, %v2193_v60, %v2232_v30 }
 0xd3a   :  { %v2243_v22 = vsel %vm1814_vm3, %v2242_v6, %v2201_v63  ;;  %v2246_v31 = vrot.slane %v2229_v19, 4  ;;  %2550 = vmatpush.msra.mxu3 %v2369_v26  ;;  %v2250_v39 = vrot.slane %v2237_v28, 4  ;;  %v2249_v61 = vsel %vm1814_vm3, %v2229_v19, %v2248_v59 }
 0xd3b   :  { %2707 = vmatmul.msk.f32.vlgmr.msra.gmra.mxu2 %vm2370_vm8, %v2243_v22  ;;  %v2241_v1 = vperm.slane %v2233_v32, %v3729_v50  ;;  %v2253_v41 = vsel %vm1814_vm3, %v2237_v28, %v2252_v34 }
 0xd3c   :  { %v2247_v62 = vsel %vm1814_vm3, %v2246_v31, %v2205_v8  ;;  %2527 = vmatpush.msra.mxu2 %v2367_v46  ;;  %v2251_v33 = vsel %vm1814_vm3, %v2250_v39, %v2213_v57 }
 0xd3d   :  { %2709 = vmatmul.msk.f32.vlgmr.msra.gmra.mxu0 %vm2370_vm8, %v2247_v62  ;;  %v2254_v29 = vrot.slane %v2241_v1, 4  ;;  %v2257_v44 = vsel %vm1814_vm3, %v2241_v1, %v2256_v42 }
 0xd3f   :  { %v2255_v4 = vsel %vm1814_vm3, %v2254_v29, %v2217_v3 }
 0xd41   :  { %2711 = vmatmul.msk.f32.vlgmr.msrb.gmra.mxu3 %vm2370_vm8, %v2251_v33 }
 0xd43   :  { %2710 = vmatmul.msk.f32.vlgmr.msrb.gmra.mxu2 %vm2370_vm8, %v2249_v61 }
 0xd45   :  { %2712 = vmatmul.msk.f32.vlgmr.msrb.gmra.mxu0 %vm2370_vm8, %v2253_v41 }
 0xd49   :  { %2714 = vmatmul.msk.f32.vlgmr.msra.gmra.mxu3 %vm2370_vm8, %v2257_v44 }
 0xd4b   :  { %2713 = vmatmul.msk.f32.vlgmr.msra.gmra.mxu2 %vm2370_vm8, %v2255_v4 }
 0xdba   :  { %v2437_v45 = vpop.f32.mrf.mxu0 }
 0xdbb   :  { %2558 = vst.msk [vmem:[%s3882_s6 + $0x10] sm:$0x7f] %vm2555_vm13, %v2437_v45 }
 0xdbc   :  { %v2414_v50 = vpop.f32.mrf.mxu3 }
 0xdbd   :  { %2557 = vst.msk [vmem:[%s3882_s6 + $0x8] sm:$0x7f] %vm2555_vm13, %v2414_v50 }
 0xdbe   :  { %v2391_v23 = vpop.f32.mrf.mxu2 }
 0xdbf   :  { %2556 = vst.msk [vmem:[%s3882_s6] sm:$0x7f] %vm2555_vm13, %v2391_v23 }
 0xdc2   :  { %v2506_v46 = vpop.f32.mrf.mxu0 }
 0xdc3   :  { %2561 = vst.msk [vmem:[%s3882_s6 + $0x28] sm:$0x7f] %vm2555_vm13, %v2506_v46 }
 0xdc4   :  { %v2483_v26 = vpop.f32.mrf.mxu3 }
 0xdc5   :  { %2560 = vst.msk [vmem:[%s3882_s6 + $0x20] sm:$0x7f] %vm2555_vm13, %v2483_v26 }
 0xdc6   :  { %v2460_v27 = vpop.f32.mrf.mxu2 }
 0xdc7   :  { %2559 = vst.msk [vmem:[%s3882_s6 + $0x18] sm:$0x7f] %vm2555_vm13, %v2460_v27 }
 0xdcc   :  { %v2552_v48 = vpop.f32.mrf.mxu3 }
 0xdcd   :  { %2563 = vst.msk [vmem:[%s3882_s6 + $0x38] sm:$0x7f] %vm2555_vm13, %v2552_v48 }
 0xdce   :  { %v2529_v24 = vpop.f32.mrf.mxu2 }
 0xdcf   :  { %2562 = vst.msk [vmem:[%s3882_s6 + $0x30] sm:$0x7f] %vm2555_vm13, %v2529_v24 }
 0xdd0   :  { %2568 = vsyncpa [#allocation5], 1 }
 0xdd1   :  { %2569 = vsyncpa [#allocation7], 1 }
 0xdd2   :  { %2570 = vsyncpa [#allocation10], 1 }

</bundles_post_ra>
